<compile_context>
chip_gen: v6e
topology: v6e:2x2x1
jax: 0.10.0
libtpu: 0.0.40
codegen_flags: <defaults>
</compile_context>

<pallas_src>
import functools

import numpy as np
import jax
import jax.numpy as jnp
from jax.experimental import pallas as pl
from jax.experimental.pallas import tpu as pltpu


# ---------------------------------------------------------------------------
# Fused forward kernel (one grid step == `bn` images).
# ---------------------------------------------------------------------------
def _lenet_kernel(x_ref,                          # (bn*32, 128) bf16  rows=(n,h), lanes=w*4+c
                  c1w_ref, c1b_ref,               # (5,128,256) bf16, (1,256) f32
                  c2w_ref, c2b_ref,               # (5,128,256) bf16, (1,256) f32
                  f1w_ref, f1b_ref,               # (5,128,128) bf16, (1,128) f32
                  f2w_ref, f2b_ref,               # (128,128) bf16,   (1,128) f32
                  f3w_ref, f3b_ref,               # (128,128) bf16,   (1,128) f32
                  o_ref,                          # (bn, 128) f32 lane-dense logits
                  xs_ref, a1_ref, p1_ref,         # scratch (see wrapper)
                  s2_ref, a2_ref, p2_ref, z_ref,
                  *, bn):
    f32, bf16 = jnp.float32, jnp.bfloat16
    R1 = bn * 32          # conv1 row space:  row = n*32 + oh
    R2 = bn * 16          # pooled-1 / conv2: row = n*16 + h
    R3 = bn * 8           # pooled-2:         row = n*8  + ph

    # Zero the 8 conv-overshoot rows ONCE: scratch persists across grid steps
    # and rows [R, R+8) are never written again.  (Even if a second TensorCore
    # never runs program 0, un-zeroed overshoot only feeds garbage rows that
    # are never consumed -- see the invariant in the header.)
    @pl.when(pl.program_id(0) == 0)
    def _init():
        xs_ref[pl.ds(R1, 8), :] = jnp.zeros((8, 128), f32)
        s2_ref[pl.ds(R2, 8), :] = jnp.zeros((8, 128), f32)

    # Stage the (unpadded) input block so the row-shifted conv1 operands are
    # plain in-bounds ref slices -- no host-side 8-row pad needed.
    xs_ref[pl.ds(0, R1), :] = x_ref[...].astype(f32)

    # ---- conv1: 5 shifted-row banded matmuls, bf16 x bf16 -> f32, accumulated
    #      in a VMEM scratch ref so no (R1,256) f32 value lives in vregs. ----
    # output lane = a*128 + pw*8 + oc  with ow = 2*pw + a  (lane-dense: 256)
    a1_ref[...] = jnp.dot(xs_ref[pl.ds(0, R1), :].astype(bf16), c1w_ref[0],
                          preferred_element_type=f32)
    for di in range(1, 5):
        a1_ref[...] += jnp.dot(xs_ref[pl.ds(di, R1), :].astype(bf16),
                               c1w_ref[di], preferred_element_type=f32)

    # bias + relu + 2x2 width-pool (max of aligned lane halves), 64-row chunks.
    rc1 = min(64, R1)
    for r0 in range(0, R1, rc1):
        v = jnp.maximum(a1_ref[pl.ds(r0, rc1), :] + c1b_ref[...], 0.0)
        p1_ref[pl.ds(r0, rc1), :] = jnp.maximum(v[:, :128], v[:, 128:])

    # 2x2 height-pool: strided sublane reads + VPU max (no selection matmuls).
    s2_ref[pl.ds(0, R2), :] = jnp.maximum(p1_ref[pl.ds(0, R2, stride=2), :],
                                          p1_ref[pl.ds(1, R2, stride=2), :])

    # ---- conv2: same banded scheme (output lanes a*128 + pw2*16 + oc). ----
    a2_ref[...] = jnp.dot(s2_ref[pl.ds(0, R2), :].astype(bf16), c2w_ref[0],
                          preferred_element_type=f32)
    for di in range(1, 5):
        a2_ref[...] += jnp.dot(s2_ref[pl.ds(di, R2), :].astype(bf16),
                               c2w_ref[di], preferred_element_type=f32)

    rc2 = min(64, R2)
    for r0 in range(0, R2, rc2):
        v = jnp.maximum(a2_ref[pl.ds(r0, rc2), :] + c2b_ref[...], 0.0)
        p2_ref[pl.ds(r0, rc2), :] = jnp.maximum(v[:, :128], v[:, 128:])

    # height-pool #2: z row = n*8 + ph2 (image-major), lanes = pw2*16 + oc.
    z_ref[...] = jnp.maximum(p2_ref[pl.ds(0, R3, stride=2), :],
                             p2_ref[pl.ds(1, R3, stride=2), :])

    # ---- fc1: PyTorch C-major flatten folded into per-row weight slabs;
    #      each slab's LHS is a stride-8 row gather (one row per image). ----
    h = jnp.dot(z_ref[pl.ds(0, bn, stride=8), :].astype(bf16), f1w_ref[0],
                preferred_element_type=f32)
    for p in range(1, 5):
        h = h + jnp.dot(z_ref[pl.ds(p, bn, stride=8), :].astype(bf16),
                        f1w_ref[p], preferred_element_type=f32)
    h = jnp.maximum(h + f1b_ref[...], 0.0)

    # ---- fc2 / fc3 (elementwise stays f32; only MXU operands are bf16). ----
    h = jnp.maximum(jnp.dot(h.astype(bf16), f2w_ref[...],
                            preferred_element_type=f32) + f2b_ref[...], 0.0)
    o_ref[...] = jnp.dot(h.astype(bf16), f3w_ref[...],
                         preferred_element_type=f32) + f3b_ref[...]


# ---------------------------------------------------------------------------
# One-time weight packing (PyTorch-convention params -> lane-dense matrices).
# Packed weights are bf16 (MXU-native); biases stay f32.  bn-independent.
# ---------------------------------------------------------------------------
def pack_params(params, *, num_classes=10):
    w1 = np.asarray(params["conv1_w"], np.float32)   # (6, 3, 5, 5)
    b1 = np.asarray(params["conv1_b"], np.float32)
    w2 = np.asarray(params["conv2_w"], np.float32)   # (16, 6, 5, 5)
    b2 = np.asarray(params["conv2_b"], np.float32)
    fw1 = np.asarray(params["fc1_w"], np.float32)    # (120, 400)
    fb1 = np.asarray(params["fc1_b"], np.float32)
    fw2 = np.asarray(params["fc2_w"], np.float32)    # (84, 120)
    fb2 = np.asarray(params["fc2_b"], np.float32)
    fw3 = np.asarray(params["fc3_w"], np.float32)    # (nc, 84)
    fb3 = np.asarray(params["fc3_b"], np.float32)
    nc = fw3.shape[0]
    assert nc == num_classes and nc <= 128

    # conv1 banded weights: input lane = w*4 + c (w<32, c<3),
    # output lane = a*128 + pw*8 + oc with ow = 2*pw + a (ow<28, oc<6).
    c1m = np.zeros((5, 128, 256), np.float32)
    c1v = np.zeros((1, 256), np.float32)
    for di in range(5):
        for dj in range(5):
            for pw in range(14):
                for a in range(2):
                    w_in = 2 * pw + a + dj
                    lo = a * 128 + pw * 8
                    for c in range(3):
                        c1m[di, w_in * 4 + c, lo:lo + 6] = w1[:, c, di, dj]
    for pw in range(14):
        for a in range(2):
            c1v[0, a * 128 + pw * 8: a * 128 + pw * 8 + 6] = b1

    # conv2 banded weights: input lane = w*8 + c (w<14, c<6),
    # output lane = a*128 + pw2*16 + oc with ow2 = 2*pw2 + a (ow2<10, oc<16).
    c2m = np.zeros((5, 128, 256), np.float32)
    c2v = np.zeros((1, 256), np.float32)
    for di in range(5):
        for dj in range(5):
            for pw in range(5):
                for a in range(2):
                    w_in = 2 * pw + a + dj
                    lo = a * 128 + pw * 16
                    for c in range(6):
                        c2m[di, w_in * 8 + c, lo:lo + 16] = w2[:, c, di, dj]
    for pw in range(5):
        for a in range(2):
            c2v[0, a * 128 + pw * 16: a * 128 + pw * 16 + 16] = b2

    # fc1 with the (C, H, W) flatten folded in: contraction rows are the
    # pooled conv2 heights (ph2), lanes are pw2*16 + oc.
    f1m = np.zeros((5, 128, 128), np.float32)
    for ph in range(5):
        for pw in range(5):
            for oc in range(16):
                f1m[ph, pw * 16 + oc, :120] = fw1[:, oc * 25 + ph * 5 + pw]
    f1v = np.zeros((1, 128), np.float32); f1v[0, :120] = fb1
    f2m = np.zeros((128, 128), np.float32); f2m[:120, :84] = fw2.T
    f2v = np.zeros((1, 128), np.float32); f2v[0, :84] = fb2
    f3m = np.zeros((128, 128), np.float32); f3m[:84, :nc] = fw3.T
    f3v = np.zeros((1, 128), np.float32); f3v[0, :nc] = fb3

    bf = jnp.bfloat16
    return (jnp.asarray(c1m, bf), jnp.asarray(c1v),
            jnp.asarray(c2m, bf), jnp.asarray(c2v),
            jnp.asarray(f1m, bf), jnp.asarray(f1v),
            jnp.asarray(f2m, bf), jnp.asarray(f2v),
            jnp.asarray(f3m, bf), jnp.asarray(f3v))


# ---------------------------------------------------------------------------
# Forward wrapper: one fused pallas_call, batch-tiled "parallel" grid.
# ---------------------------------------------------------------------------
def lenet_forward(x, packed, *, num_classes=10, block_n=8):
    """x: (N, 3, 32, 32) float32, NCHW (PyTorch convention)."""
    N, C, H, W = x.shape
    assert (C, H, W) == (3, 32, 32), "fused kernel is specialized to 3x32x32"
    bn = int(block_n)
    assert bn in (1, 2, 4, 8, 16)          # keeps the chunked epilogues exact
    n_pad = (-N) % bn
    if n_pad:
        x = jnp.pad(x, ((0, n_pad), (0, 0), (0, 0), (0, 0)))
    nb = (N + n_pad) // bn                 # pick bn so nb >= 2 on v7x (2 TCs)

    # NCHW -> lane-dense rows: row = (image, h), lane = w*4 + c (c padded 3->4),
    # cast to bf16 (MXU operand dtype) to halve the input DMA.  One fused XLA
    # relayout pass; no per-block row padding (handled in-kernel).
    xr = jnp.pad(x.transpose(0, 2, 3, 1), ((0, 0), (0, 0), (0, 0), (0, 1)))
    xr = xr.reshape(nb, bn * 32, 128).astype(jnp.bfloat16)

    def _const_spec(a):
        # Grid-invariant weights: same block every step, so Pallas never
        # re-DMAs them.  (pipeline_mode=pl.Buffered(1) could also single-buffer
        # them, but at ~1.2 MiB total bf16 it is not needed.)
        if a.ndim == 3:
            return pl.BlockSpec(a.shape, lambda i: (0, 0, 0))
        return pl.BlockSpec(a.shape, lambda i: (0, 0))

    in_specs = [pl.BlockSpec((None, bn * 32, 128), lambda i: (i, 0, 0))]
    in_specs += [_const_spec(a) for a in packed]

    out = pl.pallas_call(
        functools.partial(_lenet_kernel, bn=bn),
        out_shape=jax.ShapeDtypeStruct((nb, bn, 128), jnp.float32),
        grid=(nb,),
        in_specs=in_specs,
        out_specs=pl.BlockSpec((None, bn, 128), lambda i: (i, 0, 0)),
        scratch_shapes=[
            pltpu.VMEM((bn * 32 + 8, 128), jnp.float32),   # xs: staged input
            pltpu.VMEM((bn * 32, 256), jnp.float32),       # a1: conv1 acc
            pltpu.VMEM((bn * 32, 128), jnp.float32),       # p1: width-pooled 1
            pltpu.VMEM((bn * 16 + 8, 128), jnp.float32),   # s2: pooled conv1
            pltpu.VMEM((bn * 16, 256), jnp.float32),       # a2: conv2 acc
            pltpu.VMEM((bn * 16, 128), jnp.float32),       # p2: width-pooled 2
            pltpu.VMEM((bn * 8, 128), jnp.float32),        # z : pooled conv2
        ],
        compiler_params=pltpu.CompilerParams(
            dimension_semantics=("parallel",),
            vmem_limit_bytes=32 * 1024 * 1024),
    )(xr, *packed)
    return out.reshape(nb * bn, 128)[:N, :num_classes]


# ---------------------------------------------------------------------------
# Params (PyTorch conventions) and a pure-JAX reference for verification.
# ---------------------------------------------------------------------------
def init_params(key, num_classes=10):
    ks = jax.random.split(key, 10)

    def uinit(k, shape, fan_in):
        bound = 1.0 / (fan_in ** 0.5)
        return jax.random.uniform(k, shape, jnp.float32, -bound, bound)

    return {
        "conv1_w": uinit(ks[0], (6, 3, 5, 5), 3 * 5 * 5),
        "conv1_b": uinit(ks[1], (6,), 3 * 5 * 5),
        "conv2_w": uinit(ks[2], (16, 6, 5, 5), 6 * 5 * 5),
        "conv2_b": uinit(ks[3], (16,), 6 * 5 * 5),
        "fc1_w": uinit(ks[4], (120, 16 * 5 * 5), 16 * 5 * 5),
        "fc1_b": uinit(ks[5], (120,), 16 * 5 * 5),
        "fc2_w": uinit(ks[6], (84, 120), 120),
        "fc2_b": uinit(ks[7], (84,), 120),
        "fc3_w": uinit(ks[8], (num_classes, 84), 84),
        "fc3_b": uinit(ks[9], (84,), 84)[:num_classes] * 0 + uinit(ks[9], (num_classes,), 84),
    }


def lenet_reference(x, params):
    hp = jax.lax.Precision.HIGHEST

    def conv(x, w, b):
        y = jax.lax.conv_general_dilated(
            x, w, window_strides=(1, 1), padding="VALID",
            dimension_numbers=("NCHW", "OIHW", "NCHW"), precision=hp)
        return y + b[None, :, None, None]

    def pool(x):
        return jax.lax.reduce_window(x, -jnp.inf, jax.lax.max,
                                     (1, 1, 2, 2), (1, 1, 2, 2), "VALID")

    out = jax.nn.relu(conv(x, params["conv1_w"], params["conv1_b"]))
    out = pool(out)
    out = jax.nn.relu(conv(out, params["conv2_w"], params["conv2_b"]))
    out = pool(out)                          # (N,16,5,5): adaptive pool is identity
    out = out.reshape(out.shape[0], -1)      # C-major flatten, like .view
    out = jax.nn.relu(jnp.dot(out, params["fc1_w"].T, precision=hp) + params["fc1_b"])
    out = jax.nn.relu(jnp.dot(out, params["fc2_w"].T, precision=hp) + params["fc2_b"])
    return jnp.dot(out, params["fc3_w"].T, precision=hp) + params["fc3_b"]


if __name__ == "__main__":
    key = jax.random.PRNGKey(0)
    k_x, k_x2, k_p = jax.random.split(key, 3)
    params = init_params(k_p, num_classes=10)
    packed = pack_params(params, num_classes=10)

    fwd = jax.jit(functools.partial(lenet_forward, num_classes=10, block_n=8))

    # Small check (exercises batch padding: N=2 -> one bn=8 block).
    x = jax.random.normal(k_x, (2, 3, 32, 32), jnp.float32)
    out = jax.block_until_ready(fwd(x, packed))
    assert out.shape == (2, 10) and out.dtype == jnp.float32
    ref = lenet_reference(x, params)
    np.testing.assert_allclose(np.asarray(out), np.asarray(ref),
                               atol=1e-2, rtol=1e-2)

    # Multi-grid-step check (N=20 -> 3 blocks of 8, pads last block).
    x2 = jax.random.normal(k_x2, (20, 3, 32, 32), jnp.float32)
    out2 = jax.block_until_ready(fwd(x2, packed))
    ref2 = lenet_reference(x2, params)
    np.testing.assert_allclose(np.asarray(out2), np.asarray(ref2),
                               atol=1e-2, rtol=1e-2)

    print("KERNEL_OK")
</pallas_src>

<mosaic_0001>
module attributes {stable_mosaic.version = 11 : i64} {
  func.func @_lenet_kernel(%arg0: i32, %arg1: memref<1x256x128xbf16, #tpu.memory_space<vmem>>, %arg2: memref<5x128x256xbf16, #tpu.memory_space<vmem>>, %arg3: memref<1x256xf32, #tpu.memory_space<vmem>>, %arg4: memref<5x128x256xbf16, #tpu.memory_space<vmem>>, %arg5: memref<1x256xf32, #tpu.memory_space<vmem>>, %arg6: memref<5x128x128xbf16, #tpu.memory_space<vmem>>, %arg7: memref<1x128xf32, #tpu.memory_space<vmem>>, %arg8: memref<128x128xbf16, #tpu.memory_space<vmem>>, %arg9: memref<1x128xf32, #tpu.memory_space<vmem>>, %arg10: memref<128x128xbf16, #tpu.memory_space<vmem>>, %arg11: memref<1x128xf32, #tpu.memory_space<vmem>>, %arg12: memref<1x8x128xf32, #tpu.memory_space<vmem>>, %arg13: memref<264x128xf32, #tpu.memory_space<vmem>>, %arg14: memref<256x256xf32, #tpu.memory_space<vmem>>, %arg15: memref<256x128xf32, #tpu.memory_space<vmem>>, %arg16: memref<136x128xf32, #tpu.memory_space<vmem>>, %arg17: memref<128x256xf32, #tpu.memory_space<vmem>>, %arg18: memref<128x128xf32, #tpu.memory_space<vmem>>, %arg19: memref<64x128xf32, #tpu.memory_space<vmem>>) attributes {dimension_semantics = [#tpu.dimension_semantics<parallel>], iteration_bounds = array<i64: 1>, scalar_prefetch = 0 : i64, scratch_operands = 7 : i64, tpu.core_type = #tpu.core_type<tc>, window_params = [{transform_indices = @transform_0, window_bounds = array<i64: 1, 256, 128>}, {pipeline_mode = #tpu.pipeline_mode<synchronous>, transform_indices = @transform_1, window_bounds = array<i64: 5, 128, 256>}, {pipeline_mode = #tpu.pipeline_mode<synchronous>, transform_indices = @transform_2, window_bounds = array<i64: 1, 256>}, {pipeline_mode = #tpu.pipeline_mode<synchronous>, transform_indices = @transform_3, window_bounds = array<i64: 5, 128, 256>}, {pipeline_mode = #tpu.pipeline_mode<synchronous>, transform_indices = @transform_4, window_bounds = array<i64: 1, 256>}, {pipeline_mode = #tpu.pipeline_mode<synchronous>, transform_indices = @transform_5, window_bounds = array<i64: 5, 128, 128>}, {pipeline_mode = #tpu.pipeline_mode<synchronous>, transform_indices = @transform_6, window_bounds = array<i64: 1, 128>}, {pipeline_mode = #tpu.pipeline_mode<synchronous>, transform_indices = @transform_7, window_bounds = array<i64: 128, 128>}, {pipeline_mode = #tpu.pipeline_mode<synchronous>, transform_indices = @transform_8, window_bounds = array<i64: 1, 128>}, {pipeline_mode = #tpu.pipeline_mode<synchronous>, transform_indices = @transform_9, window_bounds = array<i64: 128, 128>}, {pipeline_mode = #tpu.pipeline_mode<synchronous>, transform_indices = @transform_10, window_bounds = array<i64: 1, 128>}, {transform_indices = @transform_11, window_bounds = array<i64: 1, 8, 128>}]} {
    %c0_i32 = arith.constant 0 : i32
    %0 = arith.cmpi eq, %arg0, %c0_i32 : i32
    %1 = arith.extui %0 : i1 to i32
    %c0_i32_0 = arith.constant 0 : i32
    %2 = arith.cmpi ne, %1, %c0_i32_0 : i32
    scf.if %2 {
      %cst_194 = arith.constant 0.000000e+00 : f32
      %202 = vector.broadcast %cst_194 : f32 to vector<8x128xf32>
      %c256 = arith.constant 256 : index
      %c0_195 = arith.constant 0 : index
      %203 = vector.load %arg13[%c256, %c0_195] : memref<264x128xf32, #tpu.memory_space<vmem>>, vector<8x128xf32>
      tpu.vector_store %arg13[%c256, %c0_195], %202 {strides = array<i32>} : memref<264x128xf32, #tpu.memory_space<vmem>>, vector<8x128xf32>,
      %cst_196 = arith.constant 0.000000e+00 : f32
      %204 = vector.broadcast %cst_196 : f32 to vector<8x128xf32>
      %c128_197 = arith.constant 128 : index
      %c0_198 = arith.constant 0 : index
      %205 = vector.load %arg16[%c128_197, %c0_198] : memref<136x128xf32, #tpu.memory_space<vmem>>, vector<8x128xf32>
      tpu.vector_store %arg16[%c128_197, %c0_198], %204 {strides = array<i32>} : memref<136x128xf32, #tpu.memory_space<vmem>>, vector<8x128xf32>,
    } else {
    }
    %c0 = arith.constant 0 : index
    %c0_1 = arith.constant 0 : index
    %c0_2 = arith.constant 0 : index
    %3 = vector.load %arg1[%c0, %c0_1, %c0_2] : memref<1x256x128xbf16, #tpu.memory_space<vmem>>, vector<1x256x128xbf16>
    %4 = vector.shape_cast %3 : vector<1x256x128xbf16> to vector<256x128xbf16>
    %5 = arith.extf %4 : vector<256x128xbf16> to vector<256x128xf32>
    %c0_3 = arith.constant 0 : index
    %c0_4 = arith.constant 0 : index
    %6 = vector.load %arg13[%c0_3, %c0_4] : memref<264x128xf32, #tpu.memory_space<vmem>>, vector<256x128xf32>
    tpu.vector_store %arg13[%c0_3, %c0_4], %5 {strides = array<i32>} : memref<264x128xf32, #tpu.memory_space<vmem>>, vector<256x128xf32>,
    %c0_5 = arith.constant 0 : index
    %c0_6 = arith.constant 0 : index
    %7 = vector.load %arg13[%c0_5, %c0_6] : memref<264x128xf32, #tpu.memory_space<vmem>>, vector<256x128xf32>
    %8 = arith.truncf %7 : vector<256x128xf32> to vector<256x128xbf16>
    %c0_7 = arith.constant 0 : index
    %c0_8 = arith.constant 0 : index
    %c0_9 = arith.constant 0 : index
    %9 = vector.load %arg2[%c0_7, %c0_8, %c0_9] : memref<5x128x256xbf16, #tpu.memory_space<vmem>>, vector<1x128x256xbf16>
    %10 = vector.shape_cast %9 : vector<1x128x256xbf16> to vector<128x256xbf16>
    %cst = arith.constant dense<0.000000e+00> : vector<256x256xf32>
    %11 = tpu.matmul %8, %10, %cst {dimension_numbers = #tpu.dot_dimension_numbers<[1], [0], [0], [1], [0, 0, 1, 1], [], []>} : vector<256x128xbf16>, vector<128x256xbf16>, vector<256x256xf32> -> vector<256x256xf32>
    %c0_10 = arith.constant 0 : index
    %c0_11 = arith.constant 0 : index
    %12 = vector.load %arg14[%c0_10, %c0_11] : memref<256x256xf32, #tpu.memory_space<vmem>>, vector<256x256xf32>
    tpu.vector_store %arg14[%c0_10, %c0_11], %11 {strides = array<i32>} : memref<256x256xf32, #tpu.memory_space<vmem>>, vector<256x256xf32>,
    %c0_12 = arith.constant 0 : index
    %c0_13 = arith.constant 0 : index
    %13 = vector.load %arg14[%c0_12, %c0_13] : memref<256x256xf32, #tpu.memory_space<vmem>>, vector<256x256xf32>
    %c1 = arith.constant 1 : index
    %c0_14 = arith.constant 0 : index
    %14 = vector.load %arg13[%c1, %c0_14] : memref<264x128xf32, #tpu.memory_space<vmem>>, vector<256x128xf32>
    %15 = arith.truncf %14 : vector<256x128xf32> to vector<256x128xbf16>
    %c1_15 = arith.constant 1 : index
    %c0_16 = arith.constant 0 : index
    %c0_17 = arith.constant 0 : index
    %16 = vector.load %arg2[%c1_15, %c0_16, %c0_17] : memref<5x128x256xbf16, #tpu.memory_space<vmem>>, vector<1x128x256xbf16>
    %17 = vector.shape_cast %16 : vector<1x128x256xbf16> to vector<128x256xbf16>
    %cst_18 = arith.constant dense<0.000000e+00> : vector<256x256xf32>
    %18 = tpu.matmul %15, %17, %cst_18 {dimension_numbers = #tpu.dot_dimension_numbers<[1], [0], [0], [1], [0, 0, 1, 1], [], []>} : vector<256x128xbf16>, vector<128x256xbf16>, vector<256x256xf32> -> vector<256x256xf32>
    %19 = arith.addf %13, %18 : vector<256x256xf32>
    %c0_19 = arith.constant 0 : index
    %c0_20 = arith.constant 0 : index
    %20 = vector.load %arg14[%c0_19, %c0_20] : memref<256x256xf32, #tpu.memory_space<vmem>>, vector<256x256xf32>
    tpu.vector_store %arg14[%c0_19, %c0_20], %19 {strides = array<i32>} : memref<256x256xf32, #tpu.memory_space<vmem>>, vector<256x256xf32>,
    %c0_21 = arith.constant 0 : index
    %c0_22 = arith.constant 0 : index
    %21 = vector.load %arg14[%c0_21, %c0_22] : memref<256x256xf32, #tpu.memory_space<vmem>>, vector<256x256xf32>
    %c2 = arith.constant 2 : index
    %c0_23 = arith.constant 0 : index
    %22 = vector.load %arg13[%c2, %c0_23] : memref<264x128xf32, #tpu.memory_space<vmem>>, vector<256x128xf32>
    %23 = arith.truncf %22 : vector<256x128xf32> to vector<256x128xbf16>
    %c2_24 = arith.constant 2 : index
    %c0_25 = arith.constant 0 : index
    %c0_26 = arith.constant 0 : index
    %24 = vector.load %arg2[%c2_24, %c0_25, %c0_26] : memref<5x128x256xbf16, #tpu.memory_space<vmem>>, vector<1x128x256xbf16>
    %25 = vector.shape_cast %24 : vector<1x128x256xbf16> to vector<128x256xbf16>
    %cst_27 = arith.constant dense<0.000000e+00> : vector<256x256xf32>
    %26 = tpu.matmul %23, %25, %cst_27 {dimension_numbers = #tpu.dot_dimension_numbers<[1], [0], [0], [1], [0, 0, 1, 1], [], []>} : vector<256x128xbf16>, vector<128x256xbf16>, vector<256x256xf32> -> vector<256x256xf32>
    %27 = arith.addf %21, %26 : vector<256x256xf32>
    %c0_28 = arith.constant 0 : index
    %c0_29 = arith.constant 0 : index
    %28 = vector.load %arg14[%c0_28, %c0_29] : memref<256x256xf32, #tpu.memory_space<vmem>>, vector<256x256xf32>
    tpu.vector_store %arg14[%c0_28, %c0_29], %27 {strides = array<i32>} : memref<256x256xf32, #tpu.memory_space<vmem>>, vector<256x256xf32>,
    %c0_30 = arith.constant 0 : index
    %c0_31 = arith.constant 0 : index
    %29 = vector.load %arg14[%c0_30, %c0_31] : memref<256x256xf32, #tpu.memory_space<vmem>>, vector<256x256xf32>
    %c3 = arith.constant 3 : index
    %c0_32 = arith.constant 0 : index
    %30 = vector.load %arg13[%c3, %c0_32] : memref<264x128xf32, #tpu.memory_space<vmem>>, vector<256x128xf32>
    %31 = arith.truncf %30 : vector<256x128xf32> to vector<256x128xbf16>
    %c3_33 = arith.constant 3 : index
    %c0_34 = arith.constant 0 : index
    %c0_35 = arith.constant 0 : index
    %32 = vector.load %arg2[%c3_33, %c0_34, %c0_35] : memref<5x128x256xbf16, #tpu.memory_space<vmem>>, vector<1x128x256xbf16>
    %33 = vector.shape_cast %32 : vector<1x128x256xbf16> to vector<128x256xbf16>
    %cst_36 = arith.constant dense<0.000000e+00> : vector<256x256xf32>
    %34 = tpu.matmul %31, %33, %cst_36 {dimension_numbers = #tpu.dot_dimension_numbers<[1], [0], [0], [1], [0, 0, 1, 1], [], []>} : vector<256x128xbf16>, vector<128x256xbf16>, vector<256x256xf32> -> vector<256x256xf32>
    %35 = arith.addf %29, %34 : vector<256x256xf32>
    %c0_37 = arith.constant 0 : index
    %c0_38 = arith.constant 0 : index
    %36 = vector.load %arg14[%c0_37, %c0_38] : memref<256x256xf32, #tpu.memory_space<vmem>>, vector<256x256xf32>
    tpu.vector_store %arg14[%c0_37, %c0_38], %35 {strides = array<i32>} : memref<256x256xf32, #tpu.memory_space<vmem>>, vector<256x256xf32>,
    %c0_39 = arith.constant 0 : index
    %c0_40 = arith.constant 0 : index
    %37 = vector.load %arg14[%c0_39, %c0_40] : memref<256x256xf32, #tpu.memory_space<vmem>>, vector<256x256xf32>
    %c4 = arith.constant 4 : index
    %c0_41 = arith.constant 0 : index
    %38 = vector.load %arg13[%c4, %c0_41] : memref<264x128xf32, #tpu.memory_space<vmem>>, vector<256x128xf32>
    %39 = arith.truncf %38 : vector<256x128xf32> to vector<256x128xbf16>
    %c4_42 = arith.constant 4 : index
    %c0_43 = arith.constant 0 : index
    %c0_44 = arith.constant 0 : index
    %40 = vector.load %arg2[%c4_42, %c0_43, %c0_44] : memref<5x128x256xbf16, #tpu.memory_space<vmem>>, vector<1x128x256xbf16>
    %41 = vector.shape_cast %40 : vector<1x128x256xbf16> to vector<128x256xbf16>
    %cst_45 = arith.constant dense<0.000000e+00> : vector<256x256xf32>
    %42 = tpu.matmul %39, %41, %cst_45 {dimension_numbers = #tpu.dot_dimension_numbers<[1], [0], [0], [1], [0, 0, 1, 1], [], []>} : vector<256x128xbf16>, vector<128x256xbf16>, vector<256x256xf32> -> vector<256x256xf32>
    %43 = arith.addf %37, %42 : vector<256x256xf32>
    %c0_46 = arith.constant 0 : index
    %c0_47 = arith.constant 0 : index
    %44 = vector.load %arg14[%c0_46, %c0_47] : memref<256x256xf32, #tpu.memory_space<vmem>>, vector<256x256xf32>
    tpu.vector_store %arg14[%c0_46, %c0_47], %43 {strides = array<i32>} : memref<256x256xf32, #tpu.memory_space<vmem>>, vector<256x256xf32>,
    %c0_48 = arith.constant 0 : index
    %c0_49 = arith.constant 0 : index
    %45 = vector.load %arg14[%c0_48, %c0_49] : memref<256x256xf32, #tpu.memory_space<vmem>>, vector<64x256xf32>
    %c0_50 = arith.constant 0 : index
    %c0_51 = arith.constant 0 : index
    %46 = vector.load %arg3[%c0_50, %c0_51] : memref<1x256xf32, #tpu.memory_space<vmem>>, vector<1x256xf32>
    %47 = vector.broadcast %46 : vector<1x256xf32> to vector<64x256xf32>
    %48 = arith.addf %45, %47 : vector<64x256xf32>
    %cst_52 = arith.constant 0.000000e+00 : f32
    %49 = vector.broadcast %cst_52 : f32 to vector<64x256xf32>
    %50 = arith.maximumf %48, %49 : vector<64x256xf32>
    %51 = vector.extract_strided_slice %50 {offsets = [0, 0], sizes = [64, 128], strides = [1, 1]} : vector<64x256xf32> to vector<64x128xf32>
    %52 = vector.extract_strided_slice %50 {offsets = [0, 128], sizes = [64, 128], strides = [1, 1]} : vector<64x256xf32> to vector<64x128xf32>
    %53 = arith.maximumf %51, %52 : vector<64x128xf32>
    %c0_53 = arith.constant 0 : index
    %c0_54 = arith.constant 0 : index
    %54 = vector.load %arg15[%c0_53, %c0_54] : memref<256x128xf32, #tpu.memory_space<vmem>>, vector<64x128xf32>
    tpu.vector_store %arg15[%c0_53, %c0_54], %53 {strides = array<i32>} : memref<256x128xf32, #tpu.memory_space<vmem>>, vector<64x128xf32>,
    %c64 = arith.constant 64 : index
    %c0_55 = arith.constant 0 : index
    %55 = vector.load %arg14[%c64, %c0_55] : memref<256x256xf32, #tpu.memory_space<vmem>>, vector<64x256xf32>
    %c0_56 = arith.constant 0 : index
    %c0_57 = arith.constant 0 : index
    %56 = vector.load %arg3[%c0_56, %c0_57] : memref<1x256xf32, #tpu.memory_space<vmem>>, vector<1x256xf32>
    %57 = vector.broadcast %56 : vector<1x256xf32> to vector<64x256xf32>
    %58 = arith.addf %55, %57 : vector<64x256xf32>
    %cst_58 = arith.constant 0.000000e+00 : f32
    %59 = vector.broadcast %cst_58 : f32 to vector<64x256xf32>
    %60 = arith.maximumf %58, %59 : vector<64x256xf32>
    %61 = vector.extract_strided_slice %60 {offsets = [0, 0], sizes = [64, 128], strides = [1, 1]} : vector<64x256xf32> to vector<64x128xf32>
    %62 = vector.extract_strided_slice %60 {offsets = [0, 128], sizes = [64, 128], strides = [1, 1]} : vector<64x256xf32> to vector<64x128xf32>
    %63 = arith.maximumf %61, %62 : vector<64x128xf32>
    %c64_59 = arith.constant 64 : index
    %c0_60 = arith.constant 0 : index
    %64 = vector.load %arg15[%c64_59, %c0_60] : memref<256x128xf32, #tpu.memory_space<vmem>>, vector<64x128xf32>
    tpu.vector_store %arg15[%c64_59, %c0_60], %63 {strides = array<i32>} : memref<256x128xf32, #tpu.memory_space<vmem>>, vector<64x128xf32>,
    %c128 = arith.constant 128 : index
    %c0_61 = arith.constant 0 : index
    %65 = vector.load %arg14[%c128, %c0_61] : memref<256x256xf32, #tpu.memory_space<vmem>>, vector<64x256xf32>
    %c0_62 = arith.constant 0 : index
    %c0_63 = arith.constant 0 : index
    %66 = vector.load %arg3[%c0_62, %c0_63] : memref<1x256xf32, #tpu.memory_space<vmem>>, vector<1x256xf32>
    %67 = vector.broadcast %66 : vector<1x256xf32> to vector<64x256xf32>
    %68 = arith.addf %65, %67 : vector<64x256xf32>
    %cst_64 = arith.constant 0.000000e+00 : f32
    %69 = vector.broadcast %cst_64 : f32 to vector<64x256xf32>
    %70 = arith.maximumf %68, %69 : vector<64x256xf32>
    %71 = vector.extract_strided_slice %70 {offsets = [0, 0], sizes = [64, 128], strides = [1, 1]} : vector<64x256xf32> to vector<64x128xf32>
    %72 = vector.extract_strided_slice %70 {offsets = [0, 128], sizes = [64, 128], strides = [1, 1]} : vector<64x256xf32> to vector<64x128xf32>
    %73 = arith.maximumf %71, %72 : vector<64x128xf32>
    %c128_65 = arith.constant 128 : index
    %c0_66 = arith.constant 0 : index
    %74 = vector.load %arg15[%c128_65, %c0_66] : memref<256x128xf32, #tpu.memory_space<vmem>>, vector<64x128xf32>
    tpu.vector_store %arg15[%c128_65, %c0_66], %73 {strides = array<i32>} : memref<256x128xf32, #tpu.memory_space<vmem>>, vector<64x128xf32>,
    %c192 = arith.constant 192 : index
    %c0_67 = arith.constant 0 : index
    %75 = vector.load %arg14[%c192, %c0_67] : memref<256x256xf32, #tpu.memory_space<vmem>>, vector<64x256xf32>
    %c0_68 = arith.constant 0 : index
    %c0_69 = arith.constant 0 : index
    %76 = vector.load %arg3[%c0_68, %c0_69] : memref<1x256xf32, #tpu.memory_space<vmem>>, vector<1x256xf32>
    %77 = vector.broadcast %76 : vector<1x256xf32> to vector<64x256xf32>
    %78 = arith.addf %75, %77 : vector<64x256xf32>
    %cst_70 = arith.constant 0.000000e+00 : f32
    %79 = vector.broadcast %cst_70 : f32 to vector<64x256xf32>
    %80 = arith.maximumf %78, %79 : vector<64x256xf32>
    %81 = vector.extract_strided_slice %80 {offsets = [0, 0], sizes = [64, 128], strides = [1, 1]} : vector<64x256xf32> to vector<64x128xf32>
    %82 = vector.extract_strided_slice %80 {offsets = [0, 128], sizes = [64, 128], strides = [1, 1]} : vector<64x256xf32> to vector<64x128xf32>
    %83 = arith.maximumf %81, %82 : vector<64x128xf32>
    %c192_71 = arith.constant 192 : index
    %c0_72 = arith.constant 0 : index
    %84 = vector.load %arg15[%c192_71, %c0_72] : memref<256x128xf32, #tpu.memory_space<vmem>>, vector<64x128xf32>
    tpu.vector_store %arg15[%c192_71, %c0_72], %83 {strides = array<i32>} : memref<256x128xf32, #tpu.memory_space<vmem>>, vector<64x128xf32>,
    %c0_73 = arith.constant 0 : index
    %c0_74 = arith.constant 0 : index
    %85 = tpu.strided_load %arg15[%c0_73, %c0_74] {strides = array<i32: 2, 1>} : memref<256x128xf32, #tpu.memory_space<vmem>>, vector<128x128xf32>
    %c1_75 = arith.constant 1 : index
    %c0_76 = arith.constant 0 : index
    %86 = tpu.strided_load %arg15[%c1_75, %c0_76] {strides = array<i32: 2, 1>} : memref<256x128xf32, #tpu.memory_space<vmem>>, vector<128x128xf32>
    %87 = arith.maximumf %85, %86 : vector<128x128xf32>
    %c0_77 = arith.constant 0 : index
    %c0_78 = arith.constant 0 : index
    %88 = vector.load %arg16[%c0_77, %c0_78] : memref<136x128xf32, #tpu.memory_space<vmem>>, vector<128x128xf32>
    tpu.vector_store %arg16[%c0_77, %c0_78], %87 {strides = array<i32>} : memref<136x128xf32, #tpu.memory_space<vmem>>, vector<128x128xf32>,
    %c0_79 = arith.constant 0 : index
    %c0_80 = arith.constant 0 : index
    %89 = vector.load %arg16[%c0_79, %c0_80] : memref<136x128xf32, #tpu.memory_space<vmem>>, vector<128x128xf32>
    %90 = arith.truncf %89 : vector<128x128xf32> to vector<128x128xbf16>
    %c0_81 = arith.constant 0 : index
    %c0_82 = arith.constant 0 : index
    %c0_83 = arith.constant 0 : index
    %91 = vector.load %arg4[%c0_81, %c0_82, %c0_83] : memref<5x128x256xbf16, #tpu.memory_space<vmem>>, vector<1x128x256xbf16>
    %92 = vector.shape_cast %91 : vector<1x128x256xbf16> to vector<128x256xbf16>
    %cst_84 = arith.constant dense<0.000000e+00> : vector<128x256xf32>
    %93 = tpu.matmul %90, %92, %cst_84 {dimension_numbers = #tpu.dot_dimension_numbers<[1], [0], [0], [1], [0, 0, 1, 1], [], []>} : vector<128x128xbf16>, vector<128x256xbf16>, vector<128x256xf32> -> vector<128x256xf32>
    %c0_85 = arith.constant 0 : index
    %c0_86 = arith.constant 0 : index
    %94 = vector.load %arg17[%c0_85, %c0_86] : memref<128x256xf32, #tpu.memory_space<vmem>>, vector<128x256xf32>
    tpu.vector_store %arg17[%c0_85, %c0_86], %93 {strides = array<i32>} : memref<128x256xf32, #tpu.memory_space<vmem>>, vector<128x256xf32>,
    %c0_87 = arith.constant 0 : index
    %c0_88 = arith.constant 0 : index
    %95 = vector.load %arg17[%c0_87, %c0_88] : memref<128x256xf32, #tpu.memory_space<vmem>>, vector<128x256xf32>
    %c1_89 = arith.constant 1 : index
    %c0_90 = arith.constant 0 : index
    %96 = vector.load %arg16[%c1_89, %c0_90] : memref<136x128xf32, #tpu.memory_space<vmem>>, vector<128x128xf32>
    %97 = arith.truncf %96 : vector<128x128xf32> to vector<128x128xbf16>
    %c1_91 = arith.constant 1 : index
    %c0_92 = arith.constant 0 : index
    %c0_93 = arith.constant 0 : index
    %98 = vector.load %arg4[%c1_91, %c0_92, %c0_93] : memref<5x128x256xbf16, #tpu.memory_space<vmem>>, vector<1x128x256xbf16>
    %99 = vector.shape_cast %98 : vector<1x128x256xbf16> to vector<128x256xbf16>
    %cst_94 = arith.constant dense<0.000000e+00> : vector<128x256xf32>
    %100 = tpu.matmul %97, %99, %cst_94 {dimension_numbers = #tpu.dot_dimension_numbers<[1], [0], [0], [1], [0, 0, 1, 1], [], []>} : vector<128x128xbf16>, vector<128x256xbf16>, vector<128x256xf32> -> vector<128x256xf32>
    %101 = arith.addf %95, %100 : vector<128x256xf32>
    %c0_95 = arith.constant 0 : index
    %c0_96 = arith.constant 0 : index
    %102 = vector.load %arg17[%c0_95, %c0_96] : memref<128x256xf32, #tpu.memory_space<vmem>>, vector<128x256xf32>
    tpu.vector_store %arg17[%c0_95, %c0_96], %101 {strides = array<i32>} : memref<128x256xf32, #tpu.memory_space<vmem>>, vector<128x256xf32>,
    %c0_97 = arith.constant 0 : index
    %c0_98 = arith.constant 0 : index
    %103 = vector.load %arg17[%c0_97, %c0_98] : memref<128x256xf32, #tpu.memory_space<vmem>>, vector<128x256xf32>
    %c2_99 = arith.constant 2 : index
    %c0_100 = arith.constant 0 : index
    %104 = vector.load %arg16[%c2_99, %c0_100] : memref<136x128xf32, #tpu.memory_space<vmem>>, vector<128x128xf32>
    %105 = arith.truncf %104 : vector<128x128xf32> to vector<128x128xbf16>
    %c2_101 = arith.constant 2 : index
    %c0_102 = arith.constant 0 : index
    %c0_103 = arith.constant 0 : index
    %106 = vector.load %arg4[%c2_101, %c0_102, %c0_103] : memref<5x128x256xbf16, #tpu.memory_space<vmem>>, vector<1x128x256xbf16>
    %107 = vector.shape_cast %106 : vector<1x128x256xbf16> to vector<128x256xbf16>
    %cst_104 = arith.constant dense<0.000000e+00> : vector<128x256xf32>
    %108 = tpu.matmul %105, %107, %cst_104 {dimension_numbers = #tpu.dot_dimension_numbers<[1], [0], [0], [1], [0, 0, 1, 1], [], []>} : vector<128x128xbf16>, vector<128x256xbf16>, vector<128x256xf32> -> vector<128x256xf32>
    %109 = arith.addf %103, %108 : vector<128x256xf32>
    %c0_105 = arith.constant 0 : index
    %c0_106 = arith.constant 0 : index
    %110 = vector.load %arg17[%c0_105, %c0_106] : memref<128x256xf32, #tpu.memory_space<vmem>>, vector<128x256xf32>
    tpu.vector_store %arg17[%c0_105, %c0_106], %109 {strides = array<i32>} : memref<128x256xf32, #tpu.memory_space<vmem>>, vector<128x256xf32>,
    %c0_107 = arith.constant 0 : index
    %c0_108 = arith.constant 0 : index
    %111 = vector.load %arg17[%c0_107, %c0_108] : memref<128x256xf32, #tpu.memory_space<vmem>>, vector<128x256xf32>
    %c3_109 = arith.constant 3 : index
    %c0_110 = arith.constant 0 : index
    %112 = vector.load %arg16[%c3_109, %c0_110] : memref<136x128xf32, #tpu.memory_space<vmem>>, vector<128x128xf32>
    %113 = arith.truncf %112 : vector<128x128xf32> to vector<128x128xbf16>
    %c3_111 = arith.constant 3 : index
    %c0_112 = arith.constant 0 : index
    %c0_113 = arith.constant 0 : index
    %114 = vector.load %arg4[%c3_111, %c0_112, %c0_113] : memref<5x128x256xbf16, #tpu.memory_space<vmem>>, vector<1x128x256xbf16>
    %115 = vector.shape_cast %114 : vector<1x128x256xbf16> to vector<128x256xbf16>
    %cst_114 = arith.constant dense<0.000000e+00> : vector<128x256xf32>
    %116 = tpu.matmul %113, %115, %cst_114 {dimension_numbers = #tpu.dot_dimension_numbers<[1], [0], [0], [1], [0, 0, 1, 1], [], []>} : vector<128x128xbf16>, vector<128x256xbf16>, vector<128x256xf32> -> vector<128x256xf32>
    %117 = arith.addf %111, %116 : vector<128x256xf32>
    %c0_115 = arith.constant 0 : index
    %c0_116 = arith.constant 0 : index
    %118 = vector.load %arg17[%c0_115, %c0_116] : memref<128x256xf32, #tpu.memory_space<vmem>>, vector<128x256xf32>
    tpu.vector_store %arg17[%c0_115, %c0_116], %117 {strides = array<i32>} : memref<128x256xf32, #tpu.memory_space<vmem>>, vector<128x256xf32>,
    %c0_117 = arith.constant 0 : index
    %c0_118 = arith.constant 0 : index
    %119 = vector.load %arg17[%c0_117, %c0_118] : memref<128x256xf32, #tpu.memory_space<vmem>>, vector<128x256xf32>
    %c4_119 = arith.constant 4 : index
    %c0_120 = arith.constant 0 : index
    %120 = vector.load %arg16[%c4_119, %c0_120] : memref<136x128xf32, #tpu.memory_space<vmem>>, vector<128x128xf32>
    %121 = arith.truncf %120 : vector<128x128xf32> to vector<128x128xbf16>
    %c4_121 = arith.constant 4 : index
    %c0_122 = arith.constant 0 : index
    %c0_123 = arith.constant 0 : index
    %122 = vector.load %arg4[%c4_121, %c0_122, %c0_123] : memref<5x128x256xbf16, #tpu.memory_space<vmem>>, vector<1x128x256xbf16>
    %123 = vector.shape_cast %122 : vector<1x128x256xbf16> to vector<128x256xbf16>
    %cst_124 = arith.constant dense<0.000000e+00> : vector<128x256xf32>
    %124 = tpu.matmul %121, %123, %cst_124 {dimension_numbers = #tpu.dot_dimension_numbers<[1], [0], [0], [1], [0, 0, 1, 1], [], []>} : vector<128x128xbf16>, vector<128x256xbf16>, vector<128x256xf32> -> vector<128x256xf32>
    %125 = arith.addf %119, %124 : vector<128x256xf32>
    %c0_125 = arith.constant 0 : index
    %c0_126 = arith.constant 0 : index
    %126 = vector.load %arg17[%c0_125, %c0_126] : memref<128x256xf32, #tpu.memory_space<vmem>>, vector<128x256xf32>
    tpu.vector_store %arg17[%c0_125, %c0_126], %125 {strides = array<i32>} : memref<128x256xf32, #tpu.memory_space<vmem>>, vector<128x256xf32>,
    %c0_127 = arith.constant 0 : index
    %c0_128 = arith.constant 0 : index
    %127 = vector.load %arg17[%c0_127, %c0_128] : memref<128x256xf32, #tpu.memory_space<vmem>>, vector<64x256xf32>
    %c0_129 = arith.constant 0 : index
    %c0_130 = arith.constant 0 : index
    %128 = vector.load %arg5[%c0_129, %c0_130] : memref<1x256xf32, #tpu.memory_space<vmem>>, vector<1x256xf32>
    %129 = vector.broadcast %128 : vector<1x256xf32> to vector<64x256xf32>
    %130 = arith.addf %127, %129 : vector<64x256xf32>
    %cst_131 = arith.constant 0.000000e+00 : f32
    %131 = vector.broadcast %cst_131 : f32 to vector<64x256xf32>
    %132 = arith.maximumf %130, %131 : vector<64x256xf32>
    %133 = vector.extract_strided_slice %132 {offsets = [0, 0], sizes = [64, 128], strides = [1, 1]} : vector<64x256xf32> to vector<64x128xf32>
    %134 = vector.extract_strided_slice %132 {offsets = [0, 128], sizes = [64, 128], strides = [1, 1]} : vector<64x256xf32> to vector<64x128xf32>
    %135 = arith.maximumf %133, %134 : vector<64x128xf32>
    %c0_132 = arith.constant 0 : index
    %c0_133 = arith.constant 0 : index
    %136 = vector.load %arg18[%c0_132, %c0_133] : memref<128x128xf32, #tpu.memory_space<vmem>>, vector<64x128xf32>
    tpu.vector_store %arg18[%c0_132, %c0_133], %135 {strides = array<i32>} : memref<128x128xf32, #tpu.memory_space<vmem>>, vector<64x128xf32>,
    %c64_134 = arith.constant 64 : index
    %c0_135 = arith.constant 0 : index
    %137 = vector.load %arg17[%c64_134, %c0_135] : memref<128x256xf32, #tpu.memory_space<vmem>>, vector<64x256xf32>
    %c0_136 = arith.constant 0 : index
    %c0_137 = arith.constant 0 : index
    %138 = vector.load %arg5[%c0_136, %c0_137] : memref<1x256xf32, #tpu.memory_space<vmem>>, vector<1x256xf32>
    %139 = vector.broadcast %138 : vector<1x256xf32> to vector<64x256xf32>
    %140 = arith.addf %137, %139 : vector<64x256xf32>
    %cst_138 = arith.constant 0.000000e+00 : f32
    %141 = vector.broadcast %cst_138 : f32 to vector<64x256xf32>
    %142 = arith.maximumf %140, %141 : vector<64x256xf32>
    %143 = vector.extract_strided_slice %142 {offsets = [0, 0], sizes = [64, 128], strides = [1, 1]} : vector<64x256xf32> to vector<64x128xf32>
    %144 = vector.extract_strided_slice %142 {offsets = [0, 128], sizes = [64, 128], strides = [1, 1]} : vector<64x256xf32> to vector<64x128xf32>
    %145 = arith.maximumf %143, %144 : vector<64x128xf32>
    %c64_139 = arith.constant 64 : index
    %c0_140 = arith.constant 0 : index
    %146 = vector.load %arg18[%c64_139, %c0_140] : memref<128x128xf32, #tpu.memory_space<vmem>>, vector<64x128xf32>
    tpu.vector_store %arg18[%c64_139, %c0_140], %145 {strides = array<i32>} : memref<128x128xf32, #tpu.memory_space<vmem>>, vector<64x128xf32>,
    %c0_141 = arith.constant 0 : index
    %c0_142 = arith.constant 0 : index
    %147 = tpu.strided_load %arg18[%c0_141, %c0_142] {strides = array<i32: 2, 1>} : memref<128x128xf32, #tpu.memory_space<vmem>>, vector<64x128xf32>
    %c1_143 = arith.constant 1 : index
    %c0_144 = arith.constant 0 : index
    %148 = tpu.strided_load %arg18[%c1_143, %c0_144] {strides = array<i32: 2, 1>} : memref<128x128xf32, #tpu.memory_space<vmem>>, vector<64x128xf32>
    %149 = arith.maximumf %147, %148 : vector<64x128xf32>
    %c0_145 = arith.constant 0 : index
    %c0_146 = arith.constant 0 : index
    %150 = vector.load %arg19[%c0_145, %c0_146] : memref<64x128xf32, #tpu.memory_space<vmem>>, vector<64x128xf32>
    tpu.vector_store %arg19[%c0_145, %c0_146], %149 {strides = array<i32>} : memref<64x128xf32, #tpu.memory_space<vmem>>, vector<64x128xf32>,
    %c0_147 = arith.constant 0 : index
    %c0_148 = arith.constant 0 : index
    %151 = tpu.strided_load %arg19[%c0_147, %c0_148] {strides = array<i32: 8, 1>} : memref<64x128xf32, #tpu.memory_space<vmem>>, vector<8x128xf32>
    %152 = arith.truncf %151 : vector<8x128xf32> to vector<8x128xbf16>
    %c0_149 = arith.constant 0 : index
    %c0_150 = arith.constant 0 : index
    %c0_151 = arith.constant 0 : index
    %153 = vector.load %arg6[%c0_149, %c0_150, %c0_151] : memref<5x128x128xbf16, #tpu.memory_space<vmem>>, vector<1x128x128xbf16>
    %154 = vector.shape_cast %153 : vector<1x128x128xbf16> to vector<128x128xbf16>
    %cst_152 = arith.constant dense<0.000000e+00> : vector<8x128xf32>
    %155 = tpu.matmul %152, %154, %cst_152 {dimension_numbers = #tpu.dot_dimension_numbers<[1], [0], [0], [1], [0, 0, 1, 1], [], []>} : vector<8x128xbf16>, vector<128x128xbf16>, vector<8x128xf32> -> vector<8x128xf32>
    %c1_153 = arith.constant 1 : index
    %c0_154 = arith.constant 0 : index
    %156 = tpu.strided_load %arg19[%c1_153, %c0_154] {strides = array<i32: 8, 1>} : memref<64x128xf32, #tpu.memory_space<vmem>>, vector<8x128xf32>
    %157 = arith.truncf %156 : vector<8x128xf32> to vector<8x128xbf16>
    %c1_155 = arith.constant 1 : index
    %c0_156 = arith.constant 0 : index
    %c0_157 = arith.constant 0 : index
    %158 = vector.load %arg6[%c1_155, %c0_156, %c0_157] : memref<5x128x128xbf16, #tpu.memory_space<vmem>>, vector<1x128x128xbf16>
    %159 = vector.shape_cast %158 : vector<1x128x128xbf16> to vector<128x128xbf16>
    %cst_158 = arith.constant dense<0.000000e+00> : vector<8x128xf32>
    %160 = tpu.matmul %157, %159, %cst_158 {dimension_numbers = #tpu.dot_dimension_numbers<[1], [0], [0], [1], [0, 0, 1, 1], [], []>} : vector<8x128xbf16>, vector<128x128xbf16>, vector<8x128xf32> -> vector<8x128xf32>
    %161 = arith.addf %155, %160 : vector<8x128xf32>
    %c2_159 = arith.constant 2 : index
    %c0_160 = arith.constant 0 : index
    %162 = tpu.strided_load %arg19[%c2_159, %c0_160] {strides = array<i32: 8, 1>} : memref<64x128xf32, #tpu.memory_space<vmem>>, vector<8x128xf32>
    %163 = arith.truncf %162 : vector<8x128xf32> to vector<8x128xbf16>
    %c2_161 = arith.constant 2 : index
    %c0_162 = arith.constant 0 : index
    %c0_163 = arith.constant 0 : index
    %164 = vector.load %arg6[%c2_161, %c0_162, %c0_163] : memref<5x128x128xbf16, #tpu.memory_space<vmem>>, vector<1x128x128xbf16>
    %165 = vector.shape_cast %164 : vector<1x128x128xbf16> to vector<128x128xbf16>
    %cst_164 = arith.constant dense<0.000000e+00> : vector<8x128xf32>
    %166 = tpu.matmul %163, %165, %cst_164 {dimension_numbers = #tpu.dot_dimension_numbers<[1], [0], [0], [1], [0, 0, 1, 1], [], []>} : vector<8x128xbf16>, vector<128x128xbf16>, vector<8x128xf32> -> vector<8x128xf32>
    %167 = arith.addf %161, %166 : vector<8x128xf32>
    %c3_165 = arith.constant 3 : index
    %c0_166 = arith.constant 0 : index
    %168 = tpu.strided_load %arg19[%c3_165, %c0_166] {strides = array<i32: 8, 1>} : memref<64x128xf32, #tpu.memory_space<vmem>>, vector<8x128xf32>
    %169 = arith.truncf %168 : vector<8x128xf32> to vector<8x128xbf16>
    %c3_167 = arith.constant 3 : index
    %c0_168 = arith.constant 0 : index
    %c0_169 = arith.constant 0 : index
    %170 = vector.load %arg6[%c3_167, %c0_168, %c0_169] : memref<5x128x128xbf16, #tpu.memory_space<vmem>>, vector<1x128x128xbf16>
    %171 = vector.shape_cast %170 : vector<1x128x128xbf16> to vector<128x128xbf16>
    %cst_170 = arith.constant dense<0.000000e+00> : vector<8x128xf32>
    %172 = tpu.matmul %169, %171, %cst_170 {dimension_numbers = #tpu.dot_dimension_numbers<[1], [0], [0], [1], [0, 0, 1, 1], [], []>} : vector<8x128xbf16>, vector<128x128xbf16>, vector<8x128xf32> -> vector<8x128xf32>
    %173 = arith.addf %167, %172 : vector<8x128xf32>
    %c4_171 = arith.constant 4 : index
    %c0_172 = arith.constant 0 : index
    %174 = tpu.strided_load %arg19[%c4_171, %c0_172] {strides = array<i32: 8, 1>} : memref<64x128xf32, #tpu.memory_space<vmem>>, vector<8x128xf32>
    %175 = arith.truncf %174 : vector<8x128xf32> to vector<8x128xbf16>
    %c4_173 = arith.constant 4 : index
    %c0_174 = arith.constant 0 : index
    %c0_175 = arith.constant 0 : index
    %176 = vector.load %arg6[%c4_173, %c0_174, %c0_175] : memref<5x128x128xbf16, #tpu.memory_space<vmem>>, vector<1x128x128xbf16>
    %177 = vector.shape_cast %176 : vector<1x128x128xbf16> to vector<128x128xbf16>
    %cst_176 = arith.constant dense<0.000000e+00> : vector<8x128xf32>
    %178 = tpu.matmul %175, %177, %cst_176 {dimension_numbers = #tpu.dot_dimension_numbers<[1], [0], [0], [1], [0, 0, 1, 1], [], []>} : vector<8x128xbf16>, vector<128x128xbf16>, vector<8x128xf32> -> vector<8x128xf32>
    %179 = arith.addf %173, %178 : vector<8x128xf32>
    %c0_177 = arith.constant 0 : index
    %c0_178 = arith.constant 0 : index
    %180 = vector.load %arg7[%c0_177, %c0_178] : memref<1x128xf32, #tpu.memory_space<vmem>>, vector<1x128xf32>
    %181 = vector.broadcast %180 : vector<1x128xf32> to vector<8x128xf32>
    %182 = arith.addf %179, %181 : vector<8x128xf32>
    %cst_179 = arith.constant 0.000000e+00 : f32
    %183 = vector.broadcast %cst_179 : f32 to vector<8x128xf32>
    %184 = arith.maximumf %182, %183 : vector<8x128xf32>
    %185 = arith.truncf %184 : vector<8x128xf32> to vector<8x128xbf16>
    %c0_180 = arith.constant 0 : index
    %c0_181 = arith.constant 0 : index
    %186 = vector.load %arg8[%c0_180, %c0_181] : memref<128x128xbf16, #tpu.memory_space<vmem>>, vector<128x128xbf16>
    %cst_182 = arith.constant dense<0.000000e+00> : vector<8x128xf32>
    %187 = tpu.matmul %185, %186, %cst_182 {dimension_numbers = #tpu.dot_dimension_numbers<[1], [0], [0], [1], [0, 0, 1, 1], [], []>} : vector<8x128xbf16>, vector<128x128xbf16>, vector<8x128xf32> -> vector<8x128xf32>
    %c0_183 = arith.constant 0 : index
    %c0_184 = arith.constant 0 : index
    %188 = vector.load %arg9[%c0_183, %c0_184] : memref<1x128xf32, #tpu.memory_space<vmem>>, vector<1x128xf32>
    %189 = vector.broadcast %188 : vector<1x128xf32> to vector<8x128xf32>
    %190 = arith.addf %187, %189 : vector<8x128xf32>
    %cst_185 = arith.constant 0.000000e+00 : f32
    %191 = vector.broadcast %cst_185 : f32 to vector<8x128xf32>
    %192 = arith.maximumf %190, %191 : vector<8x128xf32>
    %193 = arith.truncf %192 : vector<8x128xf32> to vector<8x128xbf16>
    %c0_186 = arith.constant 0 : index
    %c0_187 = arith.constant 0 : index
    %194 = vector.load %arg10[%c0_186, %c0_187] : memref<128x128xbf16, #tpu.memory_space<vmem>>, vector<128x128xbf16>
    %cst_188 = arith.constant dense<0.000000e+00> : vector<8x128xf32>
    %195 = tpu.matmul %193, %194, %cst_188 {dimension_numbers = #tpu.dot_dimension_numbers<[1], [0], [0], [1], [0, 0, 1, 1], [], []>} : vector<8x128xbf16>, vector<128x128xbf16>, vector<8x128xf32> -> vector<8x128xf32>
    %c0_189 = arith.constant 0 : index
    %c0_190 = arith.constant 0 : index
    %196 = vector.load %arg11[%c0_189, %c0_190] : memref<1x128xf32, #tpu.memory_space<vmem>>, vector<1x128xf32>
    %197 = vector.broadcast %196 : vector<1x128xf32> to vector<8x128xf32>
    %198 = arith.addf %195, %197 : vector<8x128xf32>
    %c0_191 = arith.constant 0 : index
    %c0_192 = arith.constant 0 : index
    %c0_193 = arith.constant 0 : index
    %199 = vector.load %arg12[%c0_191, %c0_192, %c0_193] : memref<1x8x128xf32, #tpu.memory_space<vmem>>, vector<1x8x128xf32>
    %200 = vector.shape_cast %199 : vector<1x8x128xf32> to vector<8x128xf32>
    %201 = vector.shape_cast %198 : vector<8x128xf32> to vector<1x8x128xf32>
    tpu.vector_store %arg12[%c0_191, %c0_192, %c0_193], %201 {strides = array<i32>} : memref<1x8x128xf32, #tpu.memory_space<vmem>>, vector<1x8x128xf32>,
    return
  }
  func.func @transform_0(%arg0: i32) -> (i32, i32, i32) {
    %c0_i32 = arith.constant 0 : i32
    %c0_i32_0 = arith.constant 0 : i32
    %c0_i32_1 = arith.constant 0 : i32
    return %arg0, %c0_i32, %c0_i32_0 : i32, i32, i32
  }
  func.func @transform_1(%arg0: i32) -> (i32, i32, i32) {
    %c0_i32 = arith.constant 0 : i32
    %c0_i32_0 = arith.constant 0 : i32
    %c0_i32_1 = arith.constant 0 : i32
    %c0_i32_2 = arith.constant 0 : i32
    return %c0_i32, %c0_i32_0, %c0_i32_1 : i32, i32, i32
  }
  func.func @transform_2(%arg0: i32) -> (i32, i32) {
    %c0_i32 = arith.constant 0 : i32
    %c0_i32_0 = arith.constant 0 : i32
    %c0_i32_1 = arith.constant 0 : i32
    return %c0_i32, %c0_i32_0 : i32, i32
  }
  func.func @transform_3(%arg0: i32) -> (i32, i32, i32) {
    %c0_i32 = arith.constant 0 : i32
    %c0_i32_0 = arith.constant 0 : i32
    %c0_i32_1 = arith.constant 0 : i32
    %c0_i32_2 = arith.constant 0 : i32
    return %c0_i32, %c0_i32_0, %c0_i32_1 : i32, i32, i32
  }
  func.func @transform_4(%arg0: i32) -> (i32, i32) {
    %c0_i32 = arith.constant 0 : i32
    %c0_i32_0 = arith.constant 0 : i32
    %c0_i32_1 = arith.constant 0 : i32
    return %c0_i32, %c0_i32_0 : i32, i32
  }
  func.func @transform_5(%arg0: i32) -> (i32, i32, i32) {
    %c0_i32 = arith.constant 0 : i32
    %c0_i32_0 = arith.constant 0 : i32
    %c0_i32_1 = arith.constant 0 : i32
    %c0_i32_2 = arith.constant 0 : i32
    return %c0_i32, %c0_i32_0, %c0_i32_1 : i32, i32, i32
  }
  func.func @transform_6(%arg0: i32) -> (i32, i32) {
    %c0_i32 = arith.constant 0 : i32
    %c0_i32_0 = arith.constant 0 : i32
    %c0_i32_1 = arith.constant 0 : i32
    return %c0_i32, %c0_i32_0 : i32, i32
  }
  func.func @transform_7(%arg0: i32) -> (i32, i32) {
    %c0_i32 = arith.constant 0 : i32
    %c0_i32_0 = arith.constant 0 : i32
    %c0_i32_1 = arith.constant 0 : i32
    return %c0_i32, %c0_i32_0 : i32, i32
  }
  func.func @transform_8(%arg0: i32) -> (i32, i32) {
    %c0_i32 = arith.constant 0 : i32
    %c0_i32_0 = arith.constant 0 : i32
    %c0_i32_1 = arith.constant 0 : i32
    return %c0_i32, %c0_i32_0 : i32, i32
  }
  func.func @transform_9(%arg0: i32) -> (i32, i32) {
    %c0_i32 = arith.constant 0 : i32
    %c0_i32_0 = arith.constant 0 : i32
    %c0_i32_1 = arith.constant 0 : i32
    return %c0_i32, %c0_i32_0 : i32, i32
  }
  func.func @transform_10(%arg0: i32) -> (i32, i32) {
    %c0_i32 = arith.constant 0 : i32
    %c0_i32_0 = arith.constant 0 : i32
    %c0_i32_1 = arith.constant 0 : i32
    return %c0_i32, %c0_i32_0 : i32, i32
  }
  func.func @transform_11(%arg0: i32) -> (i32, i32, i32) {
    %c0_i32 = arith.constant 0 : i32
    %c0_i32_0 = arith.constant 0 : i32
    %c0_i32_1 = arith.constant 0 : i32
    return %arg0, %c0_i32, %c0_i32_0 : i32, i32, i32
  }
}

</mosaic_0001>

<bundles_post_ra>
// kernel: lenet_forward.1
= control target key start
LH: loop header
LB: loop body
LE: loop exit
PB: predicated region body
PF: predicated region fallthrough
CT: control target
= control target key end

     0   :  { %v8799_v1 = vmov 0   ;;  %v6647_v23 = vmov 0.0   ;;  %vm6648_vm0 = vmmov 0   ;;  %s8787_s1 = inlined_call_operand.vmem [shape: bf16[5,128,256], index: 1, kind: input, shape index: {}]   ;;  %s8788_s0 = inlined_call_operand.vmem [shape: bf16[1,256,128], index: 0, kind: input, shape index: {}]   ;;  %s8789_s3 = inlined_call_operand.vmem [shape: bf16[5,128,256], index: 3, kind: input, shape index: {}]   ;;  %s8790_s2 = inlined_call_operand.vmem [shape: f32[1,256], index: 2, kind: input, shape index: {}]   ;;  %s8791_s5 = inlined_call_operand.vmem [shape: bf16[5,128,128], index: 5, kind: input, shape index: {}]   ;;  %s8792_s4 = inlined_call_operand.vmem [shape: f32[1,256], index: 4, kind: input, shape index: {}]   ;;  %s8793_s7 = inlined_call_operand.vmem [shape: bf16[128,128], index: 7, kind: input, shape index: {}]   ;;  %s8794_s9 = inlined_call_operand.vmem [shape: bf16[128,128], index: 9, kind: input, shape index: {}]   ;;  %s8795_s6 = inlined_call_operand.vmem [shape: f32[1,128], index: 6, kind: input, shape index: {}]   ;;  %s8796_s8 = inlined_call_operand.vmem [shape: f32[1,128], index: 8, kind: input, shape index: {}]   ;;  %s8797_s10 = inlined_call_operand.vmem [shape: f32[1,128], index: 10, kind: input, shape index: {}]   ;;  %s8798_s11 = inlined_call_operand.vmem [shape: f32[1,8,128], index: 11, kind: output, shape index: {}]  }
   0x1   :  { %v6331_v0 = vld [vmem:[%s8787_s1 + $0x74] ss:$8 sps:$4 sm:$0xff]   ;;  %317 = vmatprep.mubr.bf16.mxu0 %v8799_v1  ;;  %783 = vmatprep.mubr.bf16.mxu1 %v8799_v1  ;;  %v6335_v3 = vld [vmem:[%s8787_s1 + $0x70] ss:$8 sps:$4 sm:$0xff]   ;;  %v6337_v5 = vld [vmem:[%s8787_s1 + $0x64] ss:$8 sps:$4 sm:$0xff]  }
   0x2   :  { %v6333_v2 = vld [vmem:[%s8787_s1 + $0xf4] ss:$8 sps:$4 sm:$0xff]   ;;  %285 = vmatprep.subr.bf16.mxu0 %v6331_v0  ;;  %v6336_v4 = vld [vmem:[%s8787_s1 + $0xf0] ss:$8 sps:$4 sm:$0xff]   ;;  %v6339_v6 = vld [vmem:[%s8787_s1 + $0xe4] ss:$8 sps:$4 sm:$0xff]  }
   0x3   :  { %751 = vmatprep.subr.bf16.mxu1 %v6333_v2  ;;  %286 = vmatpush1.bf16.msra.mxu0 %v6335_v3  ;;  %v6341_v7 = vld [vmem:[%s8787_s1 + $0x60] ss:$8 sps:$4 sm:$0xff]   ;;  %v6343_v9 = vld [vmem:[%s8787_s1 + $0x54] ss:$8 sps:$4 sm:$0xff]   ;;  %v6347_v11 = vld [vmem:[%s8787_s1 + $0x50] ss:$8 sps:$4 sm:$0xff]  }
   0x4   :  { %752 = vmatpush1.bf16.msra.mxu1 %v6336_v4  ;;  %287 = vmatprep.subr.bf16.mxu0 %v6337_v5  ;;  %v6342_v8 = vld [vmem:[%s8787_s1 + $0xe0] ss:$8 sps:$4 sm:$0xff]   ;;  %v6345_v10 = vld [vmem:[%s8787_s1 + $0xd4] ss:$8 sps:$4 sm:$0xff]   ;;  %v6348_v12 = vld [vmem:[%s8787_s1 + $0xd0] ss:$8 sps:$4 sm:$0xff]  }
   0x5   :  { %753 = vmatprep.subr.bf16.mxu1 %v6339_v6  ;;  %v6349_v13 = vld [vmem:[%s8787_s1 + $0x44] ss:$8 sps:$4 sm:$0xff]   ;;  %v6353_v15 = vld [vmem:[%s8787_s1 + $0x40] ss:$8 sps:$4 sm:$0xff]   ;;  %v6355_v17 = vld [vmem:[%s8787_s1 + $0x34] ss:$8 sps:$4 sm:$0xff]  }
   0x6   :  { %v6351_v14 = vld [vmem:[%s8787_s1 + $0xc4] ss:$8 sps:$4 sm:$0xff]   ;;  %v6354_v16 = vld [vmem:[%s8787_s1 + $0xc0] ss:$8 sps:$4 sm:$0xff]   ;;  %v6357_v18 = vld [vmem:[%s8787_s1 + $0xb4] ss:$8 sps:$4 sm:$0xff]  }
   0x7   :  { %288 = vmatpush1.bf16.msra.mxu0 %v6341_v7  ;;  %v6359_v19 = vld [vmem:[%s8787_s1 + $0x30] ss:$8 sps:$4 sm:$0xff]   ;;  %v6361_v21 = vld [vmem:[%s8787_s1 + $0x24] ss:$8 sps:$4 sm:$0xff]   ;;  %43 = vst [vmem:[#allocation2 + $0x100] sm:$0xff] %v6647_v23  ;;  %44 = vst [vmem:[#allocation5 + $0x80] sm:$0xff] %v6647_v23 }
   0x8   :  { %754 = vmatpush1.bf16.msra.mxu1 %v6342_v8  ;;  %289 = vmatprep.subr.bf16.mxu0 %v6343_v9  ;;  %v6360_v20 = vld [vmem:[%s8787_s1 + $0xb0] ss:$8 sps:$4 sm:$0xff]   ;;  %v6363_v22 = vld [vmem:[%s8787_s1 + $0xa4] ss:$8 sps:$4 sm:$0xff]   ;;  %v6365_v24 = vld [vmem:[%s8787_s1 + $0x20] ss:$8 sps:$4 sm:$0xff]  }
   0x9   :  { %755 = vmatprep.subr.bf16.mxu1 %v6345_v10  ;;  %v6366_v25 = vld [vmem:[%s8787_s1 + $0xa0] ss:$8 sps:$4 sm:$0xff]   ;;  %v6367_v26 = vld [vmem:[%s8787_s1 + $0x14] ss:$8 sps:$4 sm:$0xff]   ;;  %v6371_v32 = vld [vmem:[%s8787_s1 + $0x10] ss:$8 sps:$4 sm:$0xff]  }
   0xa   :  { %v6369_v27 = vld [vmem:[%s8787_s1 + $0x94] ss:$8 sps:$4 sm:$0xff]   ;;  %v6047_v28 = vld [vmem:[%s8788_s0] sm:$0xff]   ;;  %v6110_v31 = vld [vmem:[%s8788_s0 + $0x8] sm:$0xff]  }
   0xb   :  { %290 = vmatpush1.bf16.msra.mxu0 %v6347_v11  ;;  %v6048_v29 = vunpack.c.l.bf16 %v6047_v28  ;;  %v6049_v30 = vunpack.c.h.bf16 %v6047_v28  ;;  %v6372_v33 = vld [vmem:[%s8787_s1 + $0x90] ss:$8 sps:$4 sm:$0xff]   ;;  %v6052_v34 = vunpack.c.l.bf16 %v6110_v31  ;;  %v6053_v35 = vunpack.c.h.bf16 %v6110_v31  ;;  %v6373_v36 = vld [vmem:[%s8787_s1 + $0x4] ss:$8 sps:$4 sm:$0xff]   ;;  %v6377_v48 = vld [vmem:[%s8787_s1] ss:$8 sps:$4 sm:$0xff]  }
   0xc   :  { %756 = vmatpush1.bf16.msra.mxu1 %v6348_v12  ;;  %291 = vmatprep.subr.bf16.mxu0 %v6349_v13  ;;  %v6111_v37 = vld [vmem:[%s8788_s0 + $0x10] sm:$0xff]   ;;  %v6112_v38 = vld [vmem:[%s8788_s0 + $0x18] sm:$0xff]   ;;  %v6375_v39 = vld [vmem:[%s8787_s1 + $0x84] ss:$8 sps:$4 sm:$0xff]  }
   0xd   :  { %757 = vmatprep.subr.bf16.mxu1 %v6351_v14  ;;  %109 = vst [vmem:[#allocation2] sm:$0xff] %v6048_v29  ;;  %110 = vst [vmem:[#allocation2 + $0x8] sm:$0xff] %v6049_v30  ;;  %v6056_v40 = vunpack.c.l.bf16 %v6111_v37  ;;  %v6057_v41 = vunpack.c.h.bf16 %v6111_v37  ;;  %v6060_v42 = vunpack.c.l.bf16 %v6112_v38  ;;  %v6061_v43 = vunpack.c.h.bf16 %v6112_v38  ;;  %v6113_v44 = vld [vmem:[%s8788_s0 + $0x20] sm:$0xff]   ;;  %v6114_v47 = vld [vmem:[%s8788_s0 + $0x28] sm:$0xff]  }
   0xe   :  { %111 = vst [vmem:[#allocation2 + $0x10] sm:$0xff] %v6052_v34  ;;  %112 = vst [vmem:[#allocation2 + $0x18] sm:$0xff] %v6053_v35  ;;  %v6064_v45 = vunpack.c.l.bf16 %v6113_v44  ;;  %v6065_v46 = vunpack.c.h.bf16 %v6113_v44  ;;  %v6378_v49 = vld [vmem:[%s8787_s1 + $0x80] ss:$8 sps:$4 sm:$0xff]   ;;  %v6068_v50 = vunpack.c.l.bf16 %v6114_v47  ;;  %v6069_v51 = vunpack.c.h.bf16 %v6114_v47  ;;  %v6382_v52 = vld [vmem:[%s8787_s1 + $0x174] ss:$8 sps:$4 sm:$0xff]  }
   0xf   :  { %292 = vmatpush1.bf16.msra.mxu0 %v6353_v15  ;;  %113 = vst [vmem:[#allocation2 + $0x20] sm:$0xff] %v6056_v40  ;;  %114 = vst [vmem:[#allocation2 + $0x28] sm:$0xff] %v6057_v41  ;;  %v6115_v53 = vld [vmem:[%s8788_s0 + $0x30] sm:$0xff]   ;;  %v6116_v56 = vld [vmem:[%s8788_s0 + $0x38] sm:$0xff]  }
  0x10   :  { %758 = vmatpush1.bf16.msra.mxu1 %v6354_v16  ;;  %293 = vmatprep.subr.bf16.mxu0 %v6355_v17  ;;  %115 = vst [vmem:[#allocation2 + $0x30] sm:$0xff] %v6060_v42  ;;  %116 = vst [vmem:[#allocation2 + $0x38] sm:$0xff] %v6061_v43  ;;  %v6072_v54 = vunpack.c.l.bf16 %v6115_v53  ;;  %v6073_v55 = vunpack.c.h.bf16 %v6115_v53  ;;  %v6379_v57 = vld [vmem:[%s8788_s0] sm:$0xff]  ;;  %v6076_v59 = vunpack.c.l.bf16 %v6116_v56  ;;  %v6077_v60 = vunpack.c.h.bf16 %v6116_v56  ;;  %v6380_v62 = vld [vmem:[%s8787_s1 + $0x170] ss:$8 sps:$4 sm:$0xff]  }
  0x11   :  { %759 = vmatprep.subr.bf16.mxu1 %v6357_v18  ;;  %117 = vst [vmem:[#allocation2 + $0x40] sm:$0xff] %v6064_v45  ;;  %118 = vst [vmem:[#allocation2 + $0x48] sm:$0xff] %v6065_v46  ;;  %v6387_v0 = vld [vmem:[%s8787_s1 + $0x164] ss:$8 sps:$4 sm:$0xff]   ;;  %v6385_v10 = vld [vmem:[%s8787_s1 + $0x160] ss:$8 sps:$4 sm:$0xff]  }
  0x12   :  { %119 = vst [vmem:[#allocation2 + $0x50] sm:$0xff] %v6068_v50  ;;  %120 = vst [vmem:[#allocation2 + $0x58] sm:$0xff] %v6069_v51  ;;  %v6117_v2 = vld [vmem:[%s8788_s0 + $0x40] sm:$0xff]   ;;  %v6118_v3 = vld [vmem:[%s8788_s0 + $0x48] sm:$0xff]  }
  0x13   :  { %294 = vmatpush1.bf16.msra.mxu0 %v6359_v19  ;;  %121 = vst [vmem:[#allocation2 + $0x60] sm:$0xff] %v6072_v54  ;;  %122 = vst [vmem:[#allocation2 + $0x68] sm:$0xff] %v6073_v55  ;;  %v6080_v4 = vunpack.c.l.bf16 %v6117_v2  ;;  %v6081_v5 = vunpack.c.h.bf16 %v6117_v2  ;;  %v6084_v6 = vunpack.c.l.bf16 %v6118_v3  ;;  %v6085_v7 = vunpack.c.h.bf16 %v6118_v3  ;;  %v6392_v11 = vld [vmem:[%s8787_s1 + $0x154] ss:$8 sps:$4 sm:$0xff]   ;;  %v6383_v13 = vld [vmem:[%s8788_s0 + $0x8] sm:$0xff] }
  0x14   :  { %760 = vmatpush1.bf16.msra.mxu1 %v6360_v20  ;;  %295 = vmatprep.subr.bf16.mxu0 %v6361_v21  ;;  %v606_v58 = vld [vmem:[#allocation2 + $0x1] sm:$0xff]  ;;  %123 = vst [vmem:[#allocation2 + $0x70] sm:$0xff] %v6076_v59  ;;  %124 = vst [vmem:[#allocation2 + $0x78] sm:$0xff] %v6077_v60  ;;  %v6119_v12 = vld [vmem:[%s8788_s0 + $0x50] sm:$0xff]  }
  0x15   :  { %761 = vmatprep.subr.bf16.mxu1 %v6363_v22  ;;  %v607_v61 = vld [vmem:[#allocation2 + $0x9] sm:$0xff]  ;;  %v608_v8 = vld [vmem:[#allocation2 + $0x11] sm:$0xff]  ;;  %125 = vst [vmem:[#allocation2 + $0x80] sm:$0xff] %v6080_v4  ;;  %126 = vst [vmem:[#allocation2 + $0x88] sm:$0xff] %v6081_v5  ;;  %v6088_v15 = vunpack.c.l.bf16 %v6119_v12  ;;  %v6089_v16 = vunpack.c.h.bf16 %v6119_v12 }
  0x16   :  { %v638_v63 = vpack.c.bf16 %v607_v61, %v606_v58  ;;  %v609_v9 = vld [vmem:[#allocation2 + $0x19] sm:$0xff]  ;;  %127 = vst [vmem:[#allocation2 + $0x90] sm:$0xff] %v6084_v6  ;;  %128 = vst [vmem:[#allocation2 + $0x98] sm:$0xff] %v6085_v7  ;;  %v6397_v21 = vld [vmem:[%s8787_s1 + $0x144] ss:$8 sps:$4 sm:$0xff]  }
  0x17   :  { %296 = vmatpush1.bf16.msra.mxu0 %v6365_v24  ;;  %v639_v14 = vpack.c.bf16 %v609_v9, %v608_v8  ;;  %v6120_v17 = vld [vmem:[%s8788_s0 + $0x58] sm:$0xff]   ;;  %129 = vst [vmem:[#allocation2 + $0xa0] sm:$0xff] %v6088_v15  ;;  %130 = vst [vmem:[#allocation2 + $0xa8] sm:$0xff] %v6089_v16  ;;  %v6121_v22 = vld [vmem:[%s8788_s0 + $0x60] sm:$0xff]  }
  0x18   :  { %762 = vmatpush1.bf16.msra.mxu1 %v6366_v25  ;;  %297 = vmatprep.subr.bf16.mxu0 %v6367_v26  ;;  %v6092_v18 = vunpack.c.l.bf16 %v6120_v17  ;;  %v6093_v19 = vunpack.c.h.bf16 %v6120_v17  ;;  %v6390_v20 = vld [vmem:[%s8787_s1 + $0x150] ss:$8 sps:$4 sm:$0xff]   ;;  %v610_v23 = vld [vmem:[#allocation2 + $0x21] sm:$0xff]  ;;  %v6096_v24 = vunpack.c.l.bf16 %v6121_v22  ;;  %v6097_v25 = vunpack.c.h.bf16 %v6121_v22  ;;  %v6402_v30 = vld [vmem:[%s8787_s1 + $0x134] ss:$8 sps:$4 sm:$0xff]  }
  0x19   :  { %763 = vmatprep.subr.bf16.mxu1 %v6369_v27  ;;  %v611_v26 = vld [vmem:[#allocation2 + $0x29] sm:$0xff]  ;;  %v6415_v35 = vld [vmem:[%s8787_s1 + $0x1f4] ss:$8 sps:$4 sm:$0xff]   ;;  %v614_v59 = vld [vmem:[#allocation2 + $0x41] sm:$0xff] }
  0x1a   :  { %131 = vst [vmem:[#allocation2 + $0xb0] sm:$0xff] %v6092_v18  ;;  %132 = vst [vmem:[#allocation2 + $0xb8] sm:$0xff] %v6093_v19  ;;  %v6122_v27 = vld [vmem:[%s8788_s0 + $0x68] sm:$0xff]   ;;  %v6384_v28 = vld [vmem:[%s8788_s0 + $0x10] sm:$0xff]  ;;  %v640_v34 = vpack.c.bf16 %v611_v26, %v610_v23 }
  0x1b   :  { %298 = vmatpush1.bf16.msra.mxu0 %v6371_v32  ;;  %v6395_v29 = vld [vmem:[%s8787_s1 + $0x140] ss:$8 sps:$4 sm:$0xff]   ;;  %133 = vst [vmem:[#allocation2 + $0xc0] sm:$0xff] %v6096_v24  ;;  %134 = vst [vmem:[#allocation2 + $0xc8] sm:$0xff] %v6097_v25  ;;  %v6100_v31 = vunpack.c.l.bf16 %v6122_v27  ;;  %v6101_v32 = vunpack.c.h.bf16 %v6122_v27  ;;  %v6407_v37 = vld [vmem:[%s8787_s1 + $0x124] ss:$8 sps:$4 sm:$0xff]  }
  0x1c   :  { %764 = vmatpush1.bf16.msra.mxu1 %v6372_v33  ;;  %299 = vmatprep.subr.bf16.mxu0 %v6373_v36  ;;  %v6413_v33 = vld [vmem:[%s8787_s1 + $0x1f0] ss:$8 sps:$4 sm:$0xff]   ;;  %v6418_v38 = vld [vmem:[%s8787_s1 + $0x1e4] ss:$8 sps:$4 sm:$0xff]   ;;  %v6422_v42 = vld [vmem:[%s8787_s1 + $0x1d4] ss:$8 sps:$4 sm:$0xff]  }
  0x1d   :  { %765 = vmatprep.subr.bf16.mxu1 %v6375_v39  ;;  %135 = vst [vmem:[#allocation2 + $0xd0] sm:$0xff] %v6100_v31  ;;  %136 = vst [vmem:[#allocation2 + $0xd8] sm:$0xff] %v6101_v32  ;;  %v6400_v36 = vld [vmem:[%s8787_s1 + $0x130] ss:$8 sps:$4 sm:$0xff]   ;;  %v6416_v39 = vld [vmem:[%s8787_s1 + $0x1e0] ss:$8 sps:$4 sm:$0xff]  }
  0x1e   :  { %v6123_v40 = vld [vmem:[%s8788_s0 + $0x70] sm:$0xff]   ;;  %v613_v45 = vld [vmem:[#allocation2 + $0x39] sm:$0xff]  ;;  %v6425_v56 = vld [vmem:[%s8787_s1 + $0x1c4] ss:$8 sps:$4 sm:$0xff]  }
  0x1f   :  { %300 = vmatpush1.bf16.msra.mxu0 %v6377_v48  ;;  %v6104_v41 = vunpack.c.l.bf16 %v6123_v40  ;;  %v6105_v43 = vunpack.c.h.bf16 %v6123_v40  ;;  %v612_v44 = vld [vmem:[#allocation2 + $0x31] sm:$0xff]  ;;  %v6405_v46 = vld [vmem:[%s8787_s1 + $0x120] ss:$8 sps:$4 sm:$0xff]   ;;  %v6435_v3 = vld [vmem:[%s8787_s1 + $0x1a4] ss:$8 sps:$4 sm:$0xff]  }
  0x20   :  { %766 = vmatpush1.bf16.msra.mxu1 %v6378_v49  ;;  %1281 = vmatprep.subr.bf16.mxu0 %v6382_v52  ;;  %v6388_v47 = vld [vmem:[%s8788_s0 + $0x18] sm:$0xff]  ;;  %v641_v50 = vpack.c.bf16 %v613_v45, %v612_v44  ;;  %v6423_v55 = vld [vmem:[%s8787_s1 + $0x1c0] ss:$8 sps:$4 sm:$0xff]   ;;  %v6394_v15 = vld [vmem:[%s8788_s0 + $0x30] sm:$0xff] }
  0x21   :  { %1811 = vmatprep.subr.bf16.mxu1 %v6415_v35  ;;  %137 = vst [vmem:[#allocation2 + $0xe0] sm:$0xff] %v6104_v41  ;;  %138 = vst [vmem:[#allocation2 + $0xe8] sm:$0xff] %v6105_v43  ;;  %v6412_v48 = vld [vmem:[%s8787_s1 + $0x114] ss:$8 sps:$4 sm:$0xff]   ;;  %v6420_v49 = vld [vmem:[%s8787_s1 + $0x1d0] ss:$8 sps:$4 sm:$0xff]  }
  0x22   :  { %318 = vmatmul.mubr.bf16.vlgmr.msra.gmra.mxu0 %v6379_v57  ;;  %v6124_v51 = vld [vmem:[%s8788_s0 + $0x78] sm:$0xff]   ;;  %v6429_v57 = vld [vmem:[%s8787_s1 + $0x104] ss:$8 sps:$4 sm:$0xff]   ;;  %v6427_v61 = vld [vmem:[%s8787_s1 + $0x100] ss:$8 sps:$4 sm:$0xff]  }
  0x23   :  { %784 = vmatmul.mubr.bf16.vlgmr.msra.gmra.mxu1 %v638_v63  ;;  %1282 = vmatpush1.bf16.msra.mxu0 %v6380_v62  ;;  %v6410_v52 = vld [vmem:[%s8787_s1 + $0x110] ss:$8 sps:$4 sm:$0xff]   ;;  %v6108_v53 = vunpack.c.l.bf16 %v6124_v51  ;;  %v6109_v54 = vunpack.c.h.bf16 %v6124_v51  ;;  %v6432_v58 = vld [vmem:[%s8787_s1 + $0x1b4] ss:$8 sps:$4 sm:$0xff]   ;;  %v6389_v63 = vld [vmem:[%s8788_s0 + $0x20] sm:$0xff] }
  0x24   :  { %327 = vmatprep.mubr.bf16.mxu0 %v8799_v1  ;;  %793 = vmatprep.mubr.bf16.mxu1 %v8799_v1  ;;  %v615_v60 = vld [vmem:[#allocation2 + $0x49] sm:$0xff]  ;;  %v6445_v2 = vld [vmem:[%s8787_s1 + $0x274] ss:$8 sps:$4 sm:$0xff]   ;;  %v6399_v23 = vld [vmem:[%s8788_s0 + $0x40] sm:$0xff] }
  0x25   :  { %1283 = vmatprep.subr.bf16.mxu0 %v6387_v0  ;;  %1812 = vmatpush1.bf16.msra.mxu1 %v6413_v33  ;;  %139 = vst [vmem:[#allocation2 + $0xf0] sm:$0xff] %v6108_v53  ;;  %140 = vst [vmem:[#allocation2 + $0xf8] sm:$0xff] %v6109_v54  ;;  %v6430_v62 = vld [vmem:[%s8787_s1 + $0x1b0] ss:$8 sps:$4 sm:$0xff]   ;;  %v642_v0 = vpack.c.bf16 %v615_v60, %v614_v59  ;;  %v6433_v4 = vld [vmem:[%s8787_s1 + $0x1a0] ss:$8 sps:$4 sm:$0xff]  }
  0x26   :  { %1813 = vmatprep.subr.bf16.mxu1 %v6418_v38  ;;  %v6439_v5 = vld [vmem:[%s8787_s1 + $0x194] ss:$8 sps:$4 sm:$0xff]   ;;  %v6437_v8 = vld [vmem:[%s8787_s1 + $0x190] ss:$8 sps:$4 sm:$0xff]   ;;  %v6393_v9 = vld [vmem:[%s8788_s0 + $0x28] sm:$0xff] }
  0x27   :  { %1284 = vmatpush1.bf16.msra.mxu0 %v6385_v10  ;;  %v616_v6 = vld [vmem:[#allocation2 + $0x51] sm:$0xff]  ;;  %v617_v7 = vld [vmem:[#allocation2 + $0x59] sm:$0xff]  ;;  %v623_v22 = vld [vmem:[#allocation2 + $0x89] sm:$0xff] }
  0x28   :  { %1285 = vmatprep.subr.bf16.mxu0 %v6392_v11  ;;  %v643_v10 = vpack.c.bf16 %v617_v7, %v616_v6  ;;  %v6442_v11 = vld [vmem:[%s8787_s1 + $0x184] ss:$8 sps:$4 sm:$0xff]   ;;  %v6440_v12 = vld [vmem:[%s8787_s1 + $0x180] ss:$8 sps:$4 sm:$0xff]   ;;  %v620_v17 = vld [vmem:[#allocation2 + $0x71] sm:$0xff] }
  0x29   :  { %1814 = vmatpush1.bf16.msra.mxu1 %v6416_v39  ;;  %v621_v18 = vld [vmem:[#allocation2 + $0x79] sm:$0xff]  ;;  %v624_v25 = vld [vmem:[#allocation2 + $0x91] sm:$0xff]  ;;  %v6403_v27 = vld [vmem:[%s8788_s0 + $0x48] sm:$0xff] }
  0x2a   :  { %328 = vmatmul.mubr.bf16.gmra.mxu0 %v6383_v13  ;;  %1815 = vmatprep.subr.bf16.mxu1 %v6422_v42  ;;  %v618_v13 = vld [vmem:[#allocation2 + $0x61] sm:$0xff]  ;;  %v6398_v19 = vld [vmem:[%s8788_s0 + $0x38] sm:$0xff]  ;;  %v6404_v31 = vld [vmem:[%s8788_s0 + $0x50] sm:$0xff] }
  0x2b   :  { %794 = vmatmul.mubr.bf16.gmra.mxu1 %v639_v14  ;;  %337 = vmatprep.mubr.bf16.mxu0 %v8799_v1  ;;  %v619_v14 = vld [vmem:[#allocation2 + $0x69] sm:$0xff]  ;;  %v625_v26 = vld [vmem:[#allocation2 + $0x99] sm:$0xff]  ;;  %v628_v33 = vld [vmem:[#allocation2 + $0xb1] sm:$0xff] }
  0x2c   :  { %803 = vmatprep.mubr.bf16.mxu1 %v8799_v1  ;;  %1286 = vmatpush1.bf16.msra.mxu0 %v6390_v20  ;;  %v644_v16 = vpack.c.bf16 %v619_v14, %v618_v13  ;;  %v645_v20 = vpack.c.bf16 %v621_v18, %v620_v17  ;;  %v6408_v35 = vld [vmem:[%s8788_s0 + $0x58] sm:$0xff]  ;;  %v631_v38 = vld [vmem:[#allocation2 + $0xc9] sm:$0xff]  ;;  %v6409_v39 = vld [vmem:[%s8788_s0 + $0x60] sm:$0xff] }
  0x2d   :  { %1287 = vmatprep.subr.bf16.mxu0 %v6397_v21  ;;  %1816 = vmatpush1.bf16.msra.mxu1 %v6420_v49  ;;  %v622_v21 = vld [vmem:[#allocation2 + $0x81] sm:$0xff]  ;;  %v632_v41 = vld [vmem:[#allocation2 + $0xd1] sm:$0xff]  ;;  %v633_v42 = vld [vmem:[#allocation2 + $0xd9] sm:$0xff] }
  0x2e   :  { %1817 = vmatprep.subr.bf16.mxu1 %v6425_v56  ;;  %v646_v24 = vpack.c.bf16 %v623_v22, %v622_v21  ;;  %v6419_v43 = vld [vmem:[%s8788_s0 + $0x68] sm:$0xff]  ;;  %v651_v44 = vpack.c.bf16 %v633_v42, %v632_v41  ;;  %v636_v49 = vld [vmem:[#allocation2 + $0xf1] sm:$0xff]  ;;  %v1673_v21 = vld [vmem:[#allocation2 + $0x3b] sm:$0xff] }
  0x2f   :  { %v634_v45 = vld [vmem:[#allocation2 + $0xe1] sm:$0xff]  ;;  %v6436_v51 = vld [vmem:[%s8788_s0 + $0x78] sm:$0xff]  ;;  %v1137_v54 = vld [vmem:[#allocation2 + $0xa] sm:$0xff] }
  0x30   :  { %1288 = vmatpush1.bf16.msra.mxu0 %v6395_v29  ;;  %v626_v29 = vld [vmem:[#allocation2 + $0xa1] sm:$0xff]  ;;  %v1667_v56 = vld [vmem:[#allocation2 + $0xb] sm:$0xff]  ;;  %v6457_v13 = vld [vmem:[%s8787_s1 + $0x234] ss:$8 sps:$4 sm:$0xff]  }
  0x31   :  { %1289 = vmatprep.subr.bf16.mxu0 %v6402_v30  ;;  %1818 = vmatpush1.bf16.msra.mxu1 %v6423_v55  ;;  %v627_v30 = vld [vmem:[#allocation2 + $0xa9] sm:$0xff]  ;;  %v1142_v18 = vld [vmem:[#allocation2 + $0x32] sm:$0xff] }
  0x32   :  { %338 = vmatmul.mubr.bf16.gmra.mxu0 %v6384_v28  ;;  %1819 = vmatprep.subr.bf16.mxu1 %v6432_v58  ;;  %v647_v28 = vpack.c.bf16 %v625_v26, %v624_v25  ;;  %v648_v32 = vpack.c.bf16 %v627_v30, %v626_v29  ;;  %v1136_v53 = vld [vmem:[#allocation2 + $0x2] sm:$0xff]  ;;  %v6443_v59 = vld [vmem:[%s8787_s1 + $0x270] ss:$8 sps:$4 sm:$0xff]  }
  0x33   :  { %804 = vmatmul.mubr.bf16.gmra.mxu1 %v640_v34  ;;  %347 = vmatprep.mubr.bf16.mxu0 %v8799_v1  ;;  %v629_v34 = vld [vmem:[#allocation2 + $0xb9] sm:$0xff]  ;;  %v1666_v55 = vld [vmem:[#allocation2 + $0x3] sm:$0xff] }
  0x34   :  { %813 = vmatprep.mubr.bf16.mxu1 %v8799_v1  ;;  %1290 = vmatpush1.bf16.msra.mxu0 %v6400_v36  ;;  %v649_v36 = vpack.c.bf16 %v629_v34, %v628_v33  ;;  %v1698_v58 = vpack.c.bf16 %v1667_v56, %v1666_v55  ;;  %v6448_v60 = vld [vmem:[%s8787_s1 + $0x264] ss:$8 sps:$4 sm:$0xff]   ;;  %v6449_v6 = vld [vmem:[%s8787_s1 + $0x250] ss:$8 sps:$4 sm:$0xff]   ;;  %v6458_v22 = vld [vmem:[%s8787_s1 + $0x220] ss:$8 sps:$4 sm:$0xff]  }
  0x35   :  { %1291 = vmatprep.subr.bf16.mxu0 %v6407_v37  ;;  %1820 = vmatpush1.bf16.msra.mxu1 %v6430_v62  ;;  %v630_v37 = vld [vmem:[#allocation2 + $0xc1] sm:$0xff]  ;;  %v6461_v26 = vld [vmem:[%s8787_s1 + $0x210] ss:$8 sps:$4 sm:$0xff]  }
  0x36   :  { %1821 = vmatprep.subr.bf16.mxu1 %v6435_v3  ;;  %v650_v40 = vpack.c.bf16 %v631_v38, %v630_v37  ;;  %v1139_v62 = vld [vmem:[#allocation2 + $0x1a] sm:$0xff]  ;;  %v6454_v7 = vld [vmem:[%s8787_s1 + $0x244] ss:$8 sps:$4 sm:$0xff]  }
  0x37   :  { %v6451_v3 = vld [vmem:[%s8787_s1 + $0x254] ss:$8 sps:$4 sm:$0xff]   ;;  %v6460_v17 = vld [vmem:[%s8787_s1 + $0x224] ss:$8 sps:$4 sm:$0xff]  }
  0x38   :  { %1292 = vmatpush1.bf16.msra.mxu0 %v6405_v46  ;;  %v635_v46 = vld [vmem:[#allocation2 + $0xe9] sm:$0xff]  ;;  %v1676_v37 = vld [vmem:[#allocation2 + $0x53] sm:$0xff]  ;;  %v1677_v38 = vld [vmem:[#allocation2 + $0x5b] sm:$0xff] }
  0x39   :  { %1293 = vmatprep.subr.bf16.mxu0 %v6412_v48  ;;  %1822 = vmatpush1.bf16.msra.mxu1 %v6433_v4  ;;  %v652_v48 = vpack.c.bf16 %v635_v46, %v634_v45  ;;  %v1145_v29 = vld [vmem:[#allocation2 + $0x4a] sm:$0xff]  ;;  %v1148_v41 = vld [vmem:[#allocation2 + $0x62] sm:$0xff] }
  0x3a   :  { %348 = vmatmul.mubr.bf16.gmra.mxu0 %v6388_v47  ;;  %1823 = vmatprep.subr.bf16.mxu1 %v6439_v5  ;;  %v6426_v47 = vld [vmem:[%s8788_s0 + $0x70] sm:$0xff]  ;;  %v1674_v30 = vld [vmem:[#allocation2 + $0x43] sm:$0xff] }
  0x3b   :  { %814 = vmatmul.mubr.bf16.gmra.mxu1 %v641_v50  ;;  %357 = vmatprep.mubr.bf16.mxu0 %v8799_v1  ;;  %v637_v50 = vld [vmem:[#allocation2 + $0xf9] sm:$0xff]  ;;  %v1149_v42 = vld [vmem:[#allocation2 + $0x6a] sm:$0xff] }
  0x3c   :  { %823 = vmatprep.mubr.bf16.mxu1 %v8799_v1  ;;  %1294 = vmatpush1.bf16.msra.mxu0 %v6410_v52  ;;  %v653_v52 = vpack.c.bf16 %v637_v50, %v636_v49  ;;  %v1174_v45 = vpack.c.bf16 %v1149_v42, %v1148_v41  ;;  %v1680_v49 = vld [vmem:[#allocation2 + $0x73] sm:$0xff]  ;;  %v1681_v50 = vld [vmem:[#allocation2 + $0x7b] sm:$0xff]  ;;  %v1682_v55 = vld [vmem:[#allocation2 + $0x83] sm:$0xff] }
  0x3d   :  { %1295 = vmatprep.subr.bf16.mxu0 %v6429_v57  ;;  %1824 = vmatpush1.bf16.msra.mxu1 %v6437_v8  ;;  %v1168_v57 = vpack.c.bf16 %v1137_v54, %v1136_v53  ;;  %v1140_v8 = vld [vmem:[#allocation2 + $0x22] sm:$0xff]  ;;  %v1153_v54 = vld [vmem:[#allocation2 + $0x8a] sm:$0xff] }
  0x3e   :  { %1825 = vmatprep.subr.bf16.mxu1 %v6442_v11  ;;  %v1671_v11 = vld [vmem:[#allocation2 + $0x2b] sm:$0xff]  ;;  %v1152_v53 = vld [vmem:[#allocation2 + $0x82] sm:$0xff] }
  0x3f   :  { %v1683_v56 = vld [vmem:[#allocation2 + $0x8b] sm:$0xff] }
  0x40   :  { %1296 = vmatpush1.bf16.msra.mxu0 %v6427_v61  ;;  %v1138_v61 = vld [vmem:[#allocation2 + $0x12] sm:$0xff] }
  0x41   :  { %2341 = vmatprep.subr.bf16.mxu0 %v6445_v2  ;;  %1826 = vmatpush1.bf16.msra.mxu1 %v6440_v12  ;;  %v6446_v2 = vld [vmem:[%s8787_s1 + $0x260] ss:$8 sps:$4 sm:$0xff]   ;;  %v1169_v4 = vpack.c.bf16 %v1139_v62, %v1138_v61  ;;  %v1154_v61 = vld [vmem:[#allocation2 + $0x92] sm:$0xff] }
  0x42   :  { %358 = vmatmul.mubr.bf16.gmra.mxu0 %v6389_v63  ;;  %v1668_v63 = vld [vmem:[#allocation2 + $0x13] sm:$0xff]  ;;  %v6452_v12 = vld [vmem:[%s8787_s1 + $0x240] ss:$8 sps:$4 sm:$0xff]  }
  0x43   :  { %824 = vmatmul.mubr.bf16.gmra.mxu1 %v642_v0  ;;  %367 = vmatprep.mubr.bf16.mxu0 %v8799_v1  ;;  %v1669_v0 = vld [vmem:[#allocation2 + $0x1b] sm:$0xff] }
  0x44   :  { %833 = vmatprep.mubr.bf16.mxu1 %v8799_v1  ;;  %v1699_v5 = vpack.c.bf16 %v1669_v0, %v1668_v63  ;;  %v1155_v63 = vld [vmem:[#allocation2 + $0x9a] sm:$0xff] }
  0x45   :  { %v1684_v0 = vld [vmem:[#allocation2 + $0x93] sm:$0xff] }
  0x4a   :  { %368 = vmatmul.mubr.bf16.gmra.mxu0 %v6393_v9  ;;  %v1141_v9 = vld [vmem:[#allocation2 + $0x2a] sm:$0xff] }
  0x4b   :  { %834 = vmatmul.mubr.bf16.gmra.mxu1 %v643_v10  ;;  %377 = vmatprep.mubr.bf16.mxu0 %v8799_v1  ;;  %v1670_v10 = vld [vmem:[#allocation2 + $0x23] sm:$0xff]  ;;  %v1170_v14 = vpack.c.bf16 %v1141_v9, %v1140_v8  ;;  %v1177_v8 = vpack.c.bf16 %v1155_v63, %v1154_v61 }
  0x4c   :  { %843 = vmatprep.mubr.bf16.mxu1 %v8799_v1 }
  0x52   :  { %378 = vmatmul.mubr.bf16.gmra.mxu0 %v6394_v15  ;;  %v1700_v15 = vpack.c.bf16 %v1671_v11, %v1670_v10 }
  0x53   :  { %844 = vmatmul.mubr.bf16.gmra.mxu1 %v644_v16  ;;  %387 = vmatprep.mubr.bf16.mxu0 %v8799_v1  ;;  %v6455_v16 = vld [vmem:[%s8787_s1 + $0x230] ss:$8 sps:$4 sm:$0xff]  }
  0x54   :  { %853 = vmatprep.mubr.bf16.mxu1 %v8799_v1 }
  0x5a   :  { %388 = vmatmul.mubr.bf16.gmra.mxu0 %v6398_v19  ;;  %v1143_v19 = vld [vmem:[#allocation2 + $0x3a] sm:$0xff] }
  0x5b   :  { %854 = vmatmul.mubr.bf16.gmra.mxu1 %v645_v20  ;;  %397 = vmatprep.mubr.bf16.mxu0 %v8799_v1  ;;  %v1672_v20 = vld [vmem:[#allocation2 + $0x33] sm:$0xff] }
  0x5c   :  { %863 = vmatprep.mubr.bf16.mxu1 %v8799_v1  ;;  %v1701_v25 = vpack.c.bf16 %v1673_v21, %v1672_v20  ;;  %v1687_v20 = vld [vmem:[#allocation2 + $0xab] sm:$0xff] }
  0x62   :  { %398 = vmatmul.mubr.bf16.gmra.mxu0 %v6399_v23  ;;  %v6463_v23 = vld [vmem:[%s8787_s1 + $0x214] ss:$8 sps:$4 sm:$0xff]  }
  0x63   :  { %864 = vmatmul.mubr.bf16.gmra.mxu1 %v646_v24  ;;  %407 = vmatprep.mubr.bf16.mxu0 %v8799_v1  ;;  %v1171_v24 = vpack.c.bf16 %v1143_v19, %v1142_v18  ;;  %v1157_v18 = vld [vmem:[#allocation2 + $0xaa] sm:$0xff] }
  0x64   :  { %873 = vmatprep.mubr.bf16.mxu1 %v8799_v1  ;;  %v1686_v19 = vld [vmem:[#allocation2 + $0xa3] sm:$0xff] }
  0x6a   :  { %408 = vmatmul.mubr.bf16.gmra.mxu0 %v6403_v27  ;;  %v6466_v27 = vld [vmem:[%s8787_s1 + $0x204] ss:$8 sps:$4 sm:$0xff]  }
  0x6b   :  { %874 = vmatmul.mubr.bf16.gmra.mxu1 %v647_v28  ;;  %417 = vmatprep.mubr.bf16.mxu0 %v8799_v1  ;;  %v1144_v28 = vld [vmem:[#allocation2 + $0x42] sm:$0xff] }
  0x6c   :  { %883 = vmatprep.mubr.bf16.mxu1 %v8799_v1  ;;  %v1172_v33 = vpack.c.bf16 %v1145_v29, %v1144_v28 }
  0x72   :  { %418 = vmatmul.mubr.bf16.gmra.mxu0 %v6404_v31  ;;  %v1675_v31 = vld [vmem:[#allocation2 + $0x4b] sm:$0xff] }
  0x73   :  { %884 = vmatmul.mubr.bf16.gmra.mxu1 %v648_v32  ;;  %427 = vmatprep.mubr.bf16.mxu0 %v8799_v1  ;;  %v6464_v32 = vld [vmem:[%s8787_s1 + $0x200] ss:$8 sps:$4 sm:$0xff]   ;;  %v1702_v34 = vpack.c.bf16 %v1675_v31, %v1674_v30 }
  0x74   :  { %893 = vmatprep.mubr.bf16.mxu1 %v8799_v1 }
  0x7a   :  { %428 = vmatmul.mubr.bf16.gmra.mxu0 %v6408_v35  ;;  %v1146_v35 = vld [vmem:[#allocation2 + $0x52] sm:$0xff] }
  0x7b   :  { %894 = vmatmul.mubr.bf16.gmra.mxu1 %v649_v36  ;;  %437 = vmatprep.mubr.bf16.mxu0 %v8799_v1  ;;  %v1147_v36 = vld [vmem:[#allocation2 + $0x5a] sm:$0xff] }
  0x7c   :  { %903 = vmatprep.mubr.bf16.mxu1 %v8799_v1 }
  0x82   :  { %438 = vmatmul.mubr.bf16.gmra.mxu0 %v6409_v39  ;;  %v1173_v39 = vpack.c.bf16 %v1147_v36, %v1146_v35  ;;  %v1159_v36 = vld [vmem:[#allocation2 + $0xba] sm:$0xff] }
  0x83   :  { %904 = vmatmul.mubr.bf16.gmra.mxu1 %v650_v40  ;;  %447 = vmatprep.mubr.bf16.mxu0 %v8799_v1  ;;  %v1703_v40 = vpack.c.bf16 %v1677_v38, %v1676_v37  ;;  %v1688_v37 = vld [vmem:[#allocation2 + $0xb3] sm:$0xff]  ;;  %v1689_v38 = vld [vmem:[#allocation2 + $0xbb] sm:$0xff] }
  0x84   :  { %913 = vmatprep.mubr.bf16.mxu1 %v8799_v1 }
  0x8a   :  { %448 = vmatmul.mubr.bf16.gmra.mxu0 %v6419_v43  ;;  %v1678_v43 = vld [vmem:[#allocation2 + $0x63] sm:$0xff] }
  0x8b   :  { %914 = vmatmul.mubr.bf16.gmra.mxu1 %v651_v44  ;;  %457 = vmatprep.mubr.bf16.mxu0 %v8799_v1  ;;  %v1679_v44 = vld [vmem:[#allocation2 + $0x6b] sm:$0xff] }
  0x8c   :  { %923 = vmatprep.mubr.bf16.mxu1 %v8799_v1  ;;  %v1704_v46 = vpack.c.bf16 %v1679_v44, %v1678_v43 }
  0x92   :  { %458 = vmatmul.mubr.bf16.gmra.mxu0 %v6426_v47  ;;  %v1150_v47 = vld [vmem:[#allocation2 + $0x72] sm:$0xff] }
  0x93   :  { %924 = vmatmul.mubr.bf16.gmra.mxu1 %v652_v48  ;;  %467 = vmatprep.mubr.bf16.mxu0 %v8799_v1  ;;  %v1151_v48 = vld [vmem:[#allocation2 + $0x7a] sm:$0xff] }
  0x94   :  { %933 = vmatprep.mubr.bf16.mxu1 %v8799_v1 }
  0x9a   :  { %468 = vmatmul.mubr.bf16.gmra.mxu0 %v6436_v51  ;;  %v1175_v51 = vpack.c.bf16 %v1151_v48, %v1150_v47 }
  0x9b   :  { %934 = vmatmul.mubr.bf16.gmra.mxu1 %v653_v52  ;;  %1313 = vmatprep.mubr.bf16.mxu0 %v8799_v1  ;;  %v1705_v52 = vpack.c.bf16 %v1681_v50, %v1680_v49 }
  0x9c   :  { %1843 = vmatprep.mubr.bf16.mxu1 %v8799_v1 }
  0xa2   :  { %1314 = vmatmul.mubr.bf16.vlgmr.msra.gmra.mxu0 %v1168_v57  ;;  %v1176_v57 = vpack.c.bf16 %v1153_v54, %v1152_v53  ;;  %v1161_v54 = vld [vmem:[#allocation2 + $0xca] sm:$0xff] }
  0xa3   :  { %1844 = vmatmul.mubr.bf16.vlgmr.msra.gmra.mxu1 %v1698_v58  ;;  %2342 = vmatpush1.bf16.msra.mxu0 %v6443_v59  ;;  %v1706_v58 = vpack.c.bf16 %v1683_v56, %v1682_v55  ;;  %v1690_v55 = vld [vmem:[#allocation2 + $0xc3] sm:$0xff]  ;;  %v1691_v56 = vld [vmem:[#allocation2 + $0xcb] sm:$0xff] }
  0xa4   :  { %1323 = vmatprep.mubr.bf16.mxu0 %v8799_v1  ;;  %1853 = vmatprep.mubr.bf16.mxu1 %v8799_v1 }
  0xa5   :  { %2343 = vmatprep.subr.bf16.mxu0 %v6448_v60 }
  0xa7   :  { %2344 = vmatpush1.bf16.msra.mxu0 %v6446_v2  ;;  %v1685_v2 = vld [vmem:[#allocation2 + $0x9b] sm:$0xff] }
  0xa8   :  { %2345 = vmatprep.subr.bf16.mxu0 %v6451_v3  ;;  %v1707_v9 = vpack.c.bf16 %v1685_v2, %v1684_v0  ;;  %v1710_v0 = vpack.c.bf16 %v1691_v56, %v1690_v55  ;;  %v1167_v56 = vld [vmem:[#allocation2 + $0xfa] sm:$0xff] }
  0xaa   :  { %1324 = vmatmul.mubr.bf16.gmra.mxu0 %v1169_v4 }
  0xab   :  { %1854 = vmatmul.mubr.bf16.gmra.mxu1 %v1699_v5  ;;  %1333 = vmatprep.mubr.bf16.mxu0 %v8799_v1 }
  0xac   :  { %1863 = vmatprep.mubr.bf16.mxu1 %v8799_v1  ;;  %2346 = vmatpush1.bf16.msra.mxu0 %v6449_v6 }
  0xad   :  { %2347 = vmatprep.subr.bf16.mxu0 %v6454_v7 }
  0xb0   :  { %2348 = vmatpush1.bf16.msra.mxu0 %v6452_v12 }
  0xb1   :  { %2349 = vmatprep.subr.bf16.mxu0 %v6457_v13 }
  0xb2   :  { %1334 = vmatmul.mubr.bf16.gmra.mxu0 %v1170_v14 }
  0xb3   :  { %1864 = vmatmul.mubr.bf16.gmra.mxu1 %v1700_v15  ;;  %1343 = vmatprep.mubr.bf16.mxu0 %v8799_v1 }
  0xb4   :  { %1873 = vmatprep.mubr.bf16.mxu1 %v8799_v1  ;;  %2350 = vmatpush1.bf16.msra.mxu0 %v6455_v16  ;;  %v1156_v16 = vld [vmem:[#allocation2 + $0xa2] sm:$0xff] }
  0xb5   :  { %2351 = vmatprep.subr.bf16.mxu0 %v6460_v17 }
  0xb8   :  { %2352 = vmatpush1.bf16.msra.mxu0 %v6458_v22 }
  0xb9   :  { %2353 = vmatprep.subr.bf16.mxu0 %v6463_v23 }
  0xba   :  { %1344 = vmatmul.mubr.bf16.gmra.mxu0 %v1171_v24 }
  0xbb   :  { %1874 = vmatmul.mubr.bf16.gmra.mxu1 %v1701_v25  ;;  %1353 = vmatprep.mubr.bf16.mxu0 %v8799_v1 }
  0xbc   :  { %1883 = vmatprep.mubr.bf16.mxu1 %v8799_v1  ;;  %2354 = vmatpush1.bf16.msra.mxu0 %v6461_v26  ;;  %v1178_v26 = vpack.c.bf16 %v1157_v18, %v1156_v16 }
  0xbd   :  { %2355 = vmatprep.subr.bf16.mxu0 %v6466_v27  ;;  %v1708_v27 = vpack.c.bf16 %v1687_v20, %v1686_v19 }
  0xc0   :  { %2356 = vmatpush1.bf16.msra.mxu0 %v6464_v32 }
  0xc2   :  { %1354 = vmatmul.mubr.bf16.gmra.mxu0 %v1172_v33 }
  0xc3   :  { %1884 = vmatmul.mubr.bf16.gmra.mxu1 %v1702_v34  ;;  %1363 = vmatprep.mubr.bf16.mxu0 %v8799_v1  ;;  %v1158_v34 = vld [vmem:[#allocation2 + $0xb2] sm:$0xff] }
  0xc4   :  { %1893 = vmatprep.mubr.bf16.mxu1 %v8799_v1  ;;  %v1179_v44 = vpack.c.bf16 %v1159_v36, %v1158_v34  ;;  %v1165_v34 = vld [vmem:[#allocation2 + $0xea] sm:$0xff] }
  0xc5   :  { %v1694_v36 = vld [vmem:[#allocation2 + $0xe3] sm:$0xff] }
  0xca   :  { %1364 = vmatmul.mubr.bf16.gmra.mxu0 %v1173_v39 }
  0xcb   :  { %1894 = vmatmul.mubr.bf16.gmra.mxu1 %v1703_v40  ;;  %1373 = vmatprep.mubr.bf16.mxu0 %v8799_v1 }
  0xcc   :  { %1903 = vmatprep.mubr.bf16.mxu1 %v8799_v1 }
  0xd2   :  { %1374 = vmatmul.mubr.bf16.gmra.mxu0 %v1174_v45  ;;  %v1709_v45 = vpack.c.bf16 %v1689_v38, %v1688_v37  ;;  %v1695_v37 = vld [vmem:[#allocation2 + $0xeb] sm:$0xff] }
  0xd3   :  { %1904 = vmatmul.mubr.bf16.gmra.mxu1 %v1704_v46  ;;  %1383 = vmatprep.mubr.bf16.mxu0 %v8799_v1 }
  0xd4   :  { %1913 = vmatprep.mubr.bf16.mxu1 %v8799_v1 }
  0xda   :  { %1384 = vmatmul.mubr.bf16.gmra.mxu0 %v1175_v51 }
  0xdb   :  { %1914 = vmatmul.mubr.bf16.gmra.mxu1 %v1705_v52  ;;  %1393 = vmatprep.mubr.bf16.mxu0 %v8799_v1  ;;  %v1160_v52 = vld [vmem:[#allocation2 + $0xc2] sm:$0xff] }
  0xdc   :  { %1923 = vmatprep.mubr.bf16.mxu1 %v8799_v1  ;;  %v1180_v63 = vpack.c.bf16 %v1161_v54, %v1160_v52  ;;  %v1166_v54 = vld [vmem:[#allocation2 + $0xf2] sm:$0xff] }
  0xe2   :  { %v319_v59 = vpop.f32.mrf.mxu0  ;;  %1394 = vmatmul.mubr.bf16.gmra.mxu0 %v1176_v57 }
  0xe3   :  { %v785_v60 = vpop.f32.mrf.mxu1  ;;  %1924 = vmatmul.mubr.bf16.gmra.mxu1 %v1706_v58  ;;  %1403 = vmatprep.mubr.bf16.mxu0 %v8799_v1 }
  0xe4   :  { %v7095_v62 = vadd.f32 %v785_v60, %v319_v59  ;;  %1933 = vmatprep.mubr.bf16.mxu1 %v8799_v1  ;;  %v321_v3 = vpop.f32.mrf.mxu0 }
  0xe5   :  { %v787_v4 = vpop.f32.mrf.mxu1 }
  0xe6   :  { %v7099_v5 = vadd.f32 %v787_v4, %v321_v3  ;;  %v323_v6 = vpop.f32.mrf.mxu0 }
  0xe7   :  { %v789_v7 = vpop.f32.mrf.mxu1 }
  0xe8   :  { %v7101_v10 = vadd.f32 %v789_v7, %v323_v6  ;;  %v325_v11 = vpop.f32.mrf.mxu0 }
  0xe9   :  { %v791_v12 = vpop.f32.mrf.mxu1 }
  0xea   :  { %v7103_v13 = vadd.f32 %v791_v12, %v325_v11  ;;  %v329_v14 = vpop.f32.mrf.mxu0  ;;  %1404 = vmatmul.mubr.bf16.gmra.mxu0 %v1177_v8  ;;  %v1163_v12 = vld [vmem:[#allocation2 + $0xda] sm:$0xff] }
  0xeb   :  { %v795_v15 = vpop.f32.mrf.mxu1  ;;  %1934 = vmatmul.mubr.bf16.gmra.mxu1 %v1707_v9  ;;  %1413 = vmatprep.mubr.bf16.mxu0 %v8799_v1  ;;  %v1162_v9 = vld [vmem:[#allocation2 + $0xd2] sm:$0xff] }
  0xec   :  { %v7105_v17 = vadd.f32 %v795_v15, %v329_v14  ;;  %1943 = vmatprep.mubr.bf16.mxu1 %v8799_v1  ;;  %v331_v21 = vpop.f32.mrf.mxu0  ;;  %v1692_v14 = vld [vmem:[#allocation2 + $0xd3] sm:$0xff]  ;;  %v1693_v15 = vld [vmem:[#allocation2 + $0xdb] sm:$0xff] }
  0xed   :  { %v797_v22 = vpop.f32.mrf.mxu1 }
  0xee   :  { %v7109_v23 = vadd.f32 %v797_v22, %v331_v21  ;;  %v333_v24 = vpop.f32.mrf.mxu0  ;;  %v1181_v22 = vpack.c.bf16 %v1163_v12, %v1162_v9 }
  0xef   :  { %v799_v25 = vpop.f32.mrf.mxu1 }
  0xf0   :  { %v7111_v28 = vadd.f32 %v799_v25, %v333_v24  ;;  %v335_v29 = vpop.f32.mrf.mxu0  ;;  %v1711_v24 = vpack.c.bf16 %v1693_v15, %v1692_v14 }
  0xf1   :  { %v801_v30 = vpop.f32.mrf.mxu1 }
  0xf2   :  { %v7113_v31 = vadd.f32 %v801_v30, %v335_v29  ;;  %v339_v32 = vpop.f32.mrf.mxu0  ;;  %1414 = vmatmul.mubr.bf16.gmra.mxu0 %v1178_v26 }
  0xf3   :  { %v805_v33 = vpop.f32.mrf.mxu1  ;;  %1944 = vmatmul.mubr.bf16.gmra.mxu1 %v1708_v27  ;;  %1423 = vmatprep.mubr.bf16.mxu0 %v8799_v1 }
  0xf4   :  { %v7115_v35 = vadd.f32 %v805_v33, %v339_v32  ;;  %1953 = vmatprep.mubr.bf16.mxu1 %v8799_v1  ;;  %v341_v39 = vpop.f32.mrf.mxu0  ;;  %v1164_v32 = vld [vmem:[#allocation2 + $0xe2] sm:$0xff] }
  0xf5   :  { %v807_v40 = vpop.f32.mrf.mxu1 }
  0xf6   :  { %v7119_v41 = vadd.f32 %v807_v40, %v341_v39  ;;  %v343_v42 = vpop.f32.mrf.mxu0 }
  0xf7   :  { %v809_v43 = vpop.f32.mrf.mxu1 }
  0xf8   :  { %v7121_v46 = vadd.f32 %v809_v43, %v343_v42  ;;  %v345_v47 = vpop.f32.mrf.mxu0 }
  0xf9   :  { %v811_v48 = vpop.f32.mrf.mxu1 }
  0xfa   :  { %v7123_v49 = vadd.f32 %v811_v48, %v345_v47  ;;  %v349_v50 = vpop.f32.mrf.mxu0  ;;  %1424 = vmatmul.mubr.bf16.gmra.mxu0 %v1179_v44  ;;  %v1182_v44 = vpack.c.bf16 %v1165_v34, %v1164_v32 }
  0xfb   :  { %v815_v51 = vpop.f32.mrf.mxu1  ;;  %1954 = vmatmul.mubr.bf16.gmra.mxu1 %v1709_v45  ;;  %1433 = vmatprep.mubr.bf16.mxu0 %v8799_v1  ;;  %v1712_v45 = vpack.c.bf16 %v1695_v37, %v1694_v36 }
  0xfc   :  { %v7125_v53 = vadd.f32 %v815_v51, %v349_v50  ;;  %1963 = vmatprep.mubr.bf16.mxu1 %v8799_v1  ;;  %v351_v57 = vpop.f32.mrf.mxu0 }
  0xfd   :  { %v817_v58 = vpop.f32.mrf.mxu1 }
  0xfe   :  { %v7129_v59 = vadd.f32 %v817_v58, %v351_v57  ;;  %v353_v60 = vpop.f32.mrf.mxu0  ;;  %v1696_v57 = vld [vmem:[#allocation2 + $0xf3] sm:$0xff]  ;;  %v1697_v58 = vld [vmem:[#allocation2 + $0xfb] sm:$0xff] }
  0xff   :  { %v819_v61 = vpop.f32.mrf.mxu1 }
 0x100   :  { %v7131_v2 = vadd.f32 %v819_v61, %v353_v60  ;;  %v355_v3 = vpop.f32.mrf.mxu0 }
 0x101   :  { %v821_v4 = vpop.f32.mrf.mxu1 }
 0x102   :  { %v7133_v6 = vadd.f32 %v821_v4, %v355_v3  ;;  %v359_v7 = vpop.f32.mrf.mxu0  ;;  %1434 = vmatmul.mubr.bf16.gmra.mxu0 %v1180_v63  ;;  %v1183_v4 = vpack.c.bf16 %v1167_v56, %v1166_v54 }
 0x103   :  { %v825_v8 = vpop.f32.mrf.mxu1  ;;  %1964 = vmatmul.mubr.bf16.gmra.mxu1 %v1710_v0  ;;  %1443 = vmatprep.mubr.bf16.mxu0 %v8799_v1 }
 0x104   :  { %v7135_v11 = vadd.f32 %v825_v8, %v359_v7  ;;  %1973 = vmatprep.mubr.bf16.mxu1 %v8799_v1  ;;  %v361_v16 = vpop.f32.mrf.mxu0  ;;  %v1713_v7 = vpack.c.bf16 %v1697_v58, %v1696_v57 }
 0x105   :  { %v827_v18 = vpop.f32.mrf.mxu1 }
 0x106   :  { %v7139_v19 = vadd.f32 %v827_v18, %v361_v16  ;;  %v363_v20 = vpop.f32.mrf.mxu0  ;;  %v2196_v18 = vld [vmem:[#allocation2 + $0x4] sm:$0xff] }
 0x107   :  { %v829_v21 = vpop.f32.mrf.mxu1 }
 0x108   :  { %v7141_v25 = vadd.f32 %v829_v21, %v363_v20  ;;  %v7143_v26 = vpop.f32.mrf.mxu0  ;;  %v2197_v20 = vld [vmem:[#allocation2 + $0xc] sm:$0xff] }
 0x109   :  { %8803 = vst [vmem:[#allocation9_spill] sm:$0xff] %v7143_v26  ;;  %v7145_v27 = vpop.f32.mrf.mxu1  ;;  %v2228_v32 = vpack.c.bf16 %v2197_v20, %v2196_v18 }
 0x10a   :  { %8804 = vst [vmem:[#allocation10_spill] sm:$0xff] %v7145_v27  ;;  %v369_v29 = vpop.f32.mrf.mxu0  ;;  %1444 = vmatmul.mubr.bf16.gmra.mxu0 %v1181_v22 }
 0x10b   :  { %v835_v30 = vpop.f32.mrf.mxu1  ;;  %1974 = vmatmul.mubr.bf16.gmra.mxu1 %v1711_v24  ;;  %1453 = vmatprep.mubr.bf16.mxu0 %v8799_v1 }
 0x10c   :  { %v7147_v33 = vadd.f32 %v835_v30, %v369_v29  ;;  %1983 = vmatprep.mubr.bf16.mxu1 %v8799_v1  ;;  %v371_v38 = vpop.f32.mrf.mxu0 }
 0x10d   :  { %v837_v39 = vpop.f32.mrf.mxu1 }
 0x10e   :  { %v7151_v40 = vadd.f32 %v837_v39, %v371_v38  ;;  %v373_v42 = vpop.f32.mrf.mxu0 }
 0x10f   :  { %v839_v43 = vpop.f32.mrf.mxu1 }
 0x110   :  { %v7153_v47 = vadd.f32 %v839_v43, %v373_v42  ;;  %v7155_v48 = vpop.f32.mrf.mxu0  ;;  %v2198_v43 = vld [vmem:[#allocation2 + $0x14] sm:$0xff] }
 0x111   :  { %8805 = vst [vmem:[#allocation11_spill] sm:$0xff] %v7155_v48  ;;  %v7157_v50 = vpop.f32.mrf.mxu1 }
 0x112   :  { %8806 = vst [vmem:[#allocation12_spill] sm:$0xff] %v7157_v50  ;;  %v379_v51 = vpop.f32.mrf.mxu0  ;;  %1454 = vmatmul.mubr.bf16.gmra.mxu0 %v1182_v44  ;;  %v2199_v44 = vld [vmem:[#allocation2 + $0x1c] sm:$0xff]  ;;  %v2210_v50 = vld [vmem:[#allocation2 + $0x74] sm:$0xff] }
 0x113   :  { %v845_v52 = vpop.f32.mrf.mxu1  ;;  %1984 = vmatmul.mubr.bf16.gmra.mxu1 %v1712_v45  ;;  %1463 = vmatprep.mubr.bf16.mxu0 %v8799_v1  ;;  %v2229_v57 = vpack.c.bf16 %v2199_v44, %v2198_v43 }
 0x114   :  { %v7159_v55 = vadd.f32 %v845_v52, %v379_v51  ;;  %1993 = vmatprep.mubr.bf16.mxu1 %v8799_v1  ;;  %v381_v60 = vpop.f32.mrf.mxu0 }
 0x115   :  { %v847_v61 = vpop.f32.mrf.mxu1 }
 0x116   :  { %v7163_v63 = vadd.f32 %v847_v61, %v381_v60  ;;  %v383_v0 = vpop.f32.mrf.mxu0 }
 0x117   :  { %v849_v3 = vpop.f32.mrf.mxu1 }
 0x118   :  { %v7165_v8 = vadd.f32 %v849_v3, %v383_v0  ;;  %v7167_v9 = vpop.f32.mrf.mxu0 }
 0x119   :  { %8807 = vst [vmem:[#allocation13_spill] sm:$0xff] %v7167_v9  ;;  %v7169_v12 = vpop.f32.mrf.mxu1 }
 0x11a   :  { %8808 = vst [vmem:[#allocation14_spill] sm:$0xff] %v7169_v12  ;;  %v389_v14 = vpop.f32.mrf.mxu0  ;;  %1464 = vmatmul.mubr.bf16.gmra.mxu0 %v1183_v4 }
 0x11b   :  { %v855_v15 = vpop.f32.mrf.mxu1  ;;  %1994 = vmatmul.mubr.bf16.gmra.mxu1 %v1713_v7  ;;  %2373 = vmatprep.mubr.bf16.mxu0 %v8799_v1  ;;  %v2200_v7 = vld [vmem:[#allocation2 + $0x24] sm:$0xff] }
 0x11c   :  { %v7171_v16 = vadd.f32 %v855_v15, %v389_v14  ;;  %3213 = vmatprep.mubr.bf16.mxu1 %v8799_v1  ;;  %v391_v21 = vpop.f32.mrf.mxu0  ;;  %v2201_v14 = vld [vmem:[#allocation2 + $0x2c] sm:$0xff] }
 0x11d   :  { %v857_v22 = vpop.f32.mrf.mxu1 }
 0x11e   :  { %v7175_v24 = vadd.f32 %v857_v22, %v391_v21  ;;  %v393_v29 = vpop.f32.mrf.mxu0 }
 0x11f   :  { %v859_v30 = vpop.f32.mrf.mxu1 }
 0x120   :  { %v7177_v34 = vadd.f32 %v859_v30, %v393_v29  ;;  %v7179_v36 = vpop.f32.mrf.mxu0  ;;  %v2230_v29 = vpack.c.bf16 %v2201_v14, %v2200_v7 }
 0x121   :  { %8809 = vst [vmem:[#allocation15_spill] sm:$0xff] %v7179_v36  ;;  %v7181_v37 = vpop.f32.mrf.mxu1 }
 0x122   :  { %8810 = vst [vmem:[#allocation16_spill] sm:$0xff] %v7181_v37  ;;  %v399_v38 = vpop.f32.mrf.mxu0  ;;  %2374 = vmatmul.mubr.bf16.vlgmr.msra.gmra.mxu0 %v2228_v32 }
 0x123   :  { %v865_v39 = vpop.f32.mrf.mxu1  ;;  %2383 = vmatprep.mubr.bf16.mxu0 %v8799_v1 }
 0x124   :  { %v7183_v42 = vadd.f32 %v865_v39, %v399_v38  ;;  %v401_v45 = vpop.f32.mrf.mxu0 }
 0x125   :  { %v867_v51 = vpop.f32.mrf.mxu1 }
 0x126   :  { %v7186_v52 = vadd.f32 %v867_v51, %v401_v45  ;;  %v403_v54 = vpop.f32.mrf.mxu0  ;;  %v2202_v45 = vld [vmem:[#allocation2 + $0x34] sm:$0xff]  ;;  %v2203_v51 = vld [vmem:[#allocation2 + $0x3c] sm:$0xff] }
 0x127   :  { %v869_v56 = vpop.f32.mrf.mxu1  ;;  %v2231_v7 = vpack.c.bf16 %v2203_v51, %v2202_v45 }
 0x128   :  { %v7188_v58 = vadd.f32 %v869_v56, %v403_v54  ;;  %v7190_v60 = vpop.f32.mrf.mxu0 }
 0x129   :  { %8811 = vst [vmem:[#allocation17_spill] sm:$0xff] %v7190_v60  ;;  %v7192_v61 = vpop.f32.mrf.mxu1 }
 0x12a   :  { %8812 = vst [vmem:[#allocation18_spill] sm:$0xff] %v7192_v61  ;;  %v409_v0 = vpop.f32.mrf.mxu0  ;;  %2384 = vmatmul.mubr.bf16.gmra.mxu0 %v2229_v57  ;;  %v2207_v61 = vld [vmem:[#allocation2 + $0x5c] sm:$0xff] }
 0x12b   :  { %v875_v3 = vpop.f32.mrf.mxu1  ;;  %2393 = vmatprep.mubr.bf16.mxu0 %v8799_v1 }
 0x12c   :  { %v7194_v4 = vadd.f32 %v875_v3, %v409_v0  ;;  %v411_v15 = vpop.f32.mrf.mxu0 }
 0x12d   :  { %v877_v18 = vpop.f32.mrf.mxu1 }
 0x12e   :  { %v7197_v20 = vadd.f32 %v877_v18, %v411_v15  ;;  %v413_v21 = vpop.f32.mrf.mxu0 }
 0x12f   :  { %v879_v22 = vpop.f32.mrf.mxu1 }
 0x130   :  { %v7199_v30 = vadd.f32 %v879_v22, %v413_v21  ;;  %v7201_v32 = vpop.f32.mrf.mxu0 }
 0x131   :  { %8813 = vst [vmem:[#allocation19_spill] sm:$0xff] %v7201_v32  ;;  %v7203_v38 = vpop.f32.mrf.mxu1  ;;  %v2206_v32 = vld [vmem:[#allocation2 + $0x54] sm:$0xff] }
 0x132   :  { %8814 = vst [vmem:[#allocation20_spill] sm:$0xff] %v7203_v38  ;;  %v419_v39 = vpop.f32.mrf.mxu0  ;;  %2394 = vmatmul.mubr.bf16.gmra.mxu0 %v2230_v29 }
 0x133   :  { %v885_v43 = vpop.f32.mrf.mxu1  ;;  %2403 = vmatprep.mubr.bf16.mxu0 %v8799_v1 }
 0x134   :  { %v7205_v44 = vadd.f32 %v885_v43, %v419_v39  ;;  %v421_v54 = vpop.f32.mrf.mxu0  ;;  %v2204_v39 = vld [vmem:[#allocation2 + $0x44] sm:$0xff]  ;;  %v2205_v43 = vld [vmem:[#allocation2 + $0x4c] sm:$0xff] }
 0x135   :  { %v887_v56 = vpop.f32.mrf.mxu1 }
 0x136   :  { %v7208_v57 = vadd.f32 %v887_v56, %v421_v54  ;;  %v423_v0 = vpop.f32.mrf.mxu0 }
 0x137   :  { %v889_v3 = vpop.f32.mrf.mxu1 }
 0x138   :  { %v7210_v14 = vadd.f32 %v889_v3, %v423_v0  ;;  %v7212_v15 = vpop.f32.mrf.mxu0  ;;  %v2232_v0 = vpack.c.bf16 %v2205_v43, %v2204_v39 }
 0x139   :  { %8815 = vst [vmem:[#allocation21_spill] sm:$0xff] %v7212_v15  ;;  %v7214_v18 = vpop.f32.mrf.mxu1 }
 0x13a   :  { %8816 = vst [vmem:[#allocation22_spill] sm:$0xff] %v7214_v18  ;;  %v429_v21 = vpop.f32.mrf.mxu0  ;;  %2404 = vmatmul.mubr.bf16.gmra.mxu0 %v2231_v7 }
 0x13b   :  { %v895_v22 = vpop.f32.mrf.mxu1  ;;  %2413 = vmatprep.mubr.bf16.mxu0 %v8799_v1 }
 0x13c   :  { %v7216_v29 = vadd.f32 %v895_v22, %v429_v21  ;;  %v431_v54 = vpop.f32.mrf.mxu0 }
 0x13d   :  { %v897_v56 = vpop.f32.mrf.mxu1 }
 0x13e   :  { %v7219_v38 = vadd.f32 %v897_v56, %v431_v54  ;;  %v433_v45 = vpop.f32.mrf.mxu0 }
 0x13f   :  { %v899_v51 = vpop.f32.mrf.mxu1 }
 0x140   :  { %v7221_v3 = vadd.f32 %v899_v51, %v433_v45  ;;  %v7223_v15 = vpop.f32.mrf.mxu0  ;;  %v2233_v45 = vpack.c.bf16 %v2207_v61, %v2206_v32  ;;  %v6467_v51 = vld [vmem:[%s8789_s3 + $0x70] ss:$8 sps:$4 sm:$0xff]   ;;  %v8821_v32 = vmov 0  }
 0x141   :  { %8817 = vst [vmem:[#allocation23_spill] sm:$0xff] %v7223_v15  ;;  %v7225_v18 = vpop.f32.mrf.mxu1 }
 0x142   :  { %8818 = vst [vmem:[#allocation24_spill] sm:$0xff] %v7225_v18  ;;  %v439_v7 = vpop.f32.mrf.mxu0  ;;  %2414 = vmatmul.mubr.bf16.gmra.mxu0 %v2232_v0  ;;  %v6469_v0 = vld [vmem:[%s8789_s3 + $0x74] ss:$8 sps:$4 sm:$0xff]  }
 0x143   :  { %v905_v21 = vpop.f32.mrf.mxu1  ;;  %2423 = vmatprep.mubr.bf16.mxu0 %v8799_v1  ;;  %v2208_v1 = vld [vmem:[#allocation2 + $0x64] sm:$0xff]  ;;  %3181 = vmatprep.subr.bf16.mxu1 %v6469_v0 }
 0x144   :  { %v7227_v22 = vadd.f32 %v905_v21, %v439_v7  ;;  %v441_v54 = vpop.f32.mrf.mxu0  ;;  %3182 = vmatpush1.bf16.msra.mxu1 %v6467_v51 }
 0x145   :  { %v907_v56 = vpop.f32.mrf.mxu1 }
 0x146   :  { %v7230_v60 = vadd.f32 %v907_v56, %v441_v54  ;;  %v443_v39 = vpop.f32.mrf.mxu0  ;;  %v2209_v54 = vld [vmem:[#allocation2 + $0x6c] sm:$0xff] }
 0x147   :  { %v909_v43 = vpop.f32.mrf.mxu1 }
 0x148   :  { %v7235_v18 = vadd.f32 %v909_v43, %v443_v39  ;;  %v7240_v7 = vpop.f32.mrf.mxu0 }
 0x149   :  { %8819 = vst [vmem:[#allocation25_spill] sm:$0xff] %v7240_v7  ;;  %v7242_v21 = vpop.f32.mrf.mxu1  ;;  %v2234_v7 = vpack.c.bf16 %v2209_v54, %v2208_v1  ;;  %v6470_v1 = vld [vmem:[%s8789_s3 + $0x60] ss:$8 sps:$4 sm:$0xff]  }
 0x14a   :  { %8820 = vst [vmem:[#allocation26_spill] sm:$0xff] %v7242_v21  ;;  %v449_v56 = vpop.f32.mrf.mxu0  ;;  %2424 = vmatmul.mubr.bf16.gmra.mxu0 %v2233_v45  ;;  %v2211_v45 = vld [vmem:[#allocation2 + $0x7c] sm:$0xff] }
 0x14b   :  { %v915_v15 = vpop.f32.mrf.mxu1  ;;  %2433 = vmatprep.mubr.bf16.mxu0 %v8821_v32 }
 0x14c   :  { %v7244_v61 = vadd.f32 %v915_v15, %v449_v56  ;;  %v451_v39 = vpop.f32.mrf.mxu0 }
 0x14d   :  { %v917_v43 = vpop.f32.mrf.mxu1 }
 0x14e   :  { %v7247_v37 = vadd.f32 %v917_v43, %v451_v39  ;;  %v453_v36 = vpop.f32.mrf.mxu0 }
 0x14f   :  { %v919_v12 = vpop.f32.mrf.mxu1 }
 0x150   :  { %v7249_v9 = vadd.f32 %v919_v12, %v453_v36  ;;  %v7251_v21 = vpop.f32.mrf.mxu0  ;;  %v6472_v12 = vld [vmem:[%s8789_s3 + $0x64] ss:$8 sps:$4 sm:$0xff]  }
 0x151   :  { %8822 = vst [vmem:[#allocation27_spill] sm:$0xff] %v7251_v21  ;;  %v7253_v0 = vpop.f32.mrf.mxu1  ;;  %3183 = vmatprep.subr.bf16.mxu1 %v6472_v12 }
 0x152   :  { %8823 = vst [vmem:[#allocation28_spill] sm:$0xff] %v7253_v0  ;;  %v459_v51 = vpop.f32.mrf.mxu0  ;;  %2434 = vmatmul.mubr.bf16.gmra.mxu0 %v2234_v7  ;;  %v2235_v0 = vpack.c.bf16 %v2211_v45, %v2210_v50  ;;  %3184 = vmatpush1.bf16.msra.mxu1 %v6470_v1 }
 0x153   :  { %v925_v15 = vpop.f32.mrf.mxu1  ;;  %2443 = vmatprep.mubr.bf16.mxu0 %v8821_v32 }
 0x154   :  { %v7255_v56 = vadd.f32 %v925_v15, %v459_v51  ;;  %v461_v39 = vpop.f32.mrf.mxu0 }
 0x155   :  { %v927_v43 = vpop.f32.mrf.mxu1 }
 0x156   :  { %8824 = vst [vmem:[#allocation29_spill] sm:$0xff] %v7255_v56  ;;  %v7258_v48 = vadd.f32 %v927_v43, %v461_v39  ;;  %v463_v36 = vpop.f32.mrf.mxu0  ;;  %v2212_v39 = vld [vmem:[#allocation2 + $0x84] sm:$0xff]  ;;  %v2213_v43 = vld [vmem:[#allocation2 + $0x8c] sm:$0xff] }
 0x157   :  { %v929_v54 = vpop.f32.mrf.mxu1 }
 0x158   :  { %8825 = vst [vmem:[#allocation30_spill] sm:$0xff] %v7258_v48  ;;  %v7266_v7 = vadd.f32 %v929_v54, %v463_v36  ;;  %v7268_v51 = vpop.f32.mrf.mxu0  ;;  %v2236_v36 = vpack.c.bf16 %v2213_v43, %v2212_v39 }
 0x159   :  { %8826 = vst [vmem:[#allocation31_spill] sm:$0xff] %v7268_v51  ;;  %v7270_v15 = vpop.f32.mrf.mxu1 }
 0x15a   :  { %8827 = vst [vmem:[#allocation32_spill] sm:$0xff] %v7270_v15  ;;  %v469_v21 = vpop.f32.mrf.mxu0  ;;  %2444 = vmatmul.mubr.bf16.gmra.mxu0 %v2235_v0 }
 0x15b   :  { %v935_v27 = vpop.f32.mrf.mxu1  ;;  %2453 = vmatprep.mubr.bf16.mxu0 %v8821_v32 }
 0x15c   :  { %v7272_v26 = vadd.f32 %v935_v27, %v469_v21  ;;  %v471_v48 = vpop.f32.mrf.mxu0  ;;  %v2215_v21 = vld [vmem:[#allocation2 + $0x9c] sm:$0xff] }
 0x15d   :  { %v937_v56 = vpop.f32.mrf.mxu1 }
 0x15e   :  { %v7275_v50 = vadd.f32 %v937_v56, %v471_v48  ;;  %v473_v45 = vpop.f32.mrf.mxu0  ;;  %v2214_v48 = vld [vmem:[#allocation2 + $0x94] sm:$0xff] }
 0x15f   :  { %v939_v12 = vpop.f32.mrf.mxu1 }
 0x160   :  { %8828 = vst [vmem:[#allocation33_spill] sm:$0xff] %v7275_v50  ;;  %v7277_v54 = vadd.f32 %v939_v12, %v473_v45  ;;  %v7279_v15 = vpop.f32.mrf.mxu0  ;;  %v2237_v45 = vpack.c.bf16 %v2215_v21, %v2214_v48 }
 0x161   :  { %8829 = vst [vmem:[#allocation34_spill] sm:$0xff] %v7279_v15  ;;  %v7281_v1 = vpop.f32.mrf.mxu1 }
 0x162   :  { %8830 = vst [vmem:[#allocation35_spill] sm:$0xff] %v7281_v1  ;;  %v1315_v51 = vpop.f32.mrf.mxu0  ;;  %2454 = vmatmul.mubr.bf16.gmra.mxu0 %v2236_v36 }
 0x163   :  { %v7283_v0 = vpop.f32.mrf.mxu1  ;;  %v7286_v27 = vadd.f32 %v1315_v51, %v7095_v62  ;;  %2463 = vmatprep.mubr.bf16.mxu0 %v8821_v32 }
 0x164   :  { %v1317_v56 = vpop.f32.mrf.mxu0 }
 0x165   :  { %v7289_v50 = vpop.f32.mrf.mxu1  ;;  %v7292_v39 = vadd.f32 %v1317_v56, %v7099_v5  ;;  %v2216_v5 = vld [vmem:[#allocation2 + $0xa4] sm:$0xff]  ;;  %v2217_v56 = vld [vmem:[#allocation2 + $0xac] sm:$0xff] }
 0x166   :  { %v1319_v43 = vpop.f32.mrf.mxu0 }
 0x167   :  { %v7295_v12 = vadd.f32 %v1319_v43, %v7101_v10  ;;  %v7297_v1 = vpop.f32.mrf.mxu1  ;;  %v6475_v10 = vld [vmem:[%s8789_s3 + $0x54] ss:$8 sps:$4 sm:$0xff]  }
 0x168   :  { %v1321_v36 = vpop.f32.mrf.mxu0  ;;  %3185 = vmatprep.subr.bf16.mxu1 %v6475_v10  ;;  %v2219_v10 = vld [vmem:[#allocation2 + $0xbc] sm:$0xff] }
 0x169   :  { %v7300_v62 = vadd.f32 %v1321_v36, %v7103_v13  ;;  %v7309_v48 = vpop.f32.mrf.mxu1  ;;  %v6473_v13 = vld [vmem:[%s8789_s3 + $0x50] ss:$8 sps:$4 sm:$0xff]  }
 0x16a   :  { %v1325_v51 = vpop.f32.mrf.mxu0  ;;  %2464 = vmatmul.mubr.bf16.gmra.mxu0 %v2237_v45  ;;  %8833 = vst [vmem:[#allocation38_spill] sm:$0xff] %v7309_v48  ;;  %v2238_v45 = vpack.c.bf16 %v2217_v56, %v2216_v5  ;;  %3186 = vmatpush1.bf16.msra.mxu1 %v6473_v13  ;;  %v2218_v56 = vld [vmem:[#allocation2 + $0xb4] sm:$0xff] }
 0x16b   :  { %8831 = vst [vmem:[#allocation36_spill] sm:$0xff] %v7300_v62  ;;  %v7303_v15 = vadd.f32 %v1325_v51, %v7105_v17  ;;  %2473 = vmatprep.mubr.bf16.mxu0 %v8821_v32  ;;  %v6478_v51 = vld [vmem:[%s8789_s3 + $0x44] ss:$8 sps:$4 sm:$0xff]   ;;  %v6476_v62 = vld [vmem:[%s8789_s3 + $0x40] ss:$8 sps:$4 sm:$0xff]  }
 0x16c   :  { %v1327_v21 = vpop.f32.mrf.mxu0  ;;  %3187 = vmatprep.subr.bf16.mxu1 %v6478_v51  ;;  %v2239_v51 = vpack.c.bf16 %v2219_v10, %v2218_v56  ;;  %v6482_v56 = vld [vmem:[%s8789_s3 + $0x160] ss:$8 sps:$4 sm:$0xff]  }
 0x16d   :  { %8832 = vst [vmem:[#allocation37_spill] sm:$0xff] %v7303_v15  ;;  %v7315_v43 = vadd.f32 %v1327_v21, %v7109_v23  ;;  %v7323_v15 = vpop.f32.mrf.mxu1  ;;  %v6481_v21 = vld [vmem:[%s8789_s3 + $0x174] ss:$8 sps:$4 sm:$0xff]  }
 0x16e   :  { %v1329_v17 = vpop.f32.mrf.mxu0  ;;  %3188 = vmatpush1.bf16.msra.mxu1 %v6476_v62  ;;  %v6479_v62 = vld [vmem:[%s8789_s3 + $0x170] ss:$8 sps:$4 sm:$0xff]   ;;  %3809 = vmatprep.subr.bf16.mxu0 %v6481_v21 }
 0x16f   :  { %v7318_v36 = vadd.f32 %v1329_v17, %v7111_v28  ;;  %3810 = vmatpush1.bf16.msra.mxu0 %v6479_v62  ;;  %v2221_v62 = vld [vmem:[#allocation2 + $0xcc] sm:$0xff] }
 0x170   :  { %v1331_v48 = vpop.f32.mrf.mxu0 }
 0x171   :  { %8834 = vst [vmem:[#allocation39_spill] sm:$0xff] %v7318_v36  ;;  %v7329_v23 = vadd.f32 %v1331_v48, %v7113_v31  ;;  %v6487_v31 = vld [vmem:[%s8789_s3 + $0x34] ss:$8 sps:$4 sm:$0xff]   ;;  %v7341_v48 = vpop.f32.mrf.mxu1 }
 0x172   :  { %v1335_v5 = vpop.f32.mrf.mxu0  ;;  %2474 = vmatmul.mubr.bf16.gmra.mxu0 %v2238_v45  ;;  %3189 = vmatprep.subr.bf16.mxu1 %v6487_v31  ;;  %v2220_v31 = vld [vmem:[#allocation2 + $0xc4] sm:$0xff] }
 0x173   :  { %8835 = vst [vmem:[#allocation40_spill] sm:$0xff] %v7329_v23  ;;  %v7332_v28 = vadd.f32 %v1335_v5, %v7115_v35  ;;  %2483 = vmatprep.mubr.bf16.mxu0 %v8821_v32  ;;  %v6485_v35 = vld [vmem:[%s8789_s3 + $0x30] ss:$8 sps:$4 sm:$0xff]   ;;  %v6493_v23 = vld [vmem:[%s8789_s3 + $0x24] ss:$8 sps:$4 sm:$0xff]   ;;  %v7361_v36 = vpop.f32.mrf.mxu1 }
 0x174   :  { %v1337_v13 = vpop.f32.mrf.mxu0  ;;  %3190 = vmatpush1.bf16.msra.mxu1 %v6485_v35  ;;  %v6490_v35 = vld [vmem:[%s8789_s3 + $0x154] ss:$8 sps:$4 sm:$0xff]  }
 0x175   :  { %8836 = vst [vmem:[#allocation41_spill] sm:$0xff] %v7332_v28  ;;  %v7350_v17 = vadd.f32 %v1337_v13, %v7119_v41  ;;  %v6484_v28 = vld [vmem:[%s8789_s3 + $0x164] ss:$8 sps:$4 sm:$0xff]   ;;  %3191 = vmatprep.subr.bf16.mxu1 %v6493_v23  ;;  %v7382_v23 = vpop.f32.mrf.mxu1 }
 0x176   :  { %v1339_v45 = vpop.f32.mrf.mxu0  ;;  %3811 = vmatprep.subr.bf16.mxu0 %v6484_v28 }
 0x177   :  { %v7353_v5 = vadd.f32 %v1339_v45, %v7121_v46  ;;  %v6491_v46 = vld [vmem:[%s8789_s3 + $0x20] ss:$8 sps:$4 sm:$0xff]   ;;  %3812 = vmatpush1.bf16.msra.mxu0 %v6482_v56  ;;  %v6497_v45 = vld [vmem:[%s8789_s3 + $0x10] ss:$8 sps:$4 sm:$0xff]   ;;  %v2240_v56 = vpack.c.bf16 %v2221_v62, %v2220_v31 }
 0x178   :  { %v1341_v41 = vpop.f32.mrf.mxu0  ;;  %3192 = vmatpush1.bf16.msra.mxu1 %v6491_v46  ;;  %3813 = vmatprep.subr.bf16.mxu0 %v6490_v35  ;;  %v6494_v31 = vld [vmem:[%s8789_s3 + $0x140] ss:$8 sps:$4 sm:$0xff]  }
 0x179   :  { %v7370_v10 = vadd.f32 %v1341_v41, %v7123_v49  ;;  %v6499_v49 = vld [vmem:[%s8789_s3 + $0x14] ss:$8 sps:$4 sm:$0xff]  }
 0x17a   :  { %v1345_v21 = vpop.f32.mrf.mxu0  ;;  %2484 = vmatmul.mubr.bf16.gmra.mxu0 %v2239_v51  ;;  %3193 = vmatprep.subr.bf16.mxu1 %v6499_v49 }
 0x17b   :  { %8837 = vst [vmem:[#allocation42_spill] sm:$0xff] %v7370_v10  ;;  %v7373_v13 = vadd.f32 %v1345_v21, %v7125_v53  ;;  %2493 = vmatprep.mubr.bf16.mxu0 %v8821_v32  ;;  %v6488_v53 = vld [vmem:[%s8789_s3 + $0x150] ss:$8 sps:$4 sm:$0xff]   ;;  %v6496_v21 = vld [vmem:[%s8789_s3 + $0x144] ss:$8 sps:$4 sm:$0xff]   ;;  %v7402_v10 = vpop.f32.mrf.mxu1 }
 0x17c   :  { %v1347_v28 = vpop.f32.mrf.mxu0  ;;  %3194 = vmatpush1.bf16.msra.mxu1 %v6497_v45  ;;  %3814 = vmatpush1.bf16.msra.mxu0 %v6488_v53  ;;  %v2223_v53 = vld [vmem:[#allocation2 + $0xdc] sm:$0xff] }
 0x17d   :  { %8838 = vst [vmem:[#allocation43_spill] sm:$0xff] %v7373_v13  ;;  %v7391_v51 = vadd.f32 %v1347_v28, %v7129_v59  ;;  %v6505_v13 = vld [vmem:[%s8789_s3 + $0x4] ss:$8 sps:$4 sm:$0xff]   ;;  %3815 = vmatprep.subr.bf16.mxu0 %v6496_v21  ;;  %v2222_v28 = vld [vmem:[#allocation2 + $0xd4] sm:$0xff] }
 0x17e   :  { %v1349_v41 = vpop.f32.mrf.mxu0  ;;  %3195 = vmatprep.subr.bf16.mxu1 %v6505_v13  ;;  %v6502_v45 = vld [vmem:[%s8789_s3 + $0x134] ss:$8 sps:$4 sm:$0xff]   ;;  %v6500_v13 = vld [vmem:[%s8789_s3 + $0x130] ss:$8 sps:$4 sm:$0xff]   ;;  %v2241_v21 = vpack.c.bf16 %v2223_v53, %v2222_v28 }
 0x17f   :  { %v7394_v46 = vadd.f32 %v1349_v41, %v7131_v2  ;;  %v6503_v2 = vld [vmem:[%s8789_s3] ss:$8 sps:$4 sm:$0xff]   ;;  %v7420_v41 = vpop.f32.mrf.mxu1  ;;  %v2225_v53 = vld [vmem:[#allocation2 + $0xec] sm:$0xff] }
 0x180   :  { %v1351_v59 = vpop.f32.mrf.mxu0  ;;  %3196 = vmatpush1.bf16.msra.mxu1 %v6503_v2  ;;  %3816 = vmatpush1.bf16.msra.mxu0 %v6494_v31  ;;  %v6508_v31 = vld [vmem:[%s8789_s3 + $0x124] ss:$8 sps:$4 sm:$0xff]  }
 0x181   :  { %v7411_v62 = vadd.f32 %v1351_v59, %v7133_v6  ;;  %3817 = vmatprep.subr.bf16.mxu0 %v6502_v45  ;;  %v7434_v2 = vpop.f32.mrf.mxu1 }
 0x182   :  { %v1355_v35 = vpop.f32.mrf.mxu0  ;;  %2494 = vmatmul.mubr.bf16.gmra.mxu0 %v2240_v56 }
 0x183   :  { %v7414_v49 = vadd.f32 %v1355_v35, %v7135_v11  ;;  %2503 = vmatprep.mubr.bf16.mxu0 %v8821_v32 }
 0x184   :  { %v1357_v6 = vpop.f32.mrf.mxu0  ;;  %3818 = vmatpush1.bf16.msra.mxu0 %v6500_v13 }
 0x185   :  { %v7426_v56 = vadd.f32 %v1357_v6, %v7139_v19  ;;  %v6506_v19 = vld [vmem:[%s8789_s3 + $0x120] ss:$8 sps:$4 sm:$0xff]   ;;  %3819 = vmatprep.subr.bf16.mxu0 %v6508_v31  ;;  %v7445_v6 = vpop.f32.mrf.mxu1 }
 0x186   :  { %v1359_v11 = vpop.f32.mrf.mxu0 }
 0x187   :  { %8839 = vst [vmem:[#allocation44_spill] sm:$0xff] %v7426_v56  ;;  %v7429_v59 = vadd.f32 %v1359_v11, %v7141_v25  ;;  %v2224_v25 = vld [vmem:[#allocation2 + $0xe4] sm:$0xff]  ;;  %v6511_v11 = vld [vmem:[%s8789_s3 + $0x114] ss:$8 sps:$4 sm:$0xff]  }
 0x188   :  { %v7436_v35 = vpop.f32.mrf.mxu0  ;;  %3820 = vmatpush1.bf16.msra.mxu0 %v6506_v19  ;;  %v2242_v31 = vpack.c.bf16 %v2225_v53, %v2224_v25  ;;  %v7459_v19 = vpop.f32.mrf.mxu1  ;;  %v2227_v53 = vld [vmem:[#allocation2 + $0xfc] sm:$0xff] }
 0x189   :  { %8840 = vst [vmem:[#allocation45_spill] sm:$0xff] %v7429_v59  ;;  %3821 = vmatprep.subr.bf16.mxu0 %v6511_v11 }
 0x18a   :  { %v1365_v45 = vpop.f32.mrf.mxu0  ;;  %2504 = vmatmul.mubr.bf16.gmra.mxu0 %v2241_v21  ;;  %v7473_v11 = vpop.f32.mrf.mxu1 }
 0x18b   :  { %v7442_v28 = vadd.f32 %v1365_v45, %v7147_v33  ;;  %2513 = vmatprep.mubr.bf16.mxu0 %v8821_v32  ;;  %v6509_v33 = vld [vmem:[%s8789_s3 + $0x110] ss:$8 sps:$4 sm:$0xff]  }
 0x18c   :  { %v1367_v13 = vpop.f32.mrf.mxu0  ;;  %3822 = vmatpush1.bf16.msra.mxu0 %v6509_v33 }
 0x18d   :  { %8841 = vst [vmem:[#allocation46_spill] sm:$0xff] %v7442_v28  ;;  %v7451_v59 = vadd.f32 %v1367_v13, %v7151_v40  ;;  %v6514_v40 = vld [vmem:[%s8789_s3 + $0x104] ss:$8 sps:$4 sm:$0xff]   ;;  %v6512_v13 = vld [vmem:[%s8789_s3 + $0x100] ss:$8 sps:$4 sm:$0xff]  }
 0x18e   :  { %v1369_v21 = vpop.f32.mrf.mxu0  ;;  %3823 = vmatprep.subr.bf16.mxu0 %v6514_v40 }
 0x18f   :  { %8842 = vst [vmem:[#allocation47_spill] sm:$0xff] %v7451_v59  ;;  %v7457_v45 = vadd.f32 %v1369_v21, %v7153_v47  ;;  %v2226_v47 = vld [vmem:[#allocation2 + $0xf4] sm:$0xff] }
 0x190   :  { %v7461_v28 = vpop.f32.mrf.mxu0  ;;  %3824 = vmatpush1.bf16.msra.mxu0 %v6512_v13 }
 0x191   :  { %8843 = vst [vmem:[#allocation48_spill] sm:$0xff] %v7457_v45  ;;  %8844 = vst [vmem:[#allocation49_spill] sm:$0xff] %v7461_v28  ;;  %v2243_v28 = vpack.c.bf16 %v2227_v53, %v2226_v47 }
 0x192   :  { %v1375_v59 = vpop.f32.mrf.mxu0  ;;  %2514 = vmatmul.mubr.bf16.gmra.mxu0 %v2242_v31  ;;  %v7481_v31 = vpop.f32.mrf.mxu1 }
 0x193   :  { %v7470_v25 = vadd.f32 %v1375_v59, %v7159_v55  ;;  %2523 = vmatprep.mubr.bf16.mxu0 %v8821_v32 }
 0x194   :  { %v1377_v33 = vpop.f32.mrf.mxu0  ;;  %v7489_v13 = vpop.f32.mrf.mxu1 }
 0x195   :  { %v7476_v21 = vadd.f32 %v1377_v33, %v7163_v63 }
 0x196   :  { %v1379_v45 = vpop.f32.mrf.mxu0 }
 0x197   :  { %v7479_v56 = vadd.f32 %v1379_v45, %v7165_v8  ;;  %v7497_v45 = vpop.f32.mrf.mxu1 }
 0x198   :  { %v7483_v55 = vpop.f32.mrf.mxu0 }
 0x199   :  { %8845 = vst [vmem:[#allocation50_spill] sm:$0xff] %v7479_v56 }
 0x19a   :  { %v1385_v59 = vpop.f32.mrf.mxu0  ;;  %2524 = vmatmul.mubr.bf16.gmra.mxu0 %v2243_v28 }
 0x19b   :  { %v7486_v40 = vadd.f32 %v1385_v59, %v7171_v16  ;;  %3841 = vmatprep.mubr.bf16.mxu0 %v8821_v32  ;;  %v7504_v59 = vpop.f32.mrf.mxu1 }
 0x19c   :  { %v1387_v63 = vpop.f32.mrf.mxu0 }
 0x19d   :  { %8846 = vst [vmem:[#allocation51_spill] sm:$0xff] %v7486_v40  ;;  %v7492_v33 = vadd.f32 %v1387_v63, %v7175_v24 }
 0x19e   :  { %v1389_v47 = vpop.f32.mrf.mxu0 }
 0x19f   :  { %v7495_v8 = vadd.f32 %v1389_v47, %v7177_v34  ;;  %v7512_v34 = vpop.f32.mrf.mxu1 }
 0x1a0   :  { %v7499_v53 = vpop.f32.mrf.mxu0 }
 0x1a1   :  { %8847 = vst [vmem:[#allocation52_spill] sm:$0xff] %v7495_v8  ;;  %8848 = vst [vmem:[#allocation53_spill] sm:$0xff] %v7499_v53 }
 0x1a2   :  { %v1395_v28 = vpop.f32.mrf.mxu0 }
 0x1a3   :  { %v7502_v16 = vadd.f32 %v1395_v28, %v7183_v42  ;;  %v7519_v42 = vpop.f32.mrf.mxu1 }
 0x1a4   :  { %v1397_v40 = vpop.f32.mrf.mxu0 }
 0x1a5   :  { %8849 = vst [vmem:[#allocation54_spill] sm:$0xff] %v7502_v16  ;;  %v7507_v56 = vadd.f32 %v1397_v40, %v7186_v52 }
 0x1a6   :  { %v1399_v24 = vpop.f32.mrf.mxu0 }
 0x1a7   :  { %8850 = vst [vmem:[#allocation55_spill] sm:$0xff] %v7507_v56  ;;  %v7510_v63 = vadd.f32 %v1399_v24, %v7188_v58  ;;  %v7527_v58 = vpop.f32.mrf.mxu1 }
 0x1a8   :  { %v7514_v47 = vpop.f32.mrf.mxu0 }
 0x1a9   :  { %8851 = vst [vmem:[#allocation56_spill] sm:$0xff] %v7510_v63  ;;  %8852 = vst [vmem:[#allocation57_spill] sm:$0xff] %v7514_v47 }
 0x1aa   :  { %v1405_v8 = vpop.f32.mrf.mxu0 }
 0x1ab   :  { %v7517_v53 = vadd.f32 %v1405_v8, %v7194_v4  ;;  %v7534_v4 = vpop.f32.mrf.mxu1 }
 0x1ac   :  { %v1407_v28 = vpop.f32.mrf.mxu0 }
 0x1ad   :  { %8853 = vst [vmem:[#allocation58_spill] sm:$0xff] %v7517_v53  ;;  %v7522_v16 = vadd.f32 %v1407_v28, %v7197_v20 }
 0x1ae   :  { %v1409_v52 = vpop.f32.mrf.mxu0 }
 0x1af   :  { %8854 = vst [vmem:[#allocation59_spill] sm:$0xff] %v7522_v16  ;;  %v7525_v40 = vadd.f32 %v1409_v52, %v7199_v30  ;;  %v7542_v30 = vpop.f32.mrf.mxu1  ;;  %v8890_v16 = vld [vmem:[#allocation37_spill] sm:$0xff] }
 0x1b0   :  { %v7529_v24 = vpop.f32.mrf.mxu0 }
 0x1b1   :  { %8855 = vst [vmem:[#allocation60_spill] sm:$0xff] %v7525_v40  ;;  %8856 = vst [vmem:[#allocation61_spill] sm:$0xff] %v7529_v24 }
 0x1b2   :  { %v1415_v63 = vpop.f32.mrf.mxu0 }
 0x1b3   :  { %v7532_v56 = vadd.f32 %v1415_v63, %v7205_v44  ;;  %v7549_v44 = vpop.f32.mrf.mxu1 }
 0x1b4   :  { %v1417_v8 = vpop.f32.mrf.mxu0 }
 0x1b5   :  { %8857 = vst [vmem:[#allocation62_spill] sm:$0xff] %v7532_v56  ;;  %v7537_v53 = vadd.f32 %v1417_v8, %v7208_v57 }
 0x1b6   :  { %v1419_v20 = vpop.f32.mrf.mxu0 }
 0x1b7   :  { %8858 = vst [vmem:[#allocation63_spill] sm:$0xff] %v7537_v53  ;;  %v7540_v28 = vadd.f32 %v1419_v20, %v7210_v14  ;;  %v7557_v14 = vpop.f32.mrf.mxu1 }
 0x1b8   :  { %v7544_v52 = vpop.f32.mrf.mxu0 }
 0x1b9   :  { %8859 = vst [vmem:[#allocation64_spill] sm:$0xff] %v7540_v28  ;;  %8860 = vst [vmem:[#allocation65_spill] sm:$0xff] %v7544_v52 }
 0x1ba   :  { %v1425_v40 = vpop.f32.mrf.mxu0 }
 0x1bb   :  { %v7547_v24 = vadd.f32 %v1425_v40, %v7216_v29  ;;  %v7564_v29 = vpop.f32.mrf.mxu1 }
 0x1bc   :  { %v1427_v63 = vpop.f32.mrf.mxu0 }
 0x1bd   :  { %8861 = vst [vmem:[#allocation66_spill] sm:$0xff] %v7547_v24  ;;  %v7552_v56 = vadd.f32 %v1427_v63, %v7219_v38 }
 0x1be   :  { %v1429_v57 = vpop.f32.mrf.mxu0 }
 0x1bf   :  { %8862 = vst [vmem:[#allocation67_spill] sm:$0xff] %v7552_v56  ;;  %v7555_v8 = vadd.f32 %v1429_v57, %v7221_v3  ;;  %v7572_v3 = vpop.f32.mrf.mxu1 }
 0x1c0   :  { %v7559_v20 = vpop.f32.mrf.mxu0 }
 0x1c1   :  { %8863 = vst [vmem:[#allocation68_spill] sm:$0xff] %v7555_v8  ;;  %8864 = vst [vmem:[#allocation69_spill] sm:$0xff] %v7559_v20 }
 0x1c2   :  { %v1435_v28 = vpop.f32.mrf.mxu0 }
 0x1c3   :  { %v7562_v53 = vadd.f32 %v1435_v28, %v7227_v22  ;;  %v7579_v22 = vpop.f32.mrf.mxu1 }
 0x1c4   :  { %v1437_v40 = vpop.f32.mrf.mxu0 }
 0x1c5   :  { %8865 = vst [vmem:[#allocation70_spill] sm:$0xff] %v7562_v53  ;;  %v7567_v24 = vadd.f32 %v1437_v40, %v7230_v60 }
 0x1c6   :  { %v1439_v38 = vpop.f32.mrf.mxu0 }
 0x1c7   :  { %8866 = vst [vmem:[#allocation71_spill] sm:$0xff] %v7567_v24  ;;  %v7570_v63 = vadd.f32 %v1439_v38, %v7235_v18  ;;  %v7587_v18 = vpop.f32.mrf.mxu1  ;;  %v8873_v24 = vld [vmem:[#allocation29_spill] sm:$0xff] }
 0x1c8   :  { %v7574_v57 = vpop.f32.mrf.mxu0 }
 0x1c9   :  { %8867 = vst [vmem:[#allocation72_spill] sm:$0xff] %v7570_v63  ;;  %8868 = vst [vmem:[#allocation73_spill] sm:$0xff] %v7574_v57 }
 0x1ca   :  { %v1445_v8 = vpop.f32.mrf.mxu0 }
 0x1cb   :  { %v7577_v20 = vadd.f32 %v1445_v8, %v7244_v61  ;;  %v6517_v61 = vld [vmem:[%s8789_s3 + $0xf4] ss:$8 sps:$4 sm:$0xff]   ;;  %v7597_v8 = vpop.f32.mrf.mxu1 }
 0x1cc   :  { %v1447_v28 = vpop.f32.mrf.mxu0  ;;  %3479 = vmatprep.subr.bf16.mxu1 %v6517_v61 }
 0x1cd   :  { %8869 = vst [vmem:[#allocation74_spill] sm:$0xff] %v7577_v20  ;;  %v7582_v53 = vadd.f32 %v1447_v28, %v7247_v37  ;;  %v8875_v28 = vld [vmem:[#allocation30_spill] sm:$0xff] }
 0x1ce   :  { %v1449_v60 = vpop.f32.mrf.mxu0 }
 0x1cf   :  { %8870 = vst [vmem:[#allocation75_spill] sm:$0xff] %v7582_v53  ;;  %v7585_v40 = vadd.f32 %v1449_v60, %v7249_v9  ;;  %v2680_v9 = vlaneseq }
 0x1d0   :  { %v7589_v38 = vpop.f32.mrf.mxu0 }
 0x1d1   :  { %8871 = vst [vmem:[#allocation76_spill] sm:$0xff] %v7585_v40  ;;  %8872 = vst [vmem:[#allocation77_spill] sm:$0xff] %v7589_v38  ;;  %v7605_v38 = vpop.f32.mrf.mxu1 }
 0x1d2   :  { %v1455_v63 = vpop.f32.mrf.mxu0  ;;  %8878 = vst [vmem:[#allocation79_spill] sm:$0xff] %v7605_v38 }
 0x1d3   :  { %v7592_v57 = vadd.f32 %v1455_v63, %v8873_v24  ;;  %v2681_v63 = vshrl.u32 %v2680_v9, 7  ;;  %v7612_v56 = vpop.f32.mrf.mxu1 }
 0x1d4   :  { %v1457_v37 = vpop.f32.mrf.mxu0  ;;  %8881 = vst [vmem:[#allocation82_spill] sm:$0xff] %v7612_v56 }
 0x1d5   :  { %8874 = vst [vmem:[#allocation29_spill] sm:$0xff] %v7592_v57  ;;  %v7600_v53 = vadd.f32 %v1457_v37, %v8875_v28  ;;  %v8882_v37 = vld [vmem:[#allocation33_spill] sm:$0xff]  ;;  %v7617_v61 = vsub.s32 0, %v2681_v63  ;;  %v7625_v9 = vsub.s32 1, %v2681_v63 }
 0x1d6   :  { %v1459_v60 = vpop.f32.mrf.mxu0 }
 0x1d7   :  { %8876 = vst [vmem:[#allocation30_spill] sm:$0xff] %v7600_v53  ;;  %v7603_v40 = vadd.f32 %v1459_v60, %v7266_v7  ;;  %v2678_v7 = vld [vmem:[%s8790_s2] sm:$0x3] }
 0x1d8   :  { %v7607_v24 = vpop.f32.mrf.mxu0 }
 0x1d9   :  { %8877 = vst [vmem:[#allocation78_spill] sm:$0xff] %v7603_v40  ;;  %8879 = vst [vmem:[#allocation80_spill] sm:$0xff] %v7607_v24 }
 0x1da   :  { %v1465_v57 = vpop.f32.mrf.mxu0 }
 0x1db   :  { %v7610_v20 = vadd.f32 %v1465_v57, %v7272_v26  ;;  %v7627_v26 = vpop.f32.mrf.mxu1 }
 0x1dc   :  { %v1467_v52 = vpop.f32.mrf.mxu0  ;;  %8885 = vst [vmem:[#allocation84_spill] sm:$0xff] %v7627_v26 }
 0x1dd   :  { %8880 = vst [vmem:[#allocation81_spill] sm:$0xff] %v7610_v20  ;;  %v7615_v28 = vadd.f32 %v1467_v52, %v8882_v37  ;;  %v2004_v52 = vadd.f32 %v7283_v0, %v7286_v27  ;;  %v7634_v37 = vrot.slane %v2678_v7, %v7617_v61  ;;  %v2005_v20 = vadd.f32 %v7289_v50, %v7292_v39  ;;  %v8888_v50 = vld [vmem:[#allocation36_spill] sm:$0xff]  ;;  %v8889_v39 = vld [vmem:[#allocation38_spill] sm:$0xff] }
 0x1de   :  { %v1469_v53 = vpop.f32.mrf.mxu0  ;;  %v2006_v0 = vadd.f32 %v7297_v1, %v7295_v12 }
 0x1df   :  { %8883 = vst [vmem:[#allocation33_spill] sm:$0xff] %v7615_v28  ;;  %v7623_v60 = vadd.f32 %v1469_v53, %v7277_v54  ;;  %v7639_v54 = vrot.slane %v2678_v7, %v7625_v9  ;;  %v7641_v53 = vpop.f32.mrf.mxu1 }
 0x1e0   :  { %v7629_v57 = vpop.f32.mrf.mxu0  ;;  %8887 = vst [vmem:[#allocation86_spill] sm:$0xff] %v7641_v53  ;;  %v2008_v53 = vadd.f32 %v7323_v15, %v8890_v16 }
 0x1e1   :  { %8884 = vst [vmem:[#allocation83_spill] sm:$0xff] %v7623_v60  ;;  %8886 = vst [vmem:[#allocation85_spill] sm:$0xff] %v7629_v57  ;;  %v6532_v60 = vld [vmem:[%s8789_s3 + $0x274] ss:$8 sps:$4 sm:$0xff]   ;;  %v7654_v47 = vpop.f32.mrf.mxu1 }
 0x1e2   :  { %v2375_v28 = vpop.f32.mrf.mxu0  ;;  %4469 = vmatprep.subr.bf16.mxu0 %v6532_v60 }
 0x1e3   :  { %v2534_v40 = vadd.f32 %v2375_v28, %v2004_v52  ;;  %v2007_v28 = vadd.f32 %v8889_v39, %v8888_v50  ;;  %v7662_v15 = vpop.f32.mrf.mxu1 }
 0x1e4   :  { %v2377_v63 = vpop.f32.mrf.mxu0 }
 0x1e5   :  { %v2690_v27 = vadd.f32 %v7634_v37, %v2534_v40  ;;  %v2535_v57 = vadd.f32 %v2377_v63, %v2005_v20  ;;  %v2009_v40 = vadd.f32 %v7341_v48, %v7315_v43 }
 0x1e6   :  { %v2379_v24 = vpop.f32.mrf.mxu0 }
 0x1e7   :  { %v2691_v7 = vadd.f32 %v7639_v54, %v2535_v57  ;;  %v2536_v52 = vadd.f32 %v2379_v24, %v2006_v0  ;;  %v2706_v56 = vmax.f32 %v2690_v27, 0.0  ;;  %v8891_v24 = vld [vmem:[#allocation39_spill] sm:$0xff] }
 0x1e8   :  { %v2381_v26 = vpop.f32.mrf.mxu0  ;;  %v2010_v0 = vadd.f32 %v7361_v36, %v8891_v24 }
 0x1e9   :  { %v2707_v38 = vmax.f32 %v2691_v7, 0.0  ;;  %v2692_v1 = vadd.f32 %v7634_v37, %v2536_v52  ;;  %v2537_v12 = vadd.f32 %v2381_v26, %v2007_v28  ;;  %v8892_v7 = vld [vmem:[#allocation40_spill] sm:$0xff]  ;;  %v7670_v52 = vpop.f32.mrf.mxu1 }
 0x1ea   :  { %v2385_v20 = vpop.f32.mrf.mxu0  ;;  %v2011_v43 = vadd.f32 %v7382_v23, %v8892_v7  ;;  %v2013_v23 = vadd.f32 %v7420_v41, %v7350_v17 }
 0x1eb   :  { %v2722_v60 = vmax.f32 %v2706_v56, %v2707_v38  ;;  %v2693_v63 = vadd.f32 %v7639_v54, %v2537_v12  ;;  %v2538_v57 = vadd.f32 %v2385_v20, %v2008_v53  ;;  %v2708_v27 = vmax.f32 %v2692_v1, 0.0  ;;  %v8893_v53 = vld [vmem:[#allocation41_spill] sm:$0xff] }
 0x1ec   :  { %v2387_v16 = vpop.f32.mrf.mxu0  ;;  %v2012_v36 = vadd.f32 %v7402_v10, %v8893_v53  ;;  %v2014_v10 = vadd.f32 %v7434_v2, %v7353_v5 }
 0x1ed   :  { %2730 = vst [vmem:[#allocation4] sm:$0xff] %v2722_v60  ;;  %v2709_v50 = vmax.f32 %v2693_v63, 0.0  ;;  %v2694_v39 = vadd.f32 %v7634_v37, %v2538_v57  ;;  %v2539_v26 = vadd.f32 %v2387_v16, %v2009_v40  ;;  %v7678_v16 = vpop.f32.mrf.mxu1 }
 0x1ee   :  { %v2389_v28 = vpop.f32.mrf.mxu0 }
 0x1ef   :  { %v2723_v48 = vmax.f32 %v2708_v27, %v2709_v50  ;;  %v2695_v56 = vadd.f32 %v7639_v54, %v2539_v26  ;;  %v2540_v38 = vadd.f32 %v2389_v28, %v2010_v0  ;;  %v2710_v1 = vmax.f32 %v2694_v39, 0.0  ;;  %v7686_v2 = vpop.f32.mrf.mxu1 }
 0x1f0   :  { %v2391_v12 = vpop.f32.mrf.mxu0 }
 0x1f1   :  { %2731 = vst [vmem:[#allocation4 + $0x8] sm:$0xff] %v2723_v48  ;;  %v2711_v20 = vmax.f32 %v2695_v56, 0.0  ;;  %v2696_v60 = vadd.f32 %v7634_v37, %v2540_v38  ;;  %v2541_v40 = vadd.f32 %v2391_v12, %v2011_v43  ;;  %v8894_v43 = vld [vmem:[#allocation42_spill] sm:$0xff]  ;;  %v8895_v38 = vld [vmem:[#allocation43_spill] sm:$0xff] }
 0x1f2   :  { %v2395_v63 = vpop.f32.mrf.mxu0  ;;  %v2015_v17 = vadd.f32 %v7445_v6, %v8894_v43  ;;  %v2016_v5 = vadd.f32 %v7459_v19, %v8895_v38 }
 0x1f3   :  { %v2724_v57 = vmax.f32 %v2710_v1, %v2711_v20  ;;  %v2697_v24 = vadd.f32 %v7639_v54, %v2541_v40  ;;  %v2542_v0 = vadd.f32 %v2395_v63, %v2012_v36  ;;  %v2712_v50 = vmax.f32 %v2696_v60, 0.0 }
 0x1f4   :  { %v2397_v27 = vpop.f32.mrf.mxu0 }
 0x1f5   :  { %2732 = vst [vmem:[#allocation4 + $0x10] sm:$0xff] %v2724_v57  ;;  %v2713_v39 = vmax.f32 %v2697_v24, 0.0  ;;  %v2698_v26 = vadd.f32 %v7634_v37, %v2542_v0  ;;  %v2543_v28 = vadd.f32 %v2397_v27, %v2013_v23  ;;  %v2017_v23 = vadd.f32 %v7473_v11, %v7391_v51  ;;  %v2754_v51 = vld [vmem:[%s8790_s2] sm:$0x3] }
 0x1f6   :  { %v2399_v7 = vpop.f32.mrf.mxu0  ;;  %v2018_v0 = vadd.f32 %v7481_v31, %v7394_v46 }
 0x1f7   :  { %v2725_v41 = vmax.f32 %v2712_v50, %v2713_v39  ;;  %v2699_v48 = vadd.f32 %v7639_v54, %v2543_v28  ;;  %v2544_v56 = vadd.f32 %v2399_v7, %v2014_v10  ;;  %v2714_v12 = vmax.f32 %v2698_v26, 0.0  ;;  %v7694_v10 = vpop.f32.mrf.mxu1 }
 0x1f8   :  { %v2966_v53 = vld [vmem:[#allocation4] ss:$2 sm:$0xff]  ;;  %v2998_v36 = vld [vmem:[#allocation4 + $0x1] ss:$2 sm:$0xff]  ;;  %v2401_v1 = vpop.f32.mrf.mxu0  ;;  %v2019_v7 = vadd.f32 %v7489_v13, %v7411_v62 }
 0x1f9   :  { %v3029_v20 = vmax.f32 %v2966_v53, %v2998_v36  ;;  %2733 = vst [vmem:[#allocation4 + $0x18] sm:$0xff] %v2725_v41  ;;  %v2715_v60 = vmax.f32 %v2699_v48, 0.0  ;;  %v2700_v40 = vadd.f32 %v7634_v37, %v2544_v56  ;;  %v2545_v63 = vadd.f32 %v2401_v1, %v2015_v17  ;;  %v8896_v17 = vld [vmem:[#allocation9_spill] sm:$0xff]  ;;  %v8897_v41 = vld [vmem:[#allocation10_spill] sm:$0xff]  ;;  %v7707_v38 = vpop.f32.mrf.mxu1 }
 0x1fa   :  { %v2405_v6 = vpop.f32.mrf.mxu0  ;;  %v963_v48 = vadd.f32 %v8897_v41, %v8896_v17  ;;  %v2020_v56 = vadd.f32 %v7497_v45, %v7414_v49  ;;  %v7710_v1 = vrot.slane %v2754_v51, %v7617_v61  ;;  %v7715_v49 = vrot.slane %v2754_v51, %v7625_v9  ;;  %v8898_v45 = vld [vmem:[#allocation44_spill] sm:$0xff]  ;;  %v8900_v17 = vld [vmem:[#allocation11_spill] sm:$0xff] }
 0x1fb   :  { %3045 = vst [vmem:[#allocation5] sm:$0xff] %v3029_v20  ;;  %v2726_v57 = vmax.f32 %v2714_v12, %v2715_v60  ;;  %v2701_v19 = vadd.f32 %v7639_v54, %v2545_v63  ;;  %v2546_v24 = vadd.f32 %v2405_v6, %v2016_v5  ;;  %v2716_v50 = vmax.f32 %v2700_v40, 0.0  ;;  %v8901_v41 = vld [vmem:[#allocation12_spill] sm:$0xff] }
 0x1fc   :  { %v2407_v27 = vpop.f32.mrf.mxu0  ;;  %v1493_v63 = vadd.f32 %v7436_v35, %v963_v48  ;;  %v7725_v35 = vpop.f32.mrf.mxu1  ;;  %v8902_v48 = vld [vmem:[#allocation46_spill] sm:$0xff] }
 0x1fd   :  { %2734 = vst [vmem:[#allocation4 + $0x20] sm:$0xff] %v2726_v57  ;;  %v2717_v39 = vmax.f32 %v2701_v19, 0.0  ;;  %v2702_v26 = vadd.f32 %v7634_v37, %v2546_v24  ;;  %v2547_v28 = vadd.f32 %v2407_v27, %v2017_v23  ;;  %v2021_v23 = vadd.f32 %v7504_v59, %v8898_v45  ;;  %v6520_v59 = vld [vmem:[%s8789_s3 + $0xe4] ss:$8 sps:$4 sm:$0xff]  }
 0x1fe   :  { %v2409_v11 = vpop.f32.mrf.mxu0 }
 0x1ff   :  { %v2727_v43 = vmax.f32 %v2716_v50, %v2717_v39  ;;  %v2703_v46 = vadd.f32 %v7639_v54, %v2547_v28  ;;  %v2548_v31 = vadd.f32 %v2409_v11, %v2018_v0  ;;  %v2718_v36 = vmax.f32 %v2702_v26, 0.0  ;;  %v6515_v0 = vld [vmem:[%s8789_s3 + $0xf0] ss:$8 sps:$4 sm:$0xff]  }
 0x200   :  { %v2968_v5 = vld [vmem:[#allocation4 + $0x10] ss:$2 sm:$0xff]  ;;  %v3000_v53 = vld [vmem:[#allocation4 + $0x11] ss:$2 sm:$0xff]  ;;  %v2411_v12 = vpop.f32.mrf.mxu0  ;;  %v2023_v11 = vadd.f32 %v7519_v42, %v1493_v63  ;;  %v967_v42 = vadd.f32 %v8901_v41, %v8900_v17 }
 0x201   :  { %v3030_v62 = vmax.f32 %v2968_v5, %v3000_v53  ;;  %2735 = vst [vmem:[#allocation4 + $0x28] sm:$0xff] %v2727_v43  ;;  %v2719_v13 = vmax.f32 %v2703_v46, 0.0  ;;  %v2704_v60 = vadd.f32 %v7634_v37, %v2548_v31  ;;  %v2549_v40 = vadd.f32 %v2411_v12, %v2019_v7  ;;  %v8899_v37 = vld [vmem:[#allocation45_spill] sm:$0xff]  ;;  %v7744_v5 = vpop.f32.mrf.mxu1  ;;  %v8907_v17 = vld [vmem:[#allocation14_spill] sm:$0xff] }
 0x202   :  { %v2415_v6 = vpop.f32.mrf.mxu0  ;;  %v2022_v27 = vadd.f32 %v7512_v34, %v8899_v37  ;;  %v6523_v31 = vld [vmem:[%s8789_s3 + $0xd4] ss:$8 sps:$4 sm:$0xff]   ;;  %v6521_v37 = vld [vmem:[%s8789_s3 + $0xd0] ss:$8 sps:$4 sm:$0xff]  }
 0x203   :  { %3046 = vst [vmem:[#allocation5 + $0x8] sm:$0xff] %v3030_v62  ;;  %v2728_v57 = vmax.f32 %v2718_v36, %v2719_v13  ;;  %v2705_v19 = vadd.f32 %v7639_v54, %v2549_v40  ;;  %v2550_v24 = vadd.f32 %v2415_v6, %v2020_v56  ;;  %v3077_v39 = vpack.c.bf16 %v3030_v62, %v3029_v20  ;;  %v6518_v20 = vld [vmem:[%s8789_s3 + $0xe0] ss:$8 sps:$4 sm:$0xff]  }
 0x204   :  { %v2417_v50 = vpop.f32.mrf.mxu0  ;;  %v2720_v26 = vmax.f32 %v2704_v60, 0.0  ;;  %v2024_v56 = vadd.f32 %v7527_v58, %v8902_v48  ;;  %v8903_v6 = vld [vmem:[#allocation47_spill] sm:$0xff] }
 0x205   :  { %2736 = vst [vmem:[#allocation4 + $0x30] sm:$0xff] %v2728_v57  ;;  %v2721_v28 = vmax.f32 %v2705_v19, 0.0  ;;  %v2766_v54 = vadd.f32 %v7710_v1, %v2550_v24  ;;  %v2551_v51 = vadd.f32 %v2417_v50, %v2021_v23  ;;  %3214 = vmatmul.mubr.bf16.vlgmr.msra.gmra.mxu1 %v3077_v39  ;;  %v2025_v45 = vadd.f32 %v7534_v4, %v8903_v6  ;;  %v8904_v57 = vld [vmem:[#allocation49_spill] sm:$0xff]  ;;  %v7759_v39 = vpop.f32.mrf.mxu1 }
 0x206   :  { %v2419_v7 = vpop.f32.mrf.mxu0  ;;  %3223 = vmatprep.mubr.bf16.mxu1 %v8821_v32  ;;  %3480 = vmatpush1.bf16.msra.mxu1 %v6515_v0  ;;  %v1497_v58 = vadd.f32 %v8904_v57, %v967_v42  ;;  %v2028_v42 = vadd.f32 %v7557_v14, %v7470_v25  ;;  %v2029_v25 = vadd.f32 %v7564_v29, %v7476_v21  ;;  %v6527_v21 = vld [vmem:[%s8789_s3 + $0xb0] ss:$8 sps:$4 sm:$0xff]  }
 0x207   :  { %v2729_v43 = vmax.f32 %v2720_v26, %v2721_v28  ;;  %v2767_v34 = vadd.f32 %v7715_v49, %v2551_v51  ;;  %v2552_v46 = vadd.f32 %v2419_v7, %v2022_v27  ;;  %v2782_v12 = vmax.f32 %v2766_v54, 0.0  ;;  %3481 = vmatprep.subr.bf16.mxu1 %v6520_v59  ;;  %v8905_v27 = vld [vmem:[#allocation48_spill] sm:$0xff]  ;;  %v6530_v29 = vld [vmem:[%s8789_s3 + $0x270] ss:$8 sps:$4 sm:$0xff]  }
 0x208   :  { %v2970_v53 = vld [vmem:[#allocation4 + $0x20] ss:$2 sm:$0xff]  ;;  %v3002_v36 = vld [vmem:[#allocation4 + $0x21] ss:$2 sm:$0xff]  ;;  %v2421_v62 = vpop.f32.mrf.mxu0  ;;  %v2026_v50 = vadd.f32 %v7542_v30, %v8905_v27  ;;  %v2027_v7 = vadd.f32 %v7549_v44, %v1497_v58  ;;  %v7777_v44 = vpop.f32.mrf.mxu1 }
 0x209   :  { %v7746_v13 = vmax.f32 %v2970_v53, %v3002_v36  ;;  %2737 = vst [vmem:[#allocation4 + $0x38] sm:$0xff] %v2729_v43  ;;  %v2783_v60 = vmax.f32 %v2767_v34, 0.0  ;;  %v2768_v40 = vadd.f32 %v7710_v1, %v2552_v46  ;;  %v2553_v63 = vadd.f32 %v2421_v62, %v2023_v11  ;;  %v6526_v59 = vld [vmem:[%s8789_s3 + $0xc4] ss:$8 sps:$4 sm:$0xff]   ;;  %v6524_v46 = vld [vmem:[%s8789_s3 + $0xc0] ss:$8 sps:$4 sm:$0xff]  }
 0x20a   :  { %v2425_v23 = vpop.f32.mrf.mxu0  ;;  %3482 = vmatpush1.bf16.msra.mxu1 %v6518_v20  ;;  %v6529_v20 = vld [vmem:[%s8789_s3 + $0xb4] ss:$8 sps:$4 sm:$0xff]   ;;  %v3688_v58 = vld [vmem:[#allocation5 + $0x2] sm:$0xff] }
 0x20b   :  { %3047 = vst [vmem:[#allocation5 + $0x10] sm:$0xff] %v7746_v13  ;;  %v2798_v19 = vmax.f32 %v2782_v12, %v2783_v60  ;;  %v2769_v24 = vadd.f32 %v7715_v49, %v2553_v63  ;;  %v2554_v0 = vadd.f32 %v2425_v23, %v2024_v56  ;;  %3483 = vmatprep.subr.bf16.mxu1 %v6523_v31  ;;  %v2784_v26 = vmax.f32 %v2768_v40, 0.0  ;;  %v8906_v31 = vld [vmem:[#allocation13_spill] sm:$0xff] }
 0x20c   :  { %v2427_v4 = vpop.f32.mrf.mxu0  ;;  %v971_v41 = vadd.f32 %v8907_v17, %v8906_v31 }
 0x20d   :  { %2806 = vst [vmem:[#allocation4 + $0x40] sm:$0xff] %v2798_v19  ;;  %v2785_v28 = vmax.f32 %v2769_v24, 0.0  ;;  %v2770_v54 = vadd.f32 %v7710_v1, %v2554_v0  ;;  %v2555_v51 = vadd.f32 %v2427_v4, %v2025_v45  ;;  %v8908_v19 = vld [vmem:[#allocation50_spill] sm:$0xff]  ;;  %v7786_v0 = vpop.f32.mrf.mxu1 }
 0x20e   :  { %v2429_v11 = vpop.f32.mrf.mxu0  ;;  %3484 = vmatpush1.bf16.msra.mxu1 %v6521_v37  ;;  %v1501_v63 = vadd.f32 %v7483_v55, %v971_v41  ;;  %v2030_v24 = vadd.f32 %v7572_v3, %v8908_v19 }
 0x20f   :  { %v2799_v43 = vmax.f32 %v2784_v26, %v2785_v28  ;;  %v2771_v30 = vadd.f32 %v7715_v49, %v2555_v51  ;;  %v2556_v34 = vadd.f32 %v2429_v11, %v2026_v50  ;;  %v2786_v53 = vmax.f32 %v2770_v54, 0.0  ;;  %3485 = vmatprep.subr.bf16.mxu1 %v6526_v59  ;;  %v6535_v26 = vld [vmem:[%s8789_s3 + $0x264] ss:$8 sps:$4 sm:$0xff]   ;;  %v7816_v17 = vpop.f32.mrf.mxu1 }
 0x210   :  { %v2972_v48 = vld [vmem:[#allocation4 + $0x30] ss:$2 sm:$0xff]  ;;  %v3004_v56 = vld [vmem:[#allocation4 + $0x31] ss:$2 sm:$0xff]  ;;  %v2431_v36 = vpop.f32.mrf.mxu0  ;;  %v2031_v28 = vadd.f32 %v7579_v22, %v1501_v63 }
 0x211   :  { %v3032_v12 = vmax.f32 %v2972_v48, %v3004_v56  ;;  %2807 = vst [vmem:[#allocation4 + $0x48] sm:$0xff] %v2799_v43  ;;  %v2787_v62 = vmax.f32 %v2771_v30, 0.0  ;;  %v2772_v60 = vadd.f32 %v7710_v1, %v2556_v34  ;;  %v2557_v40 = vadd.f32 %v2431_v36, %v2027_v7  ;;  %v6533_v43 = vld [vmem:[%s8789_s3 + $0x260] ss:$8 sps:$4 sm:$0xff]  }
 0x212   :  { %v2435_v6 = vpop.f32.mrf.mxu0  ;;  %v3689_v45 = vld [vmem:[#allocation5 + $0xa] sm:$0xff]  ;;  %3486 = vmatpush1.bf16.msra.mxu1 %v6524_v46  ;;  %v6536_v30 = vld [vmem:[%s8789_s3 + $0xa0] ss:$8 sps:$4 sm:$0xff]  }
 0x213   :  { %3048 = vst [vmem:[#allocation5 + $0x18] sm:$0xff] %v3032_v12  ;;  %v2800_v14 = vmax.f32 %v2786_v53, %v2787_v62  ;;  %v2773_v23 = vadd.f32 %v7715_v49, %v2557_v40  ;;  %v2558_v57 = vadd.f32 %v2435_v6, %v2028_v42  ;;  %v3704_v27 = vpack.c.bf16 %v3689_v45, %v3688_v58  ;;  %v8909_v22 = vld [vmem:[#allocation15_spill] sm:$0xff]  ;;  %v8910_v34 = vld [vmem:[#allocation16_spill] sm:$0xff]  ;;  %v8912_v6 = vld [vmem:[#allocation53_spill] sm:$0xff] }
 0x214   :  { %v2437_v37 = vpop.f32.mrf.mxu0  ;;  %v3078_v55 = vpack.c.bf16 %v3032_v12, %v7746_v13  ;;  %3487 = vmatprep.subr.bf16.mxu1 %v6529_v20  ;;  %v2788_v50 = vmax.f32 %v2772_v60, 0.0  ;;  %v6538_v13 = vld [vmem:[%s8789_s3 + $0xa4] ss:$8 sps:$4 sm:$0xff]   ;;  %v975_v46 = vadd.f32 %v8910_v34, %v8909_v22  ;;  %v6547_v60 = vld [vmem:[%s8789_s3 + $0x94] ss:$8 sps:$4 sm:$0xff]   ;;  %v2033_v40 = vadd.f32 %v7597_v8, %v7492_v33 }
 0x215   :  { %2808 = vst [vmem:[#allocation4 + $0x50] sm:$0xff] %v2800_v14  ;;  %v2789_v4 = vmax.f32 %v2773_v23, 0.0  ;;  %v2774_v3 = vadd.f32 %v7710_v1, %v2558_v57  ;;  %v2559_v59 = vadd.f32 %v2437_v37, %v2029_v25  ;;  %3842 = vmatmul.mubr.bf16.vlgmr.msra.gmra.mxu0 %v3704_v27  ;;  %v8911_v20 = vld [vmem:[#allocation51_spill] sm:$0xff]  ;;  %v8913_v57 = vld [vmem:[#allocation52_spill] sm:$0xff]  ;;  %v6539_v33 = vld [vmem:[%s8789_s3 + $0x250] ss:$8 sps:$4 sm:$0xff]  }
 0x216   :  { %v2439_v54 = vpop.f32.mrf.mxu0  ;;  %3224 = vmatmul.mubr.bf16.gmra.mxu1 %v3078_v55  ;;  %3851 = vmatprep.mubr.bf16.mxu0 %v8821_v32  ;;  %v2032_v31 = vadd.f32 %v7587_v18, %v8911_v20  ;;  %v6541_v18 = vld [vmem:[%s8789_s3 + $0x254] ss:$8 sps:$4 sm:$0xff]   ;;  %v1505_v45 = vadd.f32 %v8912_v6, %v975_v46  ;;  %v8914_v58 = vld [vmem:[#allocation79_spill] sm:$0xff]  ;;  %v6545_v8 = vld [vmem:[%s8789_s3 + $0x90] ss:$8 sps:$4 sm:$0xff]  }
 0x217   :  { %v2801_v51 = vmax.f32 %v2788_v50, %v2789_v4  ;;  %v2775_v11 = vadd.f32 %v7715_v49, %v2559_v59  ;;  %v2560_v7 = vadd.f32 %v2439_v54, %v2030_v24  ;;  %3233 = vmatprep.mubr.bf16.mxu1 %v8821_v32  ;;  %v2790_v48 = vmax.f32 %v2774_v3, 0.0  ;;  %3488 = vmatpush1.bf16.msra.mxu1 %v6527_v21  ;;  %v7834_v24 = vpop.f32.mrf.mxu1  ;;  %v2830_v27 = vld [vmem:[%s8790_s2] sm:$0x3]  ;;  %v6544_v4 = vld [vmem:[%s8789_s3 + $0x244] ss:$8 sps:$4 sm:$0xff]   ;;  %v8918_v34 = vld [vmem:[#allocation54_spill] sm:$0xff] }
 0x218   :  { %v2974_v41 = vld [vmem:[#allocation4 + $0x40] ss:$2 sm:$0xff]  ;;  %v3006_v42 = vld [vmem:[#allocation4 + $0x41] ss:$2 sm:$0xff]  ;;  %v2441_v56 = vpop.f32.mrf.mxu0  ;;  %4470 = vmatpush1.bf16.msra.mxu0 %v6530_v29  ;;  %3489 = vmatprep.subr.bf16.mxu1 %v6538_v13  ;;  %v2034_v19 = vadd.f32 %v8914_v58, %v8913_v57  ;;  %v8921_v57 = vld [vmem:[#allocation55_spill] sm:$0xff] }
 0x219   :  { %v7818_v53 = vmax.f32 %v2974_v41, %v3006_v42  ;;  %2809 = vst [vmem:[#allocation4 + $0x58] sm:$0xff] %v2801_v51  ;;  %v2791_v36 = vmax.f32 %v2775_v11, 0.0  ;;  %v2776_v12 = vadd.f32 %v7710_v1, %v2560_v7  ;;  %v2561_v62 = vadd.f32 %v2441_v56, %v2031_v28  ;;  %4471 = vmatprep.subr.bf16.mxu0 %v6535_v26  ;;  %v6556_v3 = vld [vmem:[%s8789_s3 + $0x84] ss:$8 sps:$4 sm:$0xff]   ;;  %v8915_v26 = vld [vmem:[#allocation82_spill] sm:$0xff]  ;;  %v8920_v6 = vld [vmem:[#allocation57_spill] sm:$0xff] }
 0x21a   :  { %v2445_v63 = vpop.f32.mrf.mxu0  ;;  %v2035_v13 = vadd.f32 %v8915_v26, %v1505_v45  ;;  %v6542_v11 = vld [vmem:[%s8789_s3 + $0x240] ss:$8 sps:$4 sm:$0xff]  }
 0x21b   :  { %3049 = vst [vmem:[#allocation5 + $0x20] sm:$0xff] %v7818_v53  ;;  %v2802_v25 = vmax.f32 %v2790_v48, %v2791_v36  ;;  %v2777_v14 = vadd.f32 %v7715_v49, %v2561_v62  ;;  %v2562_v23 = vadd.f32 %v2445_v63, %v2032_v31  ;;  %3490 = vmatpush1.bf16.msra.mxu1 %v6536_v30  ;;  %v2792_v55 = vmax.f32 %v2776_v12, 0.0  ;;  %v6554_v7 = vld [vmem:[%s8789_s3 + $0x80] ss:$8 sps:$4 sm:$0xff]   ;;  %v8917_v30 = vld [vmem:[#allocation18_spill] sm:$0xff]  ;;  %v7864_v31 = vpop.f32.mrf.mxu1 }
 0x21c   :  { %v2447_v37 = vpop.f32.mrf.mxu0  ;;  %4472 = vmatpush1.bf16.msra.mxu0 %v6533_v43  ;;  %3491 = vmatprep.subr.bf16.mxu1 %v6547_v60  ;;  %v8916_v43 = vld [vmem:[#allocation17_spill] sm:$0xff]  ;;  %v8919_v46 = vld [vmem:[#allocation84_spill] sm:$0xff]  ;;  %v7867_v36 = vrot.slane %v2830_v27, %v7617_v61 }
 0x21d   :  { %2810 = vst [vmem:[#allocation4 + $0x60] sm:$0xff] %v2802_v25  ;;  %v2793_v21 = vmax.f32 %v2777_v14, 0.0  ;;  %v2778_v29 = vadd.f32 %v7710_v1, %v2562_v23  ;;  %v2563_v50 = vadd.f32 %v2447_v37, %v2033_v40  ;;  %4473 = vmatprep.subr.bf16.mxu0 %v6541_v18  ;;  %v979_v22 = vadd.f32 %v8917_v30, %v8916_v43  ;;  %v6550_v40 = vld [vmem:[%s8789_s3 + $0x234] ss:$8 sps:$4 sm:$0xff]   ;;  %v8924_v43 = vld [vmem:[#allocation19_spill] sm:$0xff]  ;;  %v8925_v30 = vld [vmem:[#allocation20_spill] sm:$0xff] }
 0x21e   :  { %v2449_v59 = vpop.f32.mrf.mxu0  ;;  %v2036_v20 = vadd.f32 %v8919_v46, %v8918_v34  ;;  %v6565_v63 = vld [vmem:[%s8789_s3 + $0x1f4] ss:$8 sps:$4 sm:$0xff]   ;;  %v7878_v14 = vrot.slane %v2830_v27, %v7625_v9 }
 0x21f   :  { %v2803_v28 = vmax.f32 %v2792_v55, %v2793_v21  ;;  %v2779_v54 = vadd.f32 %v7715_v49, %v2563_v50  ;;  %v2564_v51 = vadd.f32 %v2449_v59, %v2034_v19  ;;  %v2794_v48 = vmax.f32 %v2778_v29, 0.0  ;;  %3492 = vmatpush1.bf16.msra.mxu1 %v6545_v8  ;;  %v3690_v8 = vld [vmem:[#allocation5 + $0x12] sm:$0xff]  ;;  %v8923_v55 = vld [vmem:[#allocation56_spill] sm:$0xff]  ;;  %v7885_v29 = vpop.f32.mrf.mxu1 }
 0x220   :  { %v2976_v41 = vld [vmem:[#allocation4 + $0x50] ss:$2 sm:$0xff]  ;;  %v3008_v42 = vld [vmem:[#allocation4 + $0x51] ss:$2 sm:$0xff]  ;;  %v2451_v56 = vpop.f32.mrf.mxu0  ;;  %4474 = vmatpush1.bf16.msra.mxu0 %v6539_v33  ;;  %3493 = vmatprep.subr.bf16.mxu1 %v6556_v3  ;;  %v1509_v45 = vadd.f32 %v8920_v6, %v979_v22  ;;  %v2038_v21 = vadd.f32 %v7654_v47, %v8923_v55  ;;  %v983_v22 = vadd.f32 %v8925_v30, %v8924_v43  ;;  %v8928_v6 = vld [vmem:[#allocation61_spill] sm:$0xff] }
 0x221   :  { %v3034_v12 = vmax.f32 %v2976_v41, %v3008_v42  ;;  %2811 = vst [vmem:[#allocation4 + $0x68] sm:$0xff] %v2803_v28  ;;  %v2795_v62 = vmax.f32 %v2779_v54, 0.0  ;;  %v2780_v18 = vadd.f32 %v7710_v1, %v2564_v51  ;;  %v2565_v60 = vadd.f32 %v2451_v56, %v2035_v13  ;;  %4475 = vmatprep.subr.bf16.mxu0 %v6544_v4  ;;  %v8922_v1 = vld [vmem:[#allocation86_spill] sm:$0xff]  ;;  %v6553_v47 = vld [vmem:[%s8789_s3 + $0x224] ss:$8 sps:$4 sm:$0xff]   ;;  %v7906_v46 = vpop.f32.mrf.mxu1 }
 0x222   :  { %v2455_v25 = vpop.f32.mrf.mxu0  ;;  %v3691_v23 = vld [vmem:[#allocation5 + $0x1a] sm:$0xff]  ;;  %v2037_v58 = vadd.f32 %v8922_v1, %v8921_v57  ;;  %v6548_v3 = vld [vmem:[%s8789_s3 + $0x230] ss:$8 sps:$4 sm:$0xff]  }
 0x223   :  { %3050 = vst [vmem:[#allocation5 + $0x28] sm:$0xff] %v3034_v12  ;;  %v2804_v19 = vmax.f32 %v2794_v48, %v2795_v62  ;;  %v2781_v37 = vadd.f32 %v7715_v49, %v2565_v60  ;;  %v2566_v33 = vadd.f32 %v2455_v25, %v2036_v20  ;;  %v3705_v4 = vpack.c.bf16 %v3691_v23, %v3690_v8  ;;  %v8926_v34 = vld [vmem:[#allocation58_spill] sm:$0xff]  ;;  %v8929_v1 = vld [vmem:[#allocation60_spill] sm:$0xff] }
 0x224   :  { %v2457_v50 = vpop.f32.mrf.mxu0  ;;  %v3079_v27 = vpack.c.bf16 %v3034_v12, %v7818_v53  ;;  %4476 = vmatpush1.bf16.msra.mxu0 %v6542_v11  ;;  %3494 = vmatpush1.bf16.msra.mxu1 %v6554_v7  ;;  %v2796_v59 = vmax.f32 %v2780_v18, 0.0  ;;  %v2039_v53 = vadd.f32 %v7662_v15, %v1509_v45  ;;  %v6551_v7 = vld [vmem:[%s8789_s3 + $0x220] ss:$8 sps:$4 sm:$0xff]   ;;  %v2040_v15 = vadd.f32 %v7670_v52, %v8926_v34  ;;  %v6559_v60 = vld [vmem:[%s8789_s3 + $0x214] ss:$8 sps:$4 sm:$0xff]  }
 0x225   :  { %2812 = vst [vmem:[#allocation4 + $0x70] sm:$0xff] %v2804_v19  ;;  %v2797_v49 = vmax.f32 %v2781_v37, 0.0  ;;  %v2842_v26 = vadd.f32 %v7867_v36, %v2566_v33  ;;  %v2567_v13 = vadd.f32 %v2457_v50, %v2037_v58  ;;  %4477 = vmatprep.subr.bf16.mxu0 %v6550_v40  ;;  %4139 = vmatprep.subr.bf16.mxu1 %v6565_v63  ;;  %v8927_v52 = vld [vmem:[#allocation59_spill] sm:$0xff]  ;;  %v7921_v19 = vpop.f32.mrf.mxu1 }
 0x226   :  { %3852 = vmatmul.mubr.bf16.gmra.mxu0 %v3705_v4  ;;  %v2459_v28 = vpop.f32.mrf.mxu0  ;;  %3234 = vmatmul.mubr.bf16.gmra.mxu1 %v3079_v27  ;;  %v2041_v40 = vadd.f32 %v7678_v16, %v8927_v52  ;;  %v1513_v45 = vadd.f32 %v8928_v6, %v983_v22  ;;  %v2042_v58 = vadd.f32 %v7686_v2, %v8929_v1  ;;  %v6557_v16 = vld [vmem:[%s8789_s3 + $0x210] ss:$8 sps:$4 sm:$0xff]   ;;  %v6562_v50 = vld [vmem:[%s8789_s3 + $0x204] ss:$8 sps:$4 sm:$0xff]  }
 0x227   :  { %v2805_v54 = vmax.f32 %v2796_v59, %v2797_v49  ;;  %v2843_v51 = vadd.f32 %v7878_v14, %v2567_v13  ;;  %v2568_v11 = vadd.f32 %v2459_v28, %v2038_v21  ;;  %3861 = vmatprep.mubr.bf16.mxu0 %v8821_v32  ;;  %3243 = vmatprep.mubr.bf16.mxu1 %v8821_v32  ;;  %v2858_v42 = vmax.f32 %v2842_v26, 0.0  ;;  %v6560_v49 = vld [vmem:[%s8789_s3 + $0x200] ss:$8 sps:$4 sm:$0xff]   ;;  %v8930_v26 = vld [vmem:[#allocation21_spill] sm:$0xff]  ;;  %v8931_v13 = vld [vmem:[#allocation22_spill] sm:$0xff] }
 0x228   :  { %v2978_v20 = vld [vmem:[#allocation4 + $0x60] ss:$2 sm:$0xff]  ;;  %v3010_v41 = vld [vmem:[#allocation4 + $0x61] ss:$2 sm:$0xff]  ;;  %v2461_v48 = vpop.f32.mrf.mxu0  ;;  %4478 = vmatpush1.bf16.msra.mxu0 %v6548_v3  ;;  %v2043_v4 = vadd.f32 %v7694_v10, %v1513_v45 }
 0x229   :  { %v7908_v56 = vmax.f32 %v2978_v20, %v3010_v41  ;;  %2813 = vst [vmem:[#allocation4 + $0x78] sm:$0xff] %v2805_v54  ;;  %v2859_v12 = vmax.f32 %v2843_v51, 0.0  ;;  %v2844_v62 = vadd.f32 %v7867_v36, %v2568_v11  ;;  %v2569_v18 = vadd.f32 %v2461_v48, %v2039_v53  ;;  %4479 = vmatprep.subr.bf16.mxu0 %v6553_v47  ;;  %v8932_v53 = vld [vmem:[#allocation62_spill] sm:$0xff]  ;;  %v7939_v54 = vpop.f32.mrf.mxu1  ;;  %v8934_v48 = vld [vmem:[#allocation63_spill] sm:$0xff]  ;;  %v8935_v52 = vld [vmem:[#allocation64_spill] sm:$0xff] }
 0x22a   :  { %v2465_v63 = vpop.f32.mrf.mxu0  ;;  %v987_v47 = vadd.f32 %v8931_v13, %v8930_v26  ;;  %v2044_v28 = vadd.f32 %v7707_v38, %v8932_v53  ;;  %v2045_v38 = vadd.f32 %v7725_v35, %v8934_v48  ;;  %v8939_v53 = vld [vmem:[#allocation67_spill] sm:$0xff] }
 0x22b   :  { %3051 = vst [vmem:[#allocation5 + $0x30] sm:$0xff] %v7908_v56  ;;  %v2874_v25 = vmax.f32 %v2858_v42, %v2859_v12  ;;  %v2845_v23 = vadd.f32 %v7878_v14, %v2569_v18  ;;  %v2570_v57 = vadd.f32 %v2465_v63, %v2040_v15  ;;  %v2860_v33 = vmax.f32 %v2844_v62, 0.0  ;;  %v8933_v15 = vld [vmem:[#allocation65_spill] sm:$0xff]  ;;  %v7948_v63 = vpop.f32.mrf.mxu1  ;;  %v2906_v48 = vld [vmem:[%s8790_s2] sm:$0x3] }
 0x22c   :  { %v2467_v37 = vpop.f32.mrf.mxu0  ;;  %4480 = vmatpush1.bf16.msra.mxu0 %v6551_v7  ;;  %v1517_v20 = vadd.f32 %v8933_v15, %v987_v47 }
 0x22d   :  { %2882 = vst [vmem:[#allocation4 + $0x80] sm:$0xff] %v2874_v25  ;;  %v2861_v8 = vmax.f32 %v2845_v23, 0.0  ;;  %v2846_v55 = vadd.f32 %v7867_v36, %v2570_v57  ;;  %v2571_v21 = vadd.f32 %v2467_v37, %v2041_v40  ;;  %4481 = vmatprep.subr.bf16.mxu0 %v6559_v60  ;;  %v3692_v60 = vld [vmem:[#allocation5 + $0x22] sm:$0xff]  ;;  %v2046_v40 = vadd.f32 %v7744_v5, %v8935_v52  ;;  %v8943_v52 = vld [vmem:[#allocation26_spill] sm:$0xff] }
 0x22e   :  { %v2469_v2 = vpop.f32.mrf.mxu0  ;;  %v2047_v37 = vadd.f32 %v7759_v39, %v1517_v20 }
 0x22f   :  { %v2875_v27 = vmax.f32 %v2860_v33, %v2861_v8  ;;  %v2847_v3 = vadd.f32 %v7878_v14, %v2571_v21  ;;  %v2572_v59 = vadd.f32 %v2469_v2, %v2042_v58  ;;  %v2862_v7 = vmax.f32 %v2846_v55, 0.0  ;;  %v7952_v58 = vld [vmem:[#allocation2 + $0x100] sm:$0xff]  ;;  %v8937_v55 = vld [vmem:[#allocation24_spill] sm:$0xff] }
 0x230   :  { %v2980_v51 = vld [vmem:[#allocation4 + $0x70] ss:$2 sm:$0xff]  ;;  %v3012_v11 = vld [vmem:[#allocation4 + $0x71] ss:$2 sm:$0xff]  ;;  %v2471_v10 = vpop.f32.mrf.mxu0  ;;  %4482 = vmatpush1.bf16.msra.mxu0 %v6557_v16 }
 0x231   :  { %v3036_v43 = vmax.f32 %v2980_v51, %v3012_v11  ;;  %2883 = vst [vmem:[#allocation4 + $0x88] sm:$0xff] %v2875_v27  ;;  %v2863_v30 = vmax.f32 %v2847_v3, 0.0  ;;  %v2848_v22 = vadd.f32 %v7867_v36, %v2572_v59  ;;  %v2573_v34 = vadd.f32 %v2471_v10, %v2043_v4  ;;  %4483 = vmatprep.subr.bf16.mxu0 %v6562_v50  ;;  %v8936_v8 = vld [vmem:[#allocation23_spill] sm:$0xff]  ;;  %v8938_v50 = vld [vmem:[#allocation66_spill] sm:$0xff]  ;;  %v7963_v4 = vpop.f32.mrf.mxu1  ;;  %v8940_v11 = vld [vmem:[#allocation69_spill] sm:$0xff] }
 0x232   :  { %v2475_v41 = vpop.f32.mrf.mxu0  ;;  %v3693_v42 = vld [vmem:[#allocation5 + $0x2a] sm:$0xff]  ;;  %v991_v21 = vadd.f32 %v8937_v55, %v8936_v8  ;;  %v2048_v2 = vadd.f32 %v7777_v44, %v8938_v50  ;;  %v8946_v50 = vld [vmem:[#allocation71_spill] sm:$0xff] }
 0x233   :  { %3052 = vst [vmem:[#allocation5 + $0x38] sm:$0xff] %v3036_v43  ;;  %v2876_v12 = vmax.f32 %v2862_v7, %v2863_v30  ;;  %v2849_v62 = vadd.f32 %v7878_v14, %v2573_v34  ;;  %v2574_v18 = vadd.f32 %v2475_v41, %v2044_v28  ;;  %v3706_v45 = vpack.c.bf16 %v3693_v42, %v3692_v60  ;;  %v8941_v30 = vld [vmem:[#allocation68_spill] sm:$0xff]  ;;  %v7972_v34 = vpop.f32.mrf.mxu1  ;;  %v8942_v60 = vld [vmem:[#allocation25_spill] sm:$0xff] }
 0x234   :  { %v2477_v6 = vpop.f32.mrf.mxu0  ;;  %v3080_v25 = vpack.c.bf16 %v3036_v43, %v7908_v56  ;;  %4484 = vmatpush1.bf16.msra.mxu0 %v6560_v49  ;;  %v2864_v23 = vmax.f32 %v2848_v22, 0.0  ;;  %v2049_v28 = vadd.f32 %v7786_v0, %v8939_v53  ;;  %v1521_v7 = vadd.f32 %v8940_v11, %v991_v21 }
 0x235   :  { %2884 = vst [vmem:[#allocation4 + $0x90] sm:$0xff] %v2876_v12  ;;  %v2865_v57 = vmax.f32 %v2849_v62, 0.0  ;;  %v2850_v35 = vadd.f32 %v7867_v36, %v2574_v18  ;;  %v2575_v1 = vadd.f32 %v2477_v6, %v2045_v38  ;;  %6228 = vmatprep.subr.bf16.mxu0 %v7952_v58  ;;  %3862 = vmatmul.mubr.bf16.gmra.mxu0 %v3706_v45  ;;  %v8944_v6 = vld [vmem:[#allocation70_spill] sm:$0xff] }
 0x236   :  { %v2479_v5 = vpop.f32.mrf.mxu0  ;;  %3244 = vmatmul.mubr.bf16.gmra.mxu1 %v3080_v25  ;;  %3871 = vmatprep.mubr.bf16.mxu0 %v8821_v32  ;;  %v2050_v22 = vadd.f32 %v7816_v17, %v8941_v30  ;;  %v2051_v12 = vadd.f32 %v7834_v24, %v1521_v7  ;;  %v2052_v45 = vadd.f32 %v7864_v31, %v8944_v6  ;;  %v7984_v25 = vpop.f32.mrf.mxu1  ;;  %v8949_v30 = vld [vmem:[#allocation28_spill] sm:$0xff] }
 0x237   :  { %v2877_v16 = vmax.f32 %v2864_v23, %v2865_v57  ;;  %v2851_v33 = vadd.f32 %v7878_v14, %v2575_v1  ;;  %v2576_v56 = vadd.f32 %v2479_v5, %v2046_v40  ;;  %3253 = vmatprep.mubr.bf16.mxu1 %v8821_v32  ;;  %v2866_v3 = vmax.f32 %v2850_v35, 0.0 }
 0x238   :  { %v2982_v39 = vld [vmem:[#allocation4 + $0x80] ss:$2 sm:$0xff]  ;;  %v3014_v27 = vld [vmem:[#allocation4 + $0x81] ss:$2 sm:$0xff]  ;;  %v2481_v59 = vpop.f32.mrf.mxu0  ;;  %v995_v40 = vadd.f32 %v8943_v52, %v8942_v60  ;;  %v7992_v31 = vrot.slane %v2906_v48, %v7625_v9 }
 0x239   :  { %v3037_v49 = vmax.f32 %v2982_v39, %v3014_v27  ;;  %2885 = vst [vmem:[#allocation4 + $0x98] sm:$0xff] %v2877_v16  ;;  %v2867_v26 = vmax.f32 %v2851_v33, 0.0  ;;  %v2852_v13 = vadd.f32 %v7867_v36, %v2576_v56  ;;  %v2577_v47 = vadd.f32 %v2481_v59, %v2047_v37  ;;  %v8945_v56 = vld [vmem:[#allocation73_spill] sm:$0xff] }
 0x23a   :  { %v2485_v51 = vpop.f32.mrf.mxu0  ;;  %v7987_v37 = vrot.slane %v2906_v48, %v7617_v61  ;;  %v1525_v8 = vadd.f32 %v8945_v56, %v995_v40  ;;  %v3694_v59 = vld [vmem:[#allocation5 + $0x32] sm:$0xff]  ;;  %v8952_v40 = vld [vmem:[#allocation77_spill] sm:$0xff] }
 0x23b   :  { %3053 = vst [vmem:[#allocation5 + $0x40] sm:$0xff] %v3037_v49  ;;  %v2878_v44 = vmax.f32 %v2866_v3, %v2867_v26  ;;  %v2853_v10 = vadd.f32 %v7878_v14, %v2577_v47  ;;  %v2578_v43 = vadd.f32 %v2485_v51, %v2048_v2  ;;  %v2868_v20 = vmax.f32 %v2852_v13, 0.0  ;;  %v8947_v26 = vld [vmem:[#allocation72_spill] sm:$0xff]  ;;  %v7999_v13 = vpop.f32.mrf.mxu1 }
 0x23c   :  { %v2487_v15 = vpop.f32.mrf.mxu0  ;;  %v2053_v2 = vadd.f32 %v7885_v29, %v8946_v50 }
 0x23d   :  { %2886 = vst [vmem:[#allocation4 + $0xa0] sm:$0xff] %v2878_v44  ;;  %v2869_v41 = vmax.f32 %v2853_v10, 0.0  ;;  %v2854_v42 = vadd.f32 %v7867_v36, %v2578_v43  ;;  %v2579_v0 = vadd.f32 %v2487_v15, %v2049_v28  ;;  %v2055_v44 = vadd.f32 %v7921_v19, %v1525_v8  ;;  %v8950_v15 = vld [vmem:[#allocation74_spill] sm:$0xff] }
 0x23e   :  { %v2489_v38 = vpop.f32.mrf.mxu0 }
 0x23f   :  { %v2879_v62 = vmax.f32 %v2868_v20, %v2869_v41  ;;  %v2855_v18 = vadd.f32 %v7878_v14, %v2579_v0  ;;  %v2580_v17 = vadd.f32 %v2489_v38, %v2050_v22  ;;  %v2870_v35 = vmax.f32 %v2854_v42, 0.0  ;;  %v1989_v41 = vpop.f32.mrf.mxu1 }
 0x240   :  { %v2984_v23 = vld [vmem:[#allocation4 + $0x90] ss:$2 sm:$0xff]  ;;  %v3016_v57 = vld [vmem:[#allocation4 + $0x91] ss:$2 sm:$0xff]  ;;  %v2491_v1 = vpop.f32.mrf.mxu0  ;;  %v2056_v20 = vadd.f32 %v7939_v54, %v8950_v15 }
 0x241   :  { %v3038_v24 = vmax.f32 %v2984_v23, %v3016_v57  ;;  %2887 = vst [vmem:[#allocation4 + $0xa8] sm:$0xff] %v2879_v62  ;;  %v2871_v5 = vmax.f32 %v2855_v18, 0.0  ;;  %v2856_v16 = vadd.f32 %v7867_v36, %v2580_v17  ;;  %v2581_v33 = vadd.f32 %v2491_v1, %v2051_v12  ;;  %v8951_v17 = vld [vmem:[#allocation75_spill] sm:$0xff]  ;;  %v8953_v57 = vld [vmem:[#allocation76_spill] sm:$0xff]  ;;  %v1991_v1 = vpop.f32.mrf.mxu1 }
 0x242   :  { %v2495_v55 = vpop.f32.mrf.mxu0  ;;  %v3695_v21 = vld [vmem:[#allocation5 + $0x3a] sm:$0xff]  ;;  %v2054_v36 = vadd.f32 %v7906_v46, %v8947_v26  ;;  %v2057_v60 = vadd.f32 %v7948_v63, %v8951_v17 }
 0x243   :  { %3054 = vst [vmem:[#allocation5 + $0x48] sm:$0xff] %v3038_v24  ;;  %v2880_v39 = vmax.f32 %v2870_v35, %v2871_v5  ;;  %v2857_v27 = vadd.f32 %v7878_v14, %v2581_v33  ;;  %v2582_v3 = vadd.f32 %v2495_v55, %v2052_v45  ;;  %v3707_v53 = vpack.c.bf16 %v3695_v21, %v3694_v59  ;;  %v1995_v59 = vpop.f32.mrf.mxu1 }
 0x244   :  { %v2497_v47 = vpop.f32.mrf.mxu0  ;;  %v3081_v28 = vpack.c.bf16 %v3038_v24, %v3037_v49  ;;  %v2872_v51 = vmax.f32 %v2856_v16, 0.0  ;;  %v8948_v49 = vld [vmem:[#allocation27_spill] sm:$0xff]  ;;  %v2058_v35 = vadd.f32 %v7963_v4, %v8953_v57 }
 0x245   :  { %2888 = vst [vmem:[#allocation4 + $0xb0] sm:$0xff] %v2880_v39  ;;  %v2873_v11 = vmax.f32 %v2857_v27, 0.0  ;;  %v2918_v7 = vadd.f32 %v7987_v37, %v2582_v3  ;;  %v2583_v29 = vadd.f32 %v2497_v47, %v2053_v2  ;;  %3872 = vmatmul.mubr.bf16.gmra.mxu0 %v3707_v53  ;;  %v999_v22 = vadd.f32 %v8949_v30, %v8948_v49  ;;  %v8954_v2 = vld [vmem:[#allocation31_spill] sm:$0xff]  ;;  %v8955_v39 = vld [vmem:[#allocation32_spill] sm:$0xff]  ;;  %v8956_v3 = vld [vmem:[#allocation29_spill] sm:$0xff] }
 0x246   :  { %v2499_v14 = vpop.f32.mrf.mxu0  ;;  %3254 = vmatmul.mubr.bf16.gmra.mxu1 %v3081_v28  ;;  %3881 = vmatprep.mubr.bf16.mxu0 %v8821_v32  ;;  %v1003_v27 = vadd.f32 %v8955_v39, %v8954_v2  ;;  %v2060_v4 = vadd.f32 %v7984_v25, %v8956_v3  ;;  %v8965_v3 = vld [vmem:[#allocation83_spill] sm:$0xff] }
 0x247   :  { %v2881_v10 = vmax.f32 %v2872_v51, %v2873_v11  ;;  %v2919_v43 = vadd.f32 %v7992_v31, %v2583_v29  ;;  %v2584_v46 = vadd.f32 %v2499_v14, %v2054_v36  ;;  %3263 = vmatprep.mubr.bf16.mxu1 %v8821_v32  ;;  %v2934_v0 = vmax.f32 %v2918_v7, 0.0  ;;  %v8957_v7 = vld [vmem:[#allocation80_spill] sm:$0xff] }
 0x248   :  { %v2986_v42 = vld [vmem:[#allocation4 + $0xa0] ss:$2 sm:$0xff]  ;;  %v3018_v19 = vld [vmem:[#allocation4 + $0xa1] ss:$2 sm:$0xff]  ;;  %v2501_v48 = vpop.f32.mrf.mxu0  ;;  %v1529_v6 = vadd.f32 %v8952_v40, %v999_v22  ;;  %v1533_v29 = vadd.f32 %v8957_v7, %v1003_v27  ;;  %v8959_v22 = vld [vmem:[#allocation78_spill] sm:$0xff] }
 0x249   :  { %v3039_v38 = vmax.f32 %v2986_v42, %v3018_v19  ;;  %2889 = vst [vmem:[#allocation4 + $0xb8] sm:$0xff] %v2881_v10  ;;  %v2935_v12 = vmax.f32 %v2919_v43, 0.0  ;;  %v2920_v62 = vadd.f32 %v7987_v37, %v2584_v46  ;;  %v2585_v18 = vadd.f32 %v2501_v48, %v2055_v44  ;;  %v8958_v10 = vld [vmem:[#allocation30_spill] sm:$0xff] }
 0x24a   :  { %v2505_v52 = vpop.f32.mrf.mxu0  ;;  %v2059_v8 = vadd.f32 %v7972_v34, %v1529_v6  ;;  %v2061_v43 = vadd.f32 %v7999_v13, %v8958_v10  ;;  %v3696_v30 = vld [vmem:[#allocation5 + $0x42] sm:$0xff]  ;;  %v2062_v15 = vadd.f32 %v1989_v41, %v8959_v22  ;;  %v2063_v17 = vadd.f32 %v1991_v1, %v1533_v29  ;;  %v8960_v41 = vld [vmem:[#allocation34_spill] sm:$0xff] }
 0x24b   :  { %3055 = vst [vmem:[#allocation5 + $0x50] sm:$0xff] %v3039_v38  ;;  %v2950_v45 = vmax.f32 %v2934_v0, %v2935_v12  ;;  %v2921_v54 = vadd.f32 %v7992_v31, %v2585_v18  ;;  %v2586_v23 = vadd.f32 %v2505_v52, %v2056_v20  ;;  %v2936_v5 = vmax.f32 %v2920_v62, 0.0  ;;  %v1997_v20 = vpop.f32.mrf.mxu1 }
 0x24c   :  { %v2507_v24 = vpop.f32.mrf.mxu0 }
 0x24d   :  { %2958 = vst [vmem:[#allocation4 + $0xc0] sm:$0xff] %v2950_v45  ;;  %v2937_v16 = vmax.f32 %v2921_v54, 0.0  ;;  %v2922_v33 = vadd.f32 %v7987_v37, %v2586_v23  ;;  %v2587_v56 = vadd.f32 %v2507_v24, %v2057_v60  ;;  %v8962_v45 = vld [vmem:[#allocation81_spill] sm:$0xff]  ;;  %v1999_v23 = vpop.f32.mrf.mxu1 }
 0x24e   :  { %v2509_v63 = vpop.f32.mrf.mxu0  ;;  %v2064_v54 = vadd.f32 %v1995_v59, %v8962_v45  ;;  %v6563_v45 = vld [vmem:[%s8789_s3 + $0x1f0] ss:$8 sps:$4 sm:$0xff]  }
 0x24f   :  { %v2951_v55 = vmax.f32 %v2936_v5, %v2937_v16  ;;  %v2923_v21 = vadd.f32 %v7992_v31, %v2587_v56  ;;  %v2588_v50 = vadd.f32 %v2509_v63, %v2058_v35  ;;  %v2938_v47 = vmax.f32 %v2922_v33, 0.0  ;;  %v8963_v63 = vld [vmem:[#allocation33_spill] sm:$0xff]  ;;  %v2001_v59 = vpop.f32.mrf.mxu1 }
 0x250   :  { %v2988_v26 = vld [vmem:[#allocation4 + $0xb0] ss:$2 sm:$0xff]  ;;  %v3020_v36 = vld [vmem:[#allocation4 + $0xb1] ss:$2 sm:$0xff]  ;;  %v2511_v53 = vpop.f32.mrf.mxu0 }
 0x251   :  { %v3040_v28 = vmax.f32 %v2988_v26, %v3020_v36  ;;  %2959 = vst [vmem:[#allocation4 + $0xc8] sm:$0xff] %v2951_v55  ;;  %v2939_v51 = vmax.f32 %v2923_v21, 0.0  ;;  %v2924_v34 = vadd.f32 %v7987_v37, %v2588_v50  ;;  %v2589_v11 = vadd.f32 %v2511_v53, %v2059_v8  ;;  %v8964_v21 = vld [vmem:[#allocation85_spill] sm:$0xff] }
 0x252   :  { %v2515_v44 = vpop.f32.mrf.mxu0  ;;  %v3697_v14 = vld [vmem:[#allocation5 + $0x4a] sm:$0xff]  ;;  %v2065_v8 = vadd.f32 %v1997_v20, %v8963_v63 }
 0x253   :  { %3056 = vst [vmem:[#allocation5 + $0x58] sm:$0xff] %v3040_v28  ;;  %v2952_v25 = vmax.f32 %v2938_v47, %v2939_v51  ;;  %v2925_v46 = vadd.f32 %v7992_v31, %v2589_v11  ;;  %v2590_v49 = vadd.f32 %v2515_v44, %v2060_v4  ;;  %v3708_v19 = vpack.c.bf16 %v3697_v14, %v3696_v30  ;;  %v4348_v63 = vld [vmem:[#allocation5 + $0x4] sm:$0xff] }
 0x254   :  { %v2517_v42 = vpop.f32.mrf.mxu0  ;;  %v3082_v0 = vpack.c.bf16 %v3040_v28, %v3039_v38  ;;  %v2940_v48 = vmax.f32 %v2924_v34, 0.0  ;;  %v8961_v38 = vld [vmem:[#allocation35_spill] sm:$0xff]  ;;  %v2066_v4 = vadd.f32 %v1999_v23, %v8965_v3  ;;  %v3363_v3 = vld [vmem:[#allocation5 + $0x29] sm:$0xff] }
 0x255   :  { %2960 = vst [vmem:[#allocation4 + $0xd0] sm:$0xff] %v2952_v25  ;;  %v2941_v12 = vmax.f32 %v2925_v46, 0.0  ;;  %v2926_v62 = vadd.f32 %v7987_v37, %v2590_v49  ;;  %v2591_v18 = vadd.f32 %v2517_v42, %v2061_v43  ;;  %3882 = vmatmul.mubr.bf16.gmra.mxu0 %v3708_v19  ;;  %v1007_v6 = vadd.f32 %v8961_v38, %v8960_v41 }
 0x256   :  { %v2519_v13 = vpop.f32.mrf.mxu0  ;;  %3264 = vmatmul.mubr.bf16.gmra.mxu1 %v3082_v0  ;;  %3891 = vmatprep.mubr.bf16.mxu0 %v8821_v32 }
 0x257   :  { %v2953_v60 = vmax.f32 %v2940_v48, %v2941_v12  ;;  %v2927_v52 = vadd.f32 %v7992_v31, %v2591_v18  ;;  %v2592_v40 = vadd.f32 %v2519_v13, %v2062_v15  ;;  %3273 = vmatprep.mubr.bf16.mxu1 %v8821_v32  ;;  %v2942_v1 = vmax.f32 %v2926_v62, 0.0 }
 0x258   :  { %v2990_v57 = vld [vmem:[#allocation4 + $0xc0] ss:$2 sm:$0xff]  ;;  %v3022_v35 = vld [vmem:[#allocation4 + $0xc1] ss:$2 sm:$0xff]  ;;  %v2521_v24 = vpop.f32.mrf.mxu0  ;;  %v1537_v50 = vadd.f32 %v8964_v21, %v1007_v6 }
 0x259   :  { %v3041_v5 = vmax.f32 %v2990_v57, %v3022_v35  ;;  %2961 = vst [vmem:[#allocation4 + $0xd8] sm:$0xff] %v2953_v60  ;;  %v2943_v16 = vmax.f32 %v2927_v52, 0.0  ;;  %v2928_v33 = vadd.f32 %v7987_v37, %v2592_v40  ;;  %v2593_v56 = vadd.f32 %v2521_v24, %v2063_v17  ;;  %v3359_v6 = vld [vmem:[#allocation5 + $0x9] sm:$0xff]  ;;  %v3358_v57 = vld [vmem:[#allocation5 + $0x1] sm:$0xff] }
 0x25a   :  { %v2525_v55 = vpop.f32.mrf.mxu0  ;;  %v2067_v34 = vadd.f32 %v2001_v59, %v1537_v50  ;;  %v3698_v22 = vld [vmem:[#allocation5 + $0x52] sm:$0xff]  ;;  %v6568_v24 = vld [vmem:[%s8789_s3 + $0x1e4] ss:$8 sps:$4 sm:$0xff]  }
 0x25b   :  { %3057 = vst [vmem:[#allocation5 + $0x60] sm:$0xff] %v3041_v5  ;;  %v2954_v2 = vmax.f32 %v2942_v1, %v2943_v16  ;;  %v2929_v39 = vadd.f32 %v7992_v31, %v2593_v56  ;;  %v2594_v27 = vadd.f32 %v2525_v55, %v2064_v54  ;;  %v2944_v36 = vmax.f32 %v2928_v33, 0.0  ;;  %v6571_v16 = vld [vmem:[%s8789_s3 + $0x1d4] ss:$8 sps:$4 sm:$0xff]   ;;  %v3361_v56 = vld [vmem:[#allocation5 + $0x19] sm:$0xff] }
 0x25c   :  { %v2527_v26 = vpop.f32.mrf.mxu0  ;;  %v3374_v1 = vpack.c.bf16 %v3359_v6, %v3358_v57  ;;  %v4349_v33 = vld [vmem:[#allocation5 + $0xc] sm:$0xff]  ;;  %v4350_v59 = vld [vmem:[#allocation5 + $0x14] sm:$0xff] }
 0x25d   :  { %2962 = vst [vmem:[#allocation4 + $0xe0] sm:$0xff] %v2954_v2  ;;  %v2945_v47 = vmax.f32 %v2929_v39, 0.0  ;;  %v2930_v53 = vadd.f32 %v7987_v37, %v2594_v27  ;;  %v2595_v28 = vadd.f32 %v2527_v26, %v2065_v8  ;;  %v3360_v8 = vld [vmem:[#allocation5 + $0x11] sm:$0xff]  ;;  %v4364_v55 = vpack.c.bf16 %v4349_v33, %v4348_v63  ;;  %v6574_v2 = vld [vmem:[%s8789_s3 + $0x1c4] ss:$8 sps:$4 sm:$0xff]  }
 0x25e   :  { %v2529_v51 = vpop.f32.mrf.mxu0  ;;  %v3375_v21 = vpack.c.bf16 %v3361_v56, %v3360_v8  ;;  %v6569_v50 = vld [vmem:[%s8789_s3 + $0x1d0] ss:$8 sps:$4 sm:$0xff]   ;;  %v6572_v39 = vld [vmem:[%s8789_s3 + $0x1c0] ss:$8 sps:$4 sm:$0xff]  }
 0x25f   :  { %v2955_v11 = vmax.f32 %v2944_v36, %v2945_v47  ;;  %v2931_v7 = vadd.f32 %v7992_v31, %v2595_v28  ;;  %v2596_v29 = vadd.f32 %v2529_v51, %v2066_v4  ;;  %v2946_v10 = vmax.f32 %v2930_v53, 0.0  ;;  %v4351_v27 = vld [vmem:[#allocation5 + $0x1c] sm:$0xff]  ;;  %v6577_v4 = vld [vmem:[%s8789_s3 + $0x1b4] ss:$8 sps:$4 sm:$0xff]   ;;  %v6575_v53 = vld [vmem:[%s8789_s3 + $0x1b0] ss:$8 sps:$4 sm:$0xff]  }
 0x260   :  { %v2992_v44 = vld [vmem:[#allocation4 + $0xd0] ss:$2 sm:$0xff]  ;;  %v3024_v14 = vld [vmem:[#allocation4 + $0xd1] ss:$2 sm:$0xff]  ;;  %v2531_v43 = vpop.f32.mrf.mxu0  ;;  %v3362_v26 = vld [vmem:[#allocation5 + $0x21] sm:$0xff]  ;;  %v4365_v36 = vpack.c.bf16 %v4351_v27, %v4350_v59 }
 0x261   :  { %v3042_v25 = vmax.f32 %v2992_v44, %v3024_v14  ;;  %2963 = vst [vmem:[#allocation4 + $0xe8] sm:$0xff] %v2955_v11  ;;  %v2947_v46 = vmax.f32 %v2931_v7, 0.0  ;;  %v2932_v49 = vadd.f32 %v7987_v37, %v2596_v29  ;;  %v2597_v30 = vadd.f32 %v2531_v43, %v2067_v34  ;;  %v6580_v28 = vld [vmem:[%s8789_s3 + $0x1a4] ss:$8 sps:$4 sm:$0xff]   ;;  %v6578_v51 = vld [vmem:[%s8789_s3 + $0x1a0] ss:$8 sps:$4 sm:$0xff]  }
 0x262   :  { %v3699_v15 = vld [vmem:[#allocation5 + $0x5a] sm:$0xff]  ;;  %v3376_v47 = vpack.c.bf16 %v3363_v3, %v3362_v26  ;;  %v4353_v34 = vld [vmem:[#allocation5 + $0x2c] sm:$0xff]  ;;  %v4352_v29 = vld [vmem:[#allocation5 + $0x24] sm:$0xff] }
 0x263   :  { %3058 = vst [vmem:[#allocation5 + $0x68] sm:$0xff] %v3042_v25  ;;  %v2956_v20 = vmax.f32 %v2946_v10, %v2947_v46  ;;  %v2933_v42 = vadd.f32 %v7992_v31, %v2597_v30  ;;  %v3709_v19 = vpack.c.bf16 %v3699_v15, %v3698_v22  ;;  %v3083_v0 = vpack.c.bf16 %v3042_v25, %v3041_v5  ;;  %v6566_v5 = vld [vmem:[%s8789_s3 + $0x1e0] ss:$8 sps:$4 sm:$0xff]   ;;  %v6583_v7 = vld [vmem:[%s8789_s3 + $0x194] ss:$8 sps:$4 sm:$0xff]  }
 0x264   :  { %v2948_v48 = vmax.f32 %v2932_v49, 0.0  ;;  %v3365_v11 = vld [vmem:[#allocation5 + $0x39] sm:$0xff]  ;;  %v3364_v44 = vld [vmem:[#allocation5 + $0x31] sm:$0xff]  ;;  %v4366_v14 = vpack.c.bf16 %v4353_v34, %v4352_v29  ;;  %v3367_v30 = vld [vmem:[#allocation5 + $0x49] sm:$0xff] }
 0x265   :  { %2964 = vst [vmem:[#allocation4 + $0xf0] sm:$0xff] %v2956_v20  ;;  %v2949_v12 = vmax.f32 %v2933_v42, 0.0  ;;  %3892 = vmatmul.mubr.bf16.gmra.mxu0 %v3709_v19  ;;  %3274 = vmatmul.mubr.bf16.gmra.mxu1 %v3083_v0  ;;  %v3377_v10 = vpack.c.bf16 %v3365_v11, %v3364_v44  ;;  %v6581_v43 = vld [vmem:[%s8789_s3 + $0x190] ss:$8 sps:$4 sm:$0xff]   ;;  %v6586_v25 = vld [vmem:[%s8789_s3 + $0x184] ss:$8 sps:$4 sm:$0xff]  }
 0x266   :  { %3901 = vmatprep.mubr.bf16.mxu0 %v8821_v32  ;;  %3283 = vmatprep.mubr.bf16.mxu1 %v8821_v32  ;;  %v6584_v46 = vld [vmem:[%s8789_s3 + $0x180] ss:$8 sps:$4 sm:$0xff]   ;;  %v4357_v19 = vld [vmem:[#allocation5 + $0x4c] sm:$0xff] }
 0x267   :  { %v2957_v62 = vmax.f32 %v2948_v48, %v2949_v12  ;;  %v4355_v49 = vld [vmem:[#allocation5 + $0x3c] sm:$0xff]  ;;  %v4354_v22 = vld [vmem:[#allocation5 + $0x34] sm:$0xff]  ;;  %v4356_v48 = vld [vmem:[#allocation5 + $0x44] sm:$0xff] }
 0x268   :  { %v2994_v37 = vld [vmem:[#allocation4 + $0xe0] ss:$2 sm:$0xff]  ;;  %v3026_v18 = vld [vmem:[#allocation4 + $0xe1] ss:$2 sm:$0xff]  ;;  %v4367_v20 = vpack.c.bf16 %v4355_v49, %v4354_v22  ;;  %v3368_v12 = vld [vmem:[#allocation5 + $0x51] sm:$0xff] }
 0x269   :  { %v3043_v17 = vmax.f32 %v2994_v37, %v3026_v18  ;;  %2965 = vst [vmem:[#allocation4 + $0xf8] sm:$0xff] %v2957_v62  ;;  %v3366_v15 = vld [vmem:[#allocation5 + $0x41] sm:$0xff]  ;;  %v3369_v0 = vld [vmem:[#allocation5 + $0x59] sm:$0xff]  ;;  %v4368_v62 = vpack.c.bf16 %v4357_v19, %v4356_v48  ;;  %v4023_v63 = vld [vmem:[#allocation5 + $0x2b] sm:$0xff] }
 0x26a   :  { %v3700_v52 = vld [vmem:[#allocation5 + $0x62] sm:$0xff]  ;;  %v3378_v42 = vpack.c.bf16 %v3367_v30, %v3366_v15  ;;  %v3379_v37 = vpack.c.bf16 %v3369_v0, %v3368_v12  ;;  %v4020_v33 = vld [vmem:[#allocation5 + $0x13] sm:$0xff]  ;;  %v4027_v3 = vld [vmem:[#allocation5 + $0x4b] sm:$0xff] }
 0x26b   :  { %3059 = vst [vmem:[#allocation5 + $0x70] sm:$0xff] %v3043_v17  ;;  %v4359_v18 = vld [vmem:[#allocation5 + $0x5c] sm:$0xff]  ;;  %v4360_v6 = vld [vmem:[#allocation5 + $0x64] sm:$0xff] }
 0x26c   :  { %v4022_v8 = vld [vmem:[#allocation5 + $0x23] sm:$0xff] }
 0x270   :  { %v2996_v13 = vld [vmem:[#allocation4 + $0xf0] ss:$2 sm:$0xff]  ;;  %v3028_v60 = vld [vmem:[#allocation4 + $0xf1] ss:$2 sm:$0xff] }
 0x271   :  { %v3044_v31 = vmax.f32 %v2996_v13, %v3028_v60  ;;  %v4358_v13 = vld [vmem:[#allocation5 + $0x54] sm:$0xff]  ;;  %v3370_v60 = vld [vmem:[#allocation5 + $0x61] sm:$0xff] }
 0x272   :  { %v3701_v40 = vld [vmem:[#allocation5 + $0x6a] sm:$0xff] }
 0x273   :  { %3060 = vst [vmem:[#allocation5 + $0x78] sm:$0xff] %v3044_v31  ;;  %v3710_v41 = vpack.c.bf16 %v3701_v40, %v3700_v52  ;;  %v3084_v38 = vpack.c.bf16 %v3044_v31, %v3043_v17  ;;  %v3371_v17 = vld [vmem:[#allocation5 + $0x69] sm:$0xff]  ;;  %v4369_v31 = vpack.c.bf16 %v4359_v18, %v4358_v13 }
 0x274   :  { %v3380_v52 = vpack.c.bf16 %v3371_v17, %v3370_v60  ;;  %v4361_v40 = vld [vmem:[#allocation5 + $0x6c] sm:$0xff] }
 0x275   :  { %3902 = vmatmul.mubr.bf16.gmra.mxu0 %v3710_v41  ;;  %3284 = vmatmul.mubr.bf16.gmra.mxu1 %v3084_v38  ;;  %v4031_v29 = vld [vmem:[#allocation5 + $0x6b] sm:$0xff] }
 0x276   :  { %3911 = vmatprep.mubr.bf16.mxu0 %v8821_v32  ;;  %3511 = vmatprep.mubr.bf16.mxu1 %v8821_v32 }
 0x27a   :  { %v3702_v54 = vld [vmem:[#allocation5 + $0x72] sm:$0xff]  ;;  %v3703_v23 = vld [vmem:[#allocation5 + $0x7a] sm:$0xff] }
 0x27b   :  { %v3711_v35 = vpack.c.bf16 %v3703_v23, %v3702_v54  ;;  %v3372_v41 = vld [vmem:[#allocation5 + $0x71] sm:$0xff]  ;;  %v3373_v38 = vld [vmem:[#allocation5 + $0x79] sm:$0xff] }
 0x27c   :  { %v3381_v54 = vpack.c.bf16 %v3373_v38, %v3372_v41  ;;  %v4362_v23 = vld [vmem:[#allocation5 + $0x74] sm:$0xff]  ;;  %v4363_v57 = vld [vmem:[#allocation5 + $0x7c] sm:$0xff] }
 0x27d   :  { %3912 = vmatmul.mubr.bf16.gmra.mxu0 %v3711_v35  ;;  %3512 = vmatmul.mubr.bf16.vlgmr.msra.gmra.mxu1 %v3374_v1  ;;  %v4019_v35 = vld [vmem:[#allocation5 + $0xb] sm:$0xff]  ;;  %v4018_v1 = vld [vmem:[#allocation5 + $0x3] sm:$0xff]  ;;  %v4032_v22 = vld [vmem:[#allocation5 + $0x73] sm:$0xff] }
 0x27e   :  { %4501 = vmatprep.mubr.bf16.mxu0 %v8821_v32  ;;  %4140 = vmatpush1.bf16.msra.mxu1 %v6563_v45  ;;  %v4370_v45 = vpack.c.bf16 %v4361_v40, %v4360_v6  ;;  %v4033_v15 = vld [vmem:[#allocation5 + $0x7b] sm:$0xff] }
 0x27f   :  { %3521 = vmatprep.mubr.bf16.mxu1 %v8821_v32  ;;  %4141 = vmatprep.subr.bf16.mxu1 %v6568_v24  ;;  %v4371_v24 = vpack.c.bf16 %v4363_v57, %v4362_v23  ;;  %v4041_v19 = vpack.c.bf16 %v4033_v15, %v4032_v22 }
 0x282   :  { %4142 = vmatpush1.bf16.msra.mxu1 %v6566_v5  ;;  %v4034_v5 = vpack.c.bf16 %v4019_v35, %v4018_v1 }
 0x283   :  { %4143 = vmatprep.subr.bf16.mxu1 %v6571_v16  ;;  %v4021_v16 = vld [vmem:[#allocation5 + $0x1b] sm:$0xff] }
 0x284   :  { %v4035_v56 = vpack.c.bf16 %v4021_v16, %v4020_v33 }
 0x285   :  { %4502 = vmatmul.mubr.bf16.vlgmr.msra.gmra.mxu0 %v4364_v55  ;;  %3522 = vmatmul.mubr.bf16.gmra.mxu1 %v3375_v21  ;;  %v4036_v55 = vpack.c.bf16 %v4023_v63, %v4022_v8  ;;  %v4025_v21 = vld [vmem:[#allocation5 + $0x3b] sm:$0xff] }
 0x286   :  { %4511 = vmatprep.mubr.bf16.mxu0 %v8821_v32  ;;  %3531 = vmatprep.mubr.bf16.mxu1 %v8821_v32 }
 0x287   :  { %4144 = vmatpush1.bf16.msra.mxu1 %v6569_v50  ;;  %v4024_v50 = vld [vmem:[#allocation5 + $0x33] sm:$0xff] }
 0x288   :  { %4145 = vmatprep.subr.bf16.mxu1 %v6574_v2 }
 0x28b   :  { %4146 = vmatpush1.bf16.msra.mxu1 %v6572_v39  ;;  %v4037_v39 = vpack.c.bf16 %v4025_v21, %v4024_v50 }
 0x28c   :  { %4147 = vmatprep.subr.bf16.mxu1 %v6577_v4  ;;  %v4026_v4 = vld [vmem:[#allocation5 + $0x43] sm:$0xff] }
 0x28d   :  { %4512 = vmatmul.mubr.bf16.gmra.mxu0 %v4365_v36  ;;  %3532 = vmatmul.mubr.bf16.gmra.mxu1 %v3376_v47  ;;  %v4038_v26 = vpack.c.bf16 %v4027_v3, %v4026_v4  ;;  %v4029_v47 = vld [vmem:[#allocation5 + $0x5b] sm:$0xff]  ;;  %v6587_v4 = vld [vmem:[%s8791_s5 + $0x78] sm:$0xff]  }
 0x28e   :  { %4521 = vmatprep.mubr.bf16.mxu0 %v8821_v32  ;;  %3541 = vmatprep.mubr.bf16.mxu1 %v8821_v32 }
 0x28f   :  { %4148 = vmatpush1.bf16.msra.mxu1 %v6575_v53 }
 0x290   :  { %4149 = vmatprep.subr.bf16.mxu1 %v6580_v28 }
 0x293   :  { %4150 = vmatpush1.bf16.msra.mxu1 %v6578_v51  ;;  %v4028_v51 = vld [vmem:[#allocation5 + $0x53] sm:$0xff] }
 0x294   :  { %4151 = vmatprep.subr.bf16.mxu1 %v6583_v7  ;;  %v4039_v34 = vpack.c.bf16 %v4029_v47, %v4028_v51 }
 0x295   :  { %4522 = vmatmul.mubr.bf16.gmra.mxu0 %v4366_v14  ;;  %3542 = vmatmul.mubr.bf16.gmra.mxu1 %v3377_v10  ;;  %v4030_v10 = vld [vmem:[#allocation5 + $0x63] sm:$0xff] }
 0x296   :  { %4531 = vmatprep.mubr.bf16.mxu0 %v8821_v32  ;;  %3551 = vmatprep.mubr.bf16.mxu1 %v8821_v32 }
 0x297   :  { %4152 = vmatpush1.bf16.msra.mxu1 %v6581_v43  ;;  %v4040_v43 = vpack.c.bf16 %v4031_v29, %v4030_v10 }
 0x298   :  { %4153 = vmatprep.subr.bf16.mxu1 %v6586_v25 }
 0x29b   :  { %4154 = vmatpush1.bf16.msra.mxu1 %v6584_v46 }
 0x29c   :  { %6188 = vmatprep.subr.bf16.mxu1 %v7952_v58 }
 0x29d   :  { %4532 = vmatmul.mubr.bf16.gmra.mxu0 %v4367_v20  ;;  %3552 = vmatmul.mubr.bf16.gmra.mxu1 %v3378_v42 }
 0x29e   :  { %4541 = vmatprep.mubr.bf16.mxu0 %v8821_v32  ;;  %3561 = vmatprep.mubr.bf16.mxu1 %v8821_v32 }
 0x2a5   :  { %4542 = vmatmul.mubr.bf16.gmra.mxu0 %v4368_v62  ;;  %3562 = vmatmul.mubr.bf16.gmra.mxu1 %v3379_v37 }
 0x2a6   :  { %4551 = vmatprep.mubr.bf16.mxu0 %v8821_v32  ;;  %3571 = vmatprep.mubr.bf16.mxu1 %v8821_v32 }
 0x2ad   :  { %4552 = vmatmul.mubr.bf16.gmra.mxu0 %v4369_v31  ;;  %3572 = vmatmul.mubr.bf16.gmra.mxu1 %v3380_v52 }
 0x2ae   :  { %4561 = vmatprep.mubr.bf16.mxu0 %v8821_v32  ;;  %3581 = vmatprep.mubr.bf16.mxu1 %v8821_v32 }
 0x2b5   :  { %4562 = vmatmul.mubr.bf16.gmra.mxu0 %v4370_v45  ;;  %3582 = vmatmul.mubr.bf16.gmra.mxu1 %v3381_v54 }
 0x2b6   :  { %4571 = vmatprep.mubr.bf16.mxu0 %v8821_v32  ;;  %4171 = vmatprep.mubr.bf16.mxu1 %v8821_v32 }
 0x2bd   :  { %4572 = vmatmul.mubr.bf16.gmra.mxu0 %v4371_v24  ;;  %4172 = vmatmul.mubr.bf16.vlgmr.msra.gmra.mxu1 %v4034_v5 }
 0x2be   :  { %4181 = vmatprep.mubr.bf16.mxu1 %v8821_v32  ;;  %6189 = vmatpush3.bf16.msra.mxu1 %v6587_v4 }
 0x2bf   :  { %6190 = vmatprep.subr.bf16.mxu1 %v7952_v58 }
 0x2c5   :  { %4182 = vmatmul.mubr.bf16.gmra.mxu1 %v4035_v56  ;;  %v8115_v2 = vpop.f32.mrf.mxu1 }
 0x2c6   :  { %4191 = vmatprep.mubr.bf16.mxu1 %v8821_v32 }
 0x2c7   :  { %v8118_v27 = vpop.f32.mrf.mxu1 }
 0x2c9   :  { %v8120_v59 = vpop.f32.mrf.mxu1 }
 0x2cb   :  { %v8123_v36 = vpop.f32.mrf.mxu1 }
 0x2cd   :  { %4192 = vmatmul.mubr.bf16.gmra.mxu1 %v4036_v55 }
 0x2ce   :  { %4201 = vmatprep.mubr.bf16.mxu1 %v8821_v32 }
 0x2d5   :  { %4202 = vmatmul.mubr.bf16.gmra.mxu1 %v4037_v39  ;;  %v8125_v53 = vpop.f32.mrf.mxu0 }
 0x2d6   :  { %4211 = vmatprep.mubr.bf16.mxu1 %v8821_v32  ;;  %v8127_v28 = vpop.f32.mrf.mxu1 }
 0x2d7   :  { %v8129_v11 = vpop.f32.mrf.mxu0 }
 0x2d8   :  { %v8131_v7 = vpop.f32.mrf.mxu1 }
 0x2d9   :  { %v8134_v44 = vpop.f32.mrf.mxu0 }
 0x2da   :  { %v8136_v14 = vpop.f32.mrf.mxu1 }
 0x2db   :  { %v8138_v25 = vpop.f32.mrf.mxu0 }
 0x2dc   :  { %v8140_v46 = vpop.f32.mrf.mxu1 }
 0x2dd   :  { %4212 = vmatmul.mubr.bf16.gmra.mxu1 %v4038_v26 }
 0x2de   :  { %4221 = vmatprep.mubr.bf16.mxu1 %v8821_v32 }
 0x2e5   :  { %4222 = vmatmul.mubr.bf16.gmra.mxu1 %v4039_v34 }
 0x2e6   :  { %4231 = vmatprep.mubr.bf16.mxu1 %v8821_v32  ;;  %v8143_v49 = vpop.f32.mrf.mxu0  ;;  %v8145_v30 = vpop.f32.mrf.mxu1 }
 0x2e8   :  { %v8147_v20 = vpop.f32.mrf.mxu0  ;;  %v8149_v42 = vpop.f32.mrf.mxu1 }
 0x2ea   :  { %v8151_v0 = vpop.f32.mrf.mxu0  ;;  %v8153_v48 = vpop.f32.mrf.mxu1 }
 0x2ec   :  { %v8155_v12 = vpop.f32.mrf.mxu0  ;;  %v8157_v62 = vpop.f32.mrf.mxu1 }
 0x2ed   :  { %4232 = vmatmul.mubr.bf16.gmra.mxu1 %v4040_v43  ;;  %v6588_v43 = vld [vmem:[%s8791_s5 + $0x70] sm:$0xff]  }
 0x2ee   :  { %4241 = vmatprep.mubr.bf16.mxu1 %v8821_v32  ;;  %6191 = vmatpush3.bf16.msra.mxu1 %v6588_v43  ;;  %v6589_v43 = vld [vmem:[%s8791_s5 + $0x68] sm:$0xff]  }
 0x2ef   :  { %6192 = vmatprep.subr.bf16.mxu1 %v7952_v58 }
 0x2f2   :  { %6193 = vmatpush3.bf16.msra.mxu1 %v6589_v43 }
 0x2f5   :  { %4242 = vmatmul.mubr.bf16.gmra.mxu1 %v4041_v19  ;;  %v8159_v32 = vpop.f32.mrf.mxu0 }
 0x2f6   :  { %v8161_v37 = vpop.f32.mrf.mxu1 }
 0x2f7   :  { %v8163_v18 = vpop.f32.mrf.mxu0 }
 0x2f8   :  { %v8165_v17 = vpop.f32.mrf.mxu1 }
 0x2f9   :  { %v8167_v13 = vpop.f32.mrf.mxu0 }
 0x2fa   :  { %v8169_v60 = vpop.f32.mrf.mxu1 }
 0x2fb   :  { %8966 = vst [vmem:[#allocation36_spill] sm:$0xff] %v8169_v60  ;;  %v8171_v31 = vpop.f32.mrf.mxu0 }
 0x2fc   :  { %v8173_v52 = vpop.f32.mrf.mxu1 }
 0x2fd   :  { %8967 = vst [vmem:[#allocation38_spill] sm:$0xff] %v8173_v52 }
 0x305   :  { %v8175_v40 = vpop.f32.mrf.mxu0 }
 0x306   :  { %v8177_v41 = vpop.f32.mrf.mxu1 }
 0x307   :  { %8968 = vst [vmem:[#allocation37_spill] sm:$0xff] %v8177_v41  ;;  %v8179_v38 = vpop.f32.mrf.mxu0 }
 0x308   :  { %8969 = vst [vmem:[#allocation39_spill] sm:$0xff] %v8179_v38  ;;  %v8181_v6 = vpop.f32.mrf.mxu1 }
 0x309   :  { %8970 = vst [vmem:[#allocation40_spill] sm:$0xff] %v8181_v6  ;;  %v8183_v45 = vpop.f32.mrf.mxu0 }
 0x30a   :  { %8971 = vst [vmem:[#allocation41_spill] sm:$0xff] %v8183_v45  ;;  %v8185_v54 = vpop.f32.mrf.mxu1 }
 0x30b   :  { %8972 = vst [vmem:[#allocation42_spill] sm:$0xff] %v8185_v54  ;;  %v8187_v23 = vpop.f32.mrf.mxu0 }
 0x30c   :  { %8973 = vst [vmem:[#allocation43_spill] sm:$0xff] %v8187_v23  ;;  %v8189_v57 = vpop.f32.mrf.mxu1 }
 0x30d   :  { %8974 = vst [vmem:[#allocation9_spill] sm:$0xff] %v8189_v57 }
 0x315   :  { %v8191_v35 = vpop.f32.mrf.mxu0 }
 0x316   :  { %8975 = vst [vmem:[#allocation10_spill] sm:$0xff] %v8191_v35  ;;  %v8193_v1 = vpop.f32.mrf.mxu1 }
 0x317   :  { %8976 = vst [vmem:[#allocation44_spill] sm:$0xff] %v8193_v1  ;;  %v8195_v24 = vpop.f32.mrf.mxu0 }
 0x318   :  { %8977 = vst [vmem:[#allocation45_spill] sm:$0xff] %v8195_v24  ;;  %v8197_v5 = vpop.f32.mrf.mxu1 }
 0x319   :  { %8978 = vst [vmem:[#allocation11_spill] sm:$0xff] %v8197_v5  ;;  %v8199_v16 = vpop.f32.mrf.mxu0 }
 0x31a   :  { %8979 = vst [vmem:[#allocation12_spill] sm:$0xff] %v8199_v16  ;;  %v8201_v33 = vpop.f32.mrf.mxu1 }
 0x31b   :  { %8980 = vst [vmem:[#allocation46_spill] sm:$0xff] %v8201_v33  ;;  %v8203_v56 = vpop.f32.mrf.mxu0 }
 0x31c   :  { %8981 = vst [vmem:[#allocation47_spill] sm:$0xff] %v8203_v56  ;;  %v8205_v63 = vpop.f32.mrf.mxu1  ;;  %v6600_v56 = vld [vmem:[%s8791_s5 + $0x88] sm:$0xff]  }
 0x31d   :  { %8982 = vst [vmem:[#allocation49_spill] sm:$0xff] %v8205_v63  ;;  %v6597_v63 = vld [vmem:[%s8791_s5 + $0x98] sm:$0xff]  }
 0x325   :  { %v8207_v8 = vpop.f32.mrf.mxu0  ;;  %v8209_v55 = vpop.f32.mrf.mxu1 }
 0x326   :  { %8983 = vst [vmem:[#allocation48_spill] sm:$0xff] %v8207_v8  ;;  %8984 = vst [vmem:[#allocation13_spill] sm:$0xff] %v8209_v55  ;;  %v6592_v55 = vld [vmem:[%s8791_s5 + $0x58] sm:$0xff]  }
 0x327   :  { %v8211_v21 = vpop.f32.mrf.mxu0  ;;  %v8213_v50 = vpop.f32.mrf.mxu1 }
 0x328   :  { %8985 = vst [vmem:[#allocation14_spill] sm:$0xff] %v8211_v21  ;;  %8986 = vst [vmem:[#allocation50_spill] sm:$0xff] %v8213_v50  ;;  %v6596_v50 = vld [vmem:[%s8791_s5 + $0xa0] sm:$0xff]  }
 0x329   :  { %v8215_v39 = vpop.f32.mrf.mxu0  ;;  %v8217_v3 = vpop.f32.mrf.mxu1 }
 0x32a   :  { %8987 = vst [vmem:[#allocation15_spill] sm:$0xff] %v8215_v39  ;;  %8988 = vst [vmem:[#allocation16_spill] sm:$0xff] %v8217_v3  ;;  %v6594_v3 = vld [vmem:[%s8791_s5 + $0xa8] sm:$0xff]  }
 0x32b   :  { %v8222_v26 = vpop.f32.mrf.mxu0  ;;  %v8224_v47 = vpop.f32.mrf.mxu1 }
 0x32c   :  { %8989 = vst [vmem:[#allocation51_spill] sm:$0xff] %v8222_v26  ;;  %8990 = vst [vmem:[#allocation53_spill] sm:$0xff] %v8224_v47  ;;  %v6590_v26 = vld [vmem:[%s8791_s5 + $0x60] sm:$0xff]  }
 0x335   :  { %v8227_v51 = vpop.f32.mrf.mxu0  ;;  %v8229_v34 = vpop.f32.mrf.mxu1 }
 0x336   :  { %8991 = vst [vmem:[#allocation52_spill] sm:$0xff] %v8227_v51  ;;  %8992 = vst [vmem:[#allocation79_spill] sm:$0xff] %v8229_v34 }
 0x337   :  { %v8231_v29 = vpop.f32.mrf.mxu0  ;;  %v8233_v10 = vpop.f32.mrf.mxu1 }
 0x338   :  { %8993 = vst [vmem:[#allocation82_spill] sm:$0xff] %v8231_v29  ;;  %8994 = vst [vmem:[#allocation17_spill] sm:$0xff] %v8233_v10  ;;  %v6591_v10 = vld [vmem:[%s8791_s5 + $0xb8] sm:$0xff]  }
 0x339   :  { %v8238_v22 = vpop.f32.mrf.mxu0  ;;  %v8240_v15 = vpop.f32.mrf.mxu1  ;;  %6229 = vmatpush3.bf16.msra.mxu0 %v6591_v10  ;;  %v8273_v10 = vld [vmem:[#allocation2 + $0x100] sm:$0xff] }
 0x33a   :  { %8995 = vst [vmem:[#allocation18_spill] sm:$0xff] %v8238_v22  ;;  %8996 = vst [vmem:[#allocation54_spill] sm:$0xff] %v8240_v15  ;;  %6230 = vmatprep.subr.bf16.mxu0 %v7952_v58  ;;  %6194 = vmatprep.subr.bf16.mxu1 %v8273_v10 }
 0x33b   :  { %v8242_v19 = vpop.f32.mrf.mxu0  ;;  %v8244_v4 = vpop.f32.mrf.mxu1  ;;  %9003 = vst [vmem:[#allocation20_spill] sm:$0xff] %v8273_v10  ;;  %6195 = vmatpush3.bf16.msra.mxu1 %v6590_v26  ;;  %v6599_v26 = vld [vmem:[%s8791_s5 + $0x90] sm:$0xff]   ;;  %6204 = vmatprep.mubr.msk.bf16.mxu1 %vm6648_vm0, %v8273_v10 }
 0x33c   :  { %8997 = vst [vmem:[#allocation84_spill] sm:$0xff] %v8242_v19  ;;  %8998 = vst [vmem:[#allocation57_spill] sm:$0xff] %v8244_v4  ;;  %6196 = vmatprep.subr.bf16.mxu1 %v8273_v10  ;;  %6244 = vmatprep.mubr.msk.bf16.mxu0 %vm6648_vm0, %v8273_v10 }
 0x33d   :  { %v8247_v34 = vpop.f32.mrf.mxu0  ;;  %v8249_v47 = vpop.f32.mrf.mxu1 }
 0x33e   :  { %8999 = vst [vmem:[#allocation55_spill] sm:$0xff] %v8247_v34  ;;  %v6593_v34 = vld [vmem:[%s8791_s5 + $0xb0] sm:$0xff]  }
 0x33f   :  { %v8254_v29 = vpop.f32.mrf.mxu0  ;;  %v8256_v22 = vpop.f32.mrf.mxu1  ;;  %6231 = vmatpush3.bf16.msra.mxu0 %v6593_v34  ;;  %6197 = vmatpush3.bf16.msra.mxu1 %v6592_v55  ;;  %v6598_v55 = vld [vmem:[%s8791_s5 + $0x48] sm:$0xff]  }
 0x340   :  { %9000 = vst [vmem:[#allocation86_spill] sm:$0xff] %v8254_v29  ;;  %6232 = vmatprep.subr.bf16.mxu0 %v8273_v10  ;;  %6198 = vmatprep.subr.bf16.mxu1 %v8273_v10 }
 0x341   :  { %v8262_v4 = vpop.f32.mrf.mxu0  ;;  %v8264_v15 = vpop.f32.mrf.mxu1 }
 0x342   :  { %9001 = vst [vmem:[#allocation56_spill] sm:$0xff] %v8262_v4 }
 0x343   :  { %v8269_v19 = vpop.f32.mrf.mxu0  ;;  %v8271_v29 = vpop.f32.mrf.mxu1  ;;  %6233 = vmatpush3.bf16.msra.mxu0 %v6594_v3 }
 0x344   :  { %9002 = vst [vmem:[#allocation19_spill] sm:$0xff] %v8269_v19  ;;  %6234 = vmatprep.subr.bf16.mxu0 %v8273_v10 }
 0x345   :  { %v8277_v58 = vpop.f32.mrf.mxu0  ;;  %v8279_v4 = vpop.f32.mrf.mxu1 }
 0x347   :  { %v8284_v43 = vpop.f32.mrf.mxu0  ;;  %v8286_v19 = vpop.f32.mrf.mxu1  ;;  %6235 = vmatpush3.bf16.msra.mxu0 %v6596_v50  ;;  %v6595_v50 = vld [vmem:[%s8791_s5 + $0x50] sm:$0xff]  }
 0x348   :  { %6236 = vmatprep.subr.bf16.mxu0 %v8273_v10  ;;  %6199 = vmatpush3.bf16.msra.mxu1 %v6595_v50  ;;  %v6601_v50 = vld [vmem:[%s8791_s5 + $0x40] sm:$0xff]  }
 0x349   :  { %v8289_v51 = vpop.f32.mrf.mxu0  ;;  %v8291_v34 = vpop.f32.mrf.mxu1  ;;  %6200 = vmatprep.subr.bf16.mxu1 %v8273_v10 }
 0x34b   :  { %v8299_v39 = vpop.f32.mrf.mxu1  ;;  %v8303_v3 = vpop.f32.mrf.mxu0  ;;  %6237 = vmatpush3.bf16.msra.mxu0 %v6597_v63 }
 0x34c   :  { %6238 = vmatprep.subr.bf16.mxu0 %v8273_v10  ;;  %6201 = vmatpush3.bf16.msra.mxu1 %v6598_v55 }
 0x34d   :  { %v8305_v21 = vpop.f32.mrf.mxu1  ;;  %v8323_v33 = vpop.f32.mrf.mxu0  ;;  %6202 = vmatprep.subr.bf16.mxu1 %v8273_v10 }
 0x34f   :  { %v8313_v8 = vpop.f32.mrf.mxu1  ;;  %6239 = vmatpush3.bf16.msra.mxu0 %v6599_v26  ;;  %v8341_v16 = vpop.f32.mrf.mxu0  ;;  %v6602_v26 = vld [vmem:[%s8791_s5 + $0x80] sm:$0xff]  }
 0x350   :  { %6240 = vmatprep.subr.bf16.mxu0 %v8273_v10  ;;  %6203 = vmatpush3.bf16.msra.mxu1 %v6601_v50 }
 0x351   :  { %v8325_v5 = vpop.f32.mrf.mxu1  ;;  %v8355_v57 = vpop.f32.mrf.mxu0  ;;  %6208 = vmatprep.subr.bf16.mxu1 %v8273_v10 }
 0x353   :  { %v8331_v63 = vpop.f32.mrf.mxu1  ;;  %6241 = vmatpush3.bf16.msra.mxu0 %v6600_v56  ;;  %v8363_v56 = vpop.f32.mrf.mxu0 }
 0x354   :  { %6242 = vmatprep.subr.bf16.mxu0 %v8273_v10 }
 0x355   :  { %v8343_v1 = vpop.f32.mrf.mxu1  ;;  %v8369_v6 = vpop.f32.mrf.mxu0 }
 0x357   :  { %v8345_v24 = vpop.f32.mrf.mxu1  ;;  %6243 = vmatpush3.bf16.msra.mxu0 %v6602_v26  ;;  %v8375_v38 = vpop.f32.mrf.mxu0 }
 0x358   :  { %6268 = vmatprep.subr.bf16.mxu0 %v8273_v10 }
 0x359   :  { %v8357_v54 = vpop.f32.mrf.mxu1 }
 0x35a   :  { %9004 = vst [vmem:[#allocation58_spill] sm:$0xff] %v8357_v54 }
 0x35b   :  { %v8359_v35 = vpop.f32.mrf.mxu1 }
 0x35c   :  { %9005 = vst [vmem:[#allocation59_spill] sm:$0xff] %v8359_v35  ;;  %v8381_v35 = vpop.f32.mrf.mxu0 }
 0x35d   :  { %v8365_v55 = vpop.f32.mrf.mxu1  ;;  %9012 = vst [vmem:[#allocation63_spill] sm:$0xff] %v8381_v35 }
 0x35e   :  { %9006 = vst [vmem:[#allocation61_spill] sm:$0xff] %v8365_v55  ;;  %v8387_v55 = vpop.f32.mrf.mxu0 }
 0x35f   :  { %v8367_v23 = vpop.f32.mrf.mxu1 }
 0x360   :  { %9007 = vst [vmem:[#allocation60_spill] sm:$0xff] %v8367_v23 }
 0x361   :  { %v8371_v45 = vpop.f32.mrf.mxu1 }
 0x362   :  { %9008 = vst [vmem:[#allocation21_spill] sm:$0xff] %v8371_v45  ;;  %v8393_v45 = vpop.f32.mrf.mxu0 }
 0x363   :  { %v8373_v41 = vpop.f32.mrf.mxu1  ;;  %9017 = vst [vmem:[#allocation67_spill] sm:$0xff] %v8393_v45 }
 0x364   :  { %9009 = vst [vmem:[#allocation22_spill] sm:$0xff] %v8373_v41 }
 0x365   :  { %v8377_v50 = vpop.f32.mrf.mxu1 }
 0x366   :  { %9010 = vst [vmem:[#allocation62_spill] sm:$0xff] %v8377_v50  ;;  %v8399_v50 = vpop.f32.mrf.mxu0 }
 0x367   :  { %v8379_v26 = vpop.f32.mrf.mxu1 }
 0x368   :  { %9011 = vst [vmem:[#allocation65_spill] sm:$0xff] %v8379_v26 }
 0x369   :  { %v8383_v10 = vpop.f32.mrf.mxu1 }
 0x36a   :  { %9013 = vst [vmem:[#allocation64_spill] sm:$0xff] %v8383_v10  ;;  %v8407_v10 = vpop.f32.mrf.mxu0 }
 0x36b   :  { %v8385_v52 = vpop.f32.mrf.mxu1  ;;  %9022 = vst [vmem:[#allocation70_spill] sm:$0xff] %v8407_v10 }
 0x36c   :  { %9014 = vst [vmem:[#allocation23_spill] sm:$0xff] %v8385_v52  ;;  %v3592_v52 = vadd.f32 %v8249_v47, %v8115_v2  ;;  %v3595_v47 = vadd.f32 %v8271_v29, %v8123_v36 }
 0x36d   :  { %v8389_v23 = vpop.f32.mrf.mxu1 }
 0x36e   :  { %9015 = vst [vmem:[#allocation24_spill] sm:$0xff] %v8389_v23 }
 0x36f   :  { %v8391_v54 = vpop.f32.mrf.mxu1 }
 0x370   :  { %9016 = vst [vmem:[#allocation66_spill] sm:$0xff] %v8391_v54  ;;  %v3593_v54 = vadd.f32 %v8256_v22, %v8118_v27 }
 0x371   :  { %v8395_v41 = vpop.f32.mrf.mxu1 }
 0x372   :  { %9018 = vst [vmem:[#allocation69_spill] sm:$0xff] %v8395_v41  ;;  %v8421_v41 = vpop.f32.mrf.mxu0  ;;  %v3923_v22 = vadd.f32 %v8129_v11, %v3593_v54  ;;  %v3925_v54 = vadd.f32 %v8138_v25, %v3595_v47 }
 0x373   :  { %v8397_v60 = vpop.f32.mrf.mxu1  ;;  %9025 = vst [vmem:[#allocation72_spill] sm:$0xff] %v8421_v41 }
 0x374   :  { %9019 = vst [vmem:[#allocation68_spill] sm:$0xff] %v8397_v60  ;;  %v4662_v60 = vld [vmem:[%s8792_s4] sm:$0x3]  ;;  %v8436_v41 = vpop.f32.mrf.mxu0 }
 0x375   :  { %v8401_v26 = vpop.f32.mrf.mxu1  ;;  %v8426_v27 = vrot.slane %v4662_v60, %v7617_v61 }
 0x376   :  { %9020 = vst [vmem:[#allocation25_spill] sm:$0xff] %v8401_v26  ;;  %v3594_v26 = vadd.f32 %v8264_v15, %v8120_v59 }
 0x377   :  { %v8403_v35 = vpop.f32.mrf.mxu1 }
 0x378   :  { %9021 = vst [vmem:[#allocation26_spill] sm:$0xff] %v8403_v35  ;;  %v3922_v35 = vadd.f32 %v8125_v53, %v3592_v52  ;;  %v8433_v53 = vrot.slane %v4662_v60, %v7625_v9  ;;  %v3924_v52 = vadd.f32 %v8134_v44, %v3594_v26  ;;  %v3598_v60 = vadd.f32 %v8291_v34, %v8136_v14  ;;  %v8450_v26 = vpop.f32.mrf.mxu0 }
 0x379   :  { %v8409_v23 = vpop.f32.mrf.mxu1  ;;  %v3600_v14 = vadd.f32 %v8305_v21, %v8145_v30 }
 0x37a   :  { %9023 = vst [vmem:[#allocation73_spill] sm:$0xff] %v8409_v23 }
 0x37b   :  { %v8413_v45 = vpop.f32.mrf.mxu1 }
 0x37c   :  { %9024 = vst [vmem:[#allocation71_spill] sm:$0xff] %v8413_v45  ;;  %v3596_v45 = vadd.f32 %v8279_v4, %v8127_v28  ;;  %v3597_v28 = vadd.f32 %v8286_v19, %v8131_v7 }
 0x37d   :  { %v4173_v2 = vpop.f32.mrf.mxu1 }
 0x37e   :  { %v4252_v23 = vadd.f32 %v4173_v2, %v3922_v35  ;;  %v3926_v4 = vadd.f32 %v8143_v49, %v3596_v45  ;;  %v3927_v19 = vadd.f32 %v8147_v20, %v3597_v28 }
 0x37f   :  { %v4175_v10 = vpop.f32.mrf.mxu1 }
 0x380   :  { %v4582_v59 = vadd.f32 %v8277_v58, %v4252_v23  ;;  %v4253_v15 = vadd.f32 %v4175_v10, %v3923_v22 }
 0x381   :  { %v4177_v36 = vpop.f32.mrf.mxu1 }
 0x382   :  { %v4674_v35 = vadd.f32 %v8426_v27, %v4582_v59  ;;  %v4583_v29 = vadd.f32 %v8284_v43, %v4253_v15  ;;  %v4254_v11 = vadd.f32 %v4177_v36, %v3924_v52  ;;  %v3599_v43 = vadd.f32 %v8299_v39, %v8140_v46  ;;  %v8460_v59 = vpop.f32.mrf.mxu0 }
 0x383   :  { %v4179_v23 = vpop.f32.mrf.mxu1  ;;  %v3928_v39 = vadd.f32 %v8151_v0, %v3598_v60  ;;  %v3601_v36 = vadd.f32 %v8313_v8, %v8149_v42  ;;  %v3930_v0 = vadd.f32 %v8159_v32, %v3600_v14  ;;  %v9026_v14 = vld [vmem:[#allocation36_spill] sm:$0xff] }
 0x384   :  { %v4675_v44 = vadd.f32 %v8433_v53, %v4583_v29  ;;  %v4584_v10 = vadd.f32 %v8289_v51, %v4254_v11  ;;  %v4255_v58 = vadd.f32 %v4179_v23, %v3925_v54  ;;  %v4690_v25 = vmax.f32 %v4674_v35, 0.0  ;;  %v8471_v23 = vpop.f32.mrf.mxu0 }
 0x385   :  { %v4183_v2 = vpop.f32.mrf.mxu1  ;;  %v3602_v11 = vadd.f32 %v8325_v5, %v8153_v48  ;;  %v3931_v32 = vadd.f32 %v8163_v18, %v3601_v36  ;;  %v3603_v48 = vadd.f32 %v8331_v63, %v8157_v62 }
 0x386   :  { %v4691_v47 = vmax.f32 %v4675_v44, 0.0  ;;  %v4676_v7 = vadd.f32 %v8426_v27, %v4584_v10  ;;  %v4585_v49 = vadd.f32 %v8303_v3, %v4255_v58  ;;  %v4256_v45 = vadd.f32 %v4183_v2, %v3926_v4  ;;  %v8486_v18 = vpop.f32.mrf.mxu0 }
 0x387   :  { %v4185_v51 = vpop.f32.mrf.mxu1  ;;  %v3929_v3 = vadd.f32 %v8155_v12, %v3599_v43  ;;  %v3932_v2 = vadd.f32 %v8167_v13, %v3602_v11 }
 0x388   :  { %v4706_v34 = vmax.f32 %v4690_v25, %v4691_v47  ;;  %v4677_v22 = vadd.f32 %v8433_v53, %v4585_v49  ;;  %v4586_v46 = vadd.f32 %v8323_v33, %v4256_v45  ;;  %v4257_v15 = vadd.f32 %v4185_v51, %v3927_v19  ;;  %v9027_v19 = vld [vmem:[#allocation58_spill] sm:$0xff] }
 0x389   :  { %v4187_v52 = vpop.f32.mrf.mxu1  ;;  %v4692_v30 = vmax.f32 %v4676_v7, 0.0 }
 0x38a   :  { %4714 = vst [vmem:[#allocation7] sm:$0xff] %v4706_v34  ;;  %v4693_v20 = vmax.f32 %v4677_v22, 0.0  ;;  %v4258_v21 = vadd.f32 %v4187_v52, %v3928_v39  ;;  %v4678_v35 = vadd.f32 %v8426_v27, %v4586_v46  ;;  %v4587_v29 = vadd.f32 %v8341_v16, %v4257_v15  ;;  %v9028_v34 = vld [vmem:[#allocation63_spill] sm:$0xff]  ;;  %v9029_v46 = vld [vmem:[#allocation38_spill] sm:$0xff]  ;;  %v8498_v52 = vpop.f32.mrf.mxu0 }
 0x38b   :  { %v4189_v33 = vpop.f32.mrf.mxu1  ;;  %v9030_v39 = vld [vmem:[#allocation59_spill] sm:$0xff] }
 0x38c   :  { %v4707_v54 = vmax.f32 %v4692_v30, %v4693_v20  ;;  %v4588_v12 = vadd.f32 %v8355_v57, %v4258_v21  ;;  %v4259_v28 = vadd.f32 %v4189_v33, %v3929_v3  ;;  %v4679_v42 = vadd.f32 %v8433_v53, %v4587_v29  ;;  %v9031_v30 = vld [vmem:[#allocation39_spill] sm:$0xff]  ;;  %v9032_v33 = vld [vmem:[#allocation37_spill] sm:$0xff] }
 0x38d   :  { %v4193_v8 = vpop.f32.mrf.mxu1  ;;  %v3604_v57 = vadd.f32 %v8343_v1, %v8161_v37  ;;  %v4694_v5 = vmax.f32 %v4678_v35, 0.0  ;;  %v3607_v15 = vadd.f32 %v9030_v39, %v9029_v46 }
 0x38e   :  { %4715 = vst [vmem:[#allocation7 + $0x8] sm:$0xff] %v4707_v54  ;;  %v4680_v4 = vadd.f32 %v8426_v27, %v4588_v12  ;;  %v4589_v16 = vadd.f32 %v8363_v56, %v4259_v28  ;;  %v4260_v60 = vadd.f32 %v4193_v8, %v3930_v0  ;;  %v4695_v44 = vmax.f32 %v4679_v42, 0.0  ;;  %v9033_v0 = vld [vmem:[#allocation61_spill] sm:$0xff]  ;;  %v9034_v8 = vld [vmem:[#allocation67_spill] sm:$0xff] }
 0x38f   :  { %v4195_v10 = vpop.f32.mrf.mxu1  ;;  %v3605_v56 = vadd.f32 %v8345_v24, %v8165_v17  ;;  %v3934_v13 = vadd.f32 %v8175_v40, %v3604_v57  ;;  %v3606_v17 = vadd.f32 %v9027_v19, %v9026_v14  ;;  %v3608_v11 = vadd.f32 %v9033_v0, %v9032_v33  ;;  %v9037_v57 = vld [vmem:[#allocation60_spill] sm:$0xff] }
 0x390   :  { %v4681_v58 = vadd.f32 %v8433_v53, %v4589_v16  ;;  %v4590_v43 = vadd.f32 %v8369_v6, %v4260_v60  ;;  %v4261_v25 = vadd.f32 %v4195_v10, %v3931_v32  ;;  %v4708_v47 = vmax.f32 %v4694_v5, %v4695_v44  ;;  %v9035_v60 = vld [vmem:[#allocation41_spill] sm:$0xff]  ;;  %v8509_v44 = vpop.f32.mrf.mxu0 }
 0x391   :  { %v4696_v62 = vmax.f32 %v4680_v4, 0.0  ;;  %v4197_v63 = vpop.f32.mrf.mxu1  ;;  %v3933_v6 = vadd.f32 %v8171_v31, %v3603_v48  ;;  %v3935_v20 = vadd.f32 %v9031_v30, %v3605_v56  ;;  %v3936_v32 = vadd.f32 %v9035_v60, %v3606_v17  ;;  %v9036_v48 = vld [vmem:[#allocation40_spill] sm:$0xff]  ;;  %v9043_v17 = vld [vmem:[#allocation9_spill] sm:$0xff] }
 0x392   :  { %v4697_v7 = vmax.f32 %v4681_v58, 0.0  ;;  %v4682_v37 = vadd.f32 %v8426_v27, %v4590_v43  ;;  %v4591_v1 = vadd.f32 %v8375_v38, %v4261_v25  ;;  %v4262_v49 = vadd.f32 %v4197_v63, %v3932_v2  ;;  %4716 = vst [vmem:[#allocation7 + $0x10] sm:$0xff] %v4708_v47  ;;  %v9038_v2 = vld [vmem:[#allocation43_spill] sm:$0xff] }
 0x393   :  { %v4199_v45 = vpop.f32.mrf.mxu1  ;;  %v3609_v5 = vadd.f32 %v9037_v57, %v9036_v48  ;;  %v3937_v56 = vadd.f32 %v9038_v2, %v3607_v15  ;;  %v9050_v48 = vld [vmem:[#allocation47_spill] sm:$0xff] }
 0x394   :  { %v4709_v24 = vmax.f32 %v4696_v62, %v4697_v7  ;;  %v4683_v51 = vadd.f32 %v8433_v53, %v4591_v1  ;;  %v4592_v22 = vadd.f32 %v9028_v34, %v4262_v49  ;;  %v4263_v36 = vadd.f32 %v4199_v45, %v3933_v6  ;;  %v9039_v7 = vld [vmem:[#allocation10_spill] sm:$0xff]  ;;  %v9041_v49 = vld [vmem:[#allocation21_spill] sm:$0xff]  ;;  %v8525_v34 = vpop.f32.mrf.mxu0 }
 0x395   :  { %v4798_v38 = vld [vmem:[#allocation7] ss:$2 sm:$0xff]  ;;  %v4814_v3 = vld [vmem:[#allocation7 + $0x1] ss:$2 sm:$0xff]  ;;  %v4203_v31 = vpop.f32.mrf.mxu1  ;;  %v4698_v21 = vmax.f32 %v4682_v37, 0.0  ;;  %v3938_v37 = vadd.f32 %v9039_v7, %v3608_v11 }
 0x396   :  { %v4829_v40 = vmax.f32 %v4798_v38, %v4814_v3  ;;  %4717 = vst [vmem:[#allocation7 + $0x18] sm:$0xff] %v4709_v24  ;;  %v4699_v35 = vmax.f32 %v4683_v51, 0.0  ;;  %v4264_v29 = vadd.f32 %v4203_v31, %v3934_v13  ;;  %v4684_v54 = vadd.f32 %v8426_v27, %v4592_v22  ;;  %v9040_v1 = vld [vmem:[#allocation42_spill] sm:$0xff]  ;;  %v9045_v3 = vld [vmem:[#allocation45_spill] sm:$0xff] }
 0x397   :  { %v4593_v12 = vadd.f32 %v8387_v55, %v4263_v36  ;;  %v4205_v28 = vpop.f32.mrf.mxu1  ;;  %v3610_v6 = vadd.f32 %v9041_v49, %v9040_v1  ;;  %v9042_v13 = vld [vmem:[#allocation70_spill] sm:$0xff]  ;;  %v3939_v36 = vadd.f32 %v9045_v3, %v3609_v5  ;;  %v9056_v49 = vld [vmem:[#allocation49_spill] sm:$0xff] }
 0x398   :  { %4837 = vst [vmem:[#allocation8] sm:$0xff] %v4829_v40  ;;  %v4710_v42 = vmax.f32 %v4698_v21, %v4699_v35  ;;  %v4594_v4 = vadd.f32 %v9034_v8, %v4264_v29  ;;  %v4265_v16 = vadd.f32 %v4205_v28, %v3935_v20  ;;  %v4700_v47 = vmax.f32 %v4684_v54, 0.0  ;;  %v9044_v24 = vld [vmem:[#allocation22_spill] sm:$0xff]  ;;  %v9046_v40 = vld [vmem:[#allocation72_spill] sm:$0xff] }
 0x399   :  { %v4685_v10 = vadd.f32 %v8433_v53, %v4593_v12  ;;  %v4207_v58 = vpop.f32.mrf.mxu1  ;;  %v3611_v51 = vadd.f32 %v9044_v24, %v9043_v17  ;;  %v9047_v35 = vld [vmem:[#allocation44_spill] sm:$0xff]  ;;  %v9048_v29 = vld [vmem:[#allocation62_spill] sm:$0xff] }
 0x39a   :  { %4718 = vst [vmem:[#allocation7 + $0x20] sm:$0xff] %v4710_v42  ;;  %v4686_v43 = vadd.f32 %v8426_v27, %v4594_v4  ;;  %v4595_v55 = vadd.f32 %v8399_v50, %v4265_v16  ;;  %v4266_v25 = vadd.f32 %v4207_v58, %v3936_v32  ;;  %v4738_v50 = vld [vmem:[%s8792_s4] sm:$0x3]  ;;  %v3612_v33 = vadd.f32 %v9048_v29, %v9047_v35  ;;  %v8540_v16 = vpop.f32.mrf.mxu0  ;;  %v9062_v35 = vld [vmem:[#allocation50_spill] sm:$0xff] }
 0x39b   :  { %v4701_v62 = vmax.f32 %v4685_v10, 0.0  ;;  %v4209_v63 = vpop.f32.mrf.mxu1  ;;  %v8533_v11 = vrot.slane %v4738_v50, %v7617_v61  ;;  %v8536_v12 = vrot.slane %v4738_v50, %v7625_v9  ;;  %v3941_v57 = vadd.f32 %v9050_v48, %v3611_v51  ;;  %v9051_v58 = vld [vmem:[#allocation11_spill] sm:$0xff]  ;;  %v9063_v29 = vld [vmem:[#allocation66_spill] sm:$0xff]  ;;  %v9065_v48 = vld [vmem:[#allocation52_spill] sm:$0xff] }
 0x39c   :  { %v4687_v45 = vadd.f32 %v8433_v53, %v4595_v55  ;;  %v4596_v14 = vadd.f32 %v9042_v13, %v4266_v25  ;;  %v4267_v19 = vadd.f32 %v4209_v63, %v3937_v56  ;;  %v4702_v15 = vmax.f32 %v4686_v43, 0.0  ;;  %v9052_v43 = vld [vmem:[#allocation65_spill] sm:$0xff]  ;;  %v9054_v25 = vld [vmem:[#allocation64_spill] sm:$0xff] }
 0x39d   :  { %v4800_v22 = vld [vmem:[#allocation7 + $0x10] ss:$2 sm:$0xff]  ;;  %v4816_v46 = vld [vmem:[#allocation7 + $0x11] ss:$2 sm:$0xff]  ;;  %v4711_v39 = vmax.f32 %v4700_v47, %v4701_v62  ;;  %v4213_v38 = vpop.f32.mrf.mxu1  ;;  %v3613_v55 = vadd.f32 %v9052_v43, %v9051_v58 }
 0x39e   :  { %v4830_v31 = vmax.f32 %v4800_v22, %v4816_v46  ;;  %v4703_v30 = vmax.f32 %v4687_v45, 0.0  ;;  %v4688_v20 = vadd.f32 %v8426_v27, %v4596_v14  ;;  %v4597_v21 = vadd.f32 %v9046_v40, %v4267_v19  ;;  %v9049_v27 = vld [vmem:[#allocation12_spill] sm:$0xff]  ;;  %v8555_v45 = vpop.f32.mrf.mxu0  ;;  %v9058_v46 = vld [vmem:[#allocation13_spill] sm:$0xff]  ;;  %v9061_v40 = vld [vmem:[#allocation15_spill] sm:$0xff] }
 0x39f   :  { %4719 = vst [vmem:[#allocation7 + $0x28] sm:$0xff] %v4711_v39  ;;  %v4268_v0 = vadd.f32 %v4213_v38, %v3938_v37  ;;  %v4215_v54 = vpop.f32.mrf.mxu1  ;;  %v3940_v4 = vadd.f32 %v9049_v27, %v3610_v6  ;;  %v9055_v62 = vld [vmem:[#allocation48_spill] sm:$0xff]  ;;  %v9060_v38 = vld [vmem:[#allocation14_spill] sm:$0xff]  ;;  %v9064_v27 = vld [vmem:[#allocation51_spill] sm:$0xff] }
 0x3a0   :  { %4838 = vst [vmem:[#allocation8 + $0x8] sm:$0xff] %v4830_v31  ;;  %v4712_v28 = vmax.f32 %v4702_v15, %v4703_v30  ;;  %v4689_v42 = vadd.f32 %v8433_v53, %v4597_v21  ;;  %v4269_v8 = vadd.f32 %v4215_v54, %v3939_v36  ;;  %v4704_v61 = vmax.f32 %v4688_v20, 0.0  ;;  %v9053_v53 = vld [vmem:[#allocation46_spill] sm:$0xff]  ;;  %v9059_v39 = vld [vmem:[#allocation24_spill] sm:$0xff] }
 0x3a1   :  { %v4598_v60 = vadd.f32 %v8436_v41, %v4268_v0  ;;  %v4217_v32 = vpop.f32.mrf.mxu1  ;;  %v3614_v2 = vadd.f32 %v9054_v25, %v9053_v53  ;;  %v3942_v41 = vadd.f32 %v9055_v62, %v3612_v33  ;;  %v3943_v3 = vadd.f32 %v9060_v38, %v3613_v55  ;;  %v4567_v0 = vpop.f32.mrf.mxu0 }
 0x3a2   :  { %4720 = vst [vmem:[#allocation7 + $0x30] sm:$0xff] %v4712_v28  ;;  %v4705_v5 = vmax.f32 %v4689_v42, 0.0  ;;  %v4599_v9 = vadd.f32 %v8450_v26, %v4269_v8  ;;  %v4270_v10 = vadd.f32 %v4217_v32, %v3940_v4  ;;  %v9057_v26 = vld [vmem:[#allocation23_spill] sm:$0xff]  ;;  %v3617_v33 = vadd.f32 %v9063_v29, %v9062_v35 }
 0x3a3   :  { %v4750_v56 = vadd.f32 %v8533_v11, %v4598_v60  ;;  %v4219_v47 = vpop.f32.mrf.mxu1  ;;  %v3615_v6 = vadd.f32 %v9057_v26, %v9056_v49  ;;  %v3944_v21 = vadd.f32 %v9061_v40, %v3614_v2  ;;  %v4569_v55 = vpop.f32.mrf.mxu0  ;;  %v9072_v26 = vld [vmem:[#allocation25_spill] sm:$0xff]  ;;  %v9076_v40 = vld [vmem:[#allocation84_spill] sm:$0xff]  ;;  %v9077_v35 = vld [vmem:[#allocation55_spill] sm:$0xff] }
 0x3a4   :  { %v4713_v63 = vmax.f32 %v4704_v61, %v4705_v5  ;;  %v4751_v7 = vadd.f32 %v8536_v12, %v4599_v9  ;;  %v4600_v37 = vadd.f32 %v8460_v59, %v4270_v10  ;;  %v4271_v1 = vadd.f32 %v4219_v47, %v3941_v57  ;;  %v9066_v61 = vld [vmem:[#allocation16_spill] sm:$0xff]  ;;  %v9067_v5 = vld [vmem:[#allocation69_spill] sm:$0xff]  ;;  %v9068_v47 = vld [vmem:[#allocation82_spill] sm:$0xff] }
 0x3a5   :  { %v4766_v13 = vmax.f32 %v4750_v56, 0.0  ;;  %v4223_v14 = vpop.f32.mrf.mxu1  ;;  %v3616_v59 = vadd.f32 %v9059_v39, %v9058_v46  ;;  %v3945_v4 = vadd.f32 %v9064_v27, %v3615_v6  ;;  %v3618_v9 = vadd.f32 %v9067_v5, %v9066_v61  ;;  %v4573_v46 = vpop.f32.mrf.mxu0  ;;  %v9075_v39 = vld [vmem:[#allocation26_spill] sm:$0xff] }
 0x3a6   :  { %v4802_v19 = vld [vmem:[#allocation7 + $0x20] ss:$2 sm:$0xff]  ;;  %v4818_v50 = vld [vmem:[#allocation7 + $0x21] ss:$2 sm:$0xff]  ;;  %4721 = vst [vmem:[#allocation7 + $0x38] sm:$0xff] %v4713_v63  ;;  %v4767_v17 = vmax.f32 %v4751_v7, 0.0  ;;  %v4752_v24 = vadd.f32 %v8533_v11, %v4600_v37  ;;  %v4601_v51 = vadd.f32 %v8471_v23, %v4271_v1  ;;  %v4272_v22 = vadd.f32 %v4223_v14, %v3942_v41 }
 0x3a7   :  { %v4831_v15 = vmax.f32 %v4802_v19, %v4818_v50  ;;  %v4225_v36 = vpop.f32.mrf.mxu1  ;;  %v3946_v57 = vadd.f32 %v9065_v48, %v3616_v59  ;;  %v3947_v62 = vadd.f32 %v9068_v47, %v3617_v33  ;;  %v9069_v37 = vld [vmem:[#allocation53_spill] sm:$0xff]  ;;  %v9070_v1 = vld [vmem:[#allocation68_spill] sm:$0xff]  ;;  %v9078_v33 = vld [vmem:[#allocation54_spill] sm:$0xff]  ;;  %v4575_v27 = vpop.f32.mrf.mxu0 }
 0x3a8   :  { %v4782_v31 = vmax.f32 %v4766_v13, %v4767_v17  ;;  %v4753_v30 = vadd.f32 %v8536_v12, %v4601_v51  ;;  %v4602_v20 = vadd.f32 %v8486_v18, %v4272_v22  ;;  %v4273_v23 = vadd.f32 %v4225_v36, %v3943_v3  ;;  %v9073_v51 = vld [vmem:[#allocation18_spill] sm:$0xff] }
 0x3a9   :  { %4839 = vst [vmem:[#allocation8 + $0x10] sm:$0xff] %v4831_v15  ;;  %v4227_v54 = vpop.f32.mrf.mxu1  ;;  %v4768_v28 = vmax.f32 %v4752_v24, 0.0  ;;  %v3619_v49 = vadd.f32 %v9070_v1, %v9069_v37  ;;  %v3948_v22 = vadd.f32 %v9073_v51, %v3618_v9  ;;  %v9082_v61 = vld [vmem:[#allocation86_spill] sm:$0xff] }
 0x3aa   :  { %4790 = vst [vmem:[#allocation7 + $0x40] sm:$0xff] %v4782_v31  ;;  %v4769_v42 = vmax.f32 %v4753_v30, 0.0  ;;  %v4274_v8 = vadd.f32 %v4227_v54, %v3944_v21  ;;  %v4754_v60 = vadd.f32 %v8533_v11, %v4602_v20  ;;  %v4603_v32 = vadd.f32 %v8498_v52, %v4273_v23  ;;  %v9079_v23 = vld [vmem:[#allocation73_spill] sm:$0xff] }
 0x3ab   :  { %v4229_v18 = vpop.f32.mrf.mxu1  ;;  %v3949_v21 = vadd.f32 %v9076_v40, %v3619_v49  ;;  %v3622_v54 = vadd.f32 %v9079_v23, %v9078_v33 }
 0x3ac   :  { %v4783_v10 = vmax.f32 %v4768_v28, %v4769_v42  ;;  %v4604_v58 = vadd.f32 %v8509_v44, %v4274_v8  ;;  %v4275_v43 = vadd.f32 %v4229_v18, %v3945_v4  ;;  %v4755_v2 = vadd.f32 %v8536_v12, %v4603_v32  ;;  %v9071_v44 = vld [vmem:[#allocation79_spill] sm:$0xff]  ;;  %v9080_v4 = vld [vmem:[#allocation57_spill] sm:$0xff] }
 0x3ad   :  { %v4804_v53 = vld [vmem:[#allocation7 + $0x30] ss:$2 sm:$0xff]  ;;  %v4820_v25 = vld [vmem:[#allocation7 + $0x31] ss:$2 sm:$0xff]  ;;  %v4233_v56 = vpop.f32.mrf.mxu1  ;;  %v3620_v6 = vadd.f32 %v9072_v26, %v9071_v44  ;;  %v4770_v13 = vmax.f32 %v4754_v60, 0.0 }
 0x3ae   :  { %v4832_v41 = vmax.f32 %v4804_v53, %v4820_v25  ;;  %4791 = vst [vmem:[#allocation7 + $0x48] sm:$0xff] %v4783_v10  ;;  %v4756_v52 = vadd.f32 %v8533_v11, %v4604_v58  ;;  %v4605_v63 = vadd.f32 %v8525_v34, %v4275_v43  ;;  %v4276_v7 = vadd.f32 %v4233_v56, %v3946_v57  ;;  %v9074_v34 = vld [vmem:[#allocation17_spill] sm:$0xff]  ;;  %v9081_v60 = vld [vmem:[#allocation71_spill] sm:$0xff] }
 0x3af   :  { %v4771_v14 = vmax.f32 %v4755_v2, 0.0  ;;  %v4235_v19 = vpop.f32.mrf.mxu1  ;;  %v3621_v59 = vadd.f32 %v9075_v39, %v9074_v34  ;;  %v3950_v29 = vadd.f32 %v9077_v35, %v3620_v6  ;;  %v3623_v32 = vadd.f32 %v9081_v60, %v9080_v4  ;;  %v9084_v44 = vld [vmem:[#allocation19_spill] sm:$0xff]  ;;  %v6605_v60 = vld [vmem:[%s8791_s5 + $0x30] sm:$0xff]  }
 0x3b0   :  { %4840 = vst [vmem:[#allocation8 + $0x18] sm:$0xff] %v4832_v41  ;;  %v4757_v50 = vadd.f32 %v8536_v12, %v4605_v63  ;;  %v4606_v17 = vadd.f32 %v8540_v16, %v4276_v7  ;;  %v4277_v24 = vadd.f32 %v4235_v19, %v3947_v62  ;;  %v4772_v38 = vmax.f32 %v4756_v52, 0.0  ;;  %v9083_v62 = vld [vmem:[#allocation56_spill] sm:$0xff]  ;;  %v4577_v52 = vpop.f32.mrf.mxu0 }
 0x3b1   :  { %v4784_v15 = vmax.f32 %v4770_v13, %v4771_v14  ;;  %v4237_v3 = vpop.f32.mrf.mxu1  ;;  %v3951_v5 = vadd.f32 %v9082_v61, %v3621_v59  ;;  %v3952_v41 = vadd.f32 %v9083_v62, %v3622_v54  ;;  %v3953_v26 = vadd.f32 %v9084_v44, %v3623_v32  ;;  %v6606_v32 = vld [vmem:[%s8791_s5 + $0x130] sm:$0xff]   ;;  %v6610_v61 = vld [vmem:[%s8791_s5 + $0x120] sm:$0xff]  }
 0x3b2   :  { %v4773_v36 = vmax.f32 %v4757_v50, 0.0  ;;  %v4758_v31 = vadd.f32 %v8533_v11, %v4606_v17  ;;  %v4607_v30 = vadd.f32 %v8555_v45, %v4277_v24  ;;  %v4278_v20 = vadd.f32 %v4237_v3, %v3948_v22  ;;  %v4579_v17 = vpop.f32.mrf.mxu0  ;;  %v6622_v44 = vld [vmem:[%s8791_s5 + $0xe0] sm:$0xff]  }
 0x3b3   :  { %4792 = vst [vmem:[#allocation7 + $0x50] sm:$0xff] %v4784_v15  ;;  %v4239_v16 = vpop.f32.mrf.mxu1 }
 0x3b4   :  { %v4785_v28 = vmax.f32 %v4772_v38, %v4773_v36  ;;  %v4759_v42 = vadd.f32 %v8536_v12, %v4607_v30  ;;  %v4608_v8 = vadd.f32 %v4567_v0, %v4278_v20  ;;  %v4279_v48 = vadd.f32 %v4239_v16, %v3949_v21 }
 0x3b5   :  { %v4806_v18 = vld [vmem:[#allocation7 + $0x40] ss:$2 sm:$0xff]  ;;  %v4822_v45 = vld [vmem:[#allocation7 + $0x41] ss:$2 sm:$0xff]  ;;  %v4243_v57 = vpop.f32.mrf.mxu1  ;;  %v4774_v10 = vmax.f32 %v4758_v31, 0.0 }
 0x3b6   :  { %v4833_v9 = vmax.f32 %v4806_v18, %v4822_v45  ;;  %4793 = vst [vmem:[#allocation7 + $0x58] sm:$0xff] %v4785_v28  ;;  %v4775_v58 = vmax.f32 %v4759_v42, 0.0  ;;  %v4280_v43 = vadd.f32 %v4243_v57, %v3950_v29  ;;  %v4760_v53 = vadd.f32 %v8533_v11, %v4608_v8  ;;  %v6604_v8 = vld [vmem:[%s8791_s5 + $0x138] sm:$0xff]   ;;  %v9085_v18 = vld [vmem:[#allocation20_spill] sm:$0xff]  ;;  %v6609_v57 = vld [vmem:[%s8791_s5 + $0x20] sm:$0xff]  }
 0x3b7   :  { %v4609_v25 = vadd.f32 %v4569_v55, %v4279_v48  ;;  %v4245_v2 = vpop.f32.mrf.mxu1  ;;  %v5064_v33 = vld [vmem:[#allocation8 + $0x2] ss:$8 sm:$0xf]  ;;  %v5286_v62 = vld [vmem:[#allocation8 + $0x4] ss:$8 sm:$0xf] }
 0x3b8   :  { %4841 = vst [vmem:[#allocation8 + $0x20] sm:$0xff] %v4833_v9  ;;  %v4786_v0 = vmax.f32 %v4774_v10, %v4775_v58  ;;  %v4610_v56 = vadd.f32 %v4573_v46, %v4280_v43  ;;  %v4281_v47 = vadd.f32 %v4245_v2, %v3951_v5  ;;  %v4776_v6 = vmax.f32 %v4760_v53, 0.0  ;;  %v6607_v45 = vld [vmem:[%s8791_s5 + $0x28] sm:$0xff]   ;;  %v6611_v5 = vld [vmem:[%s8791_s5 + $0x18] sm:$0xff]   ;;  %v6613_v10 = vld [vmem:[%s8791_s5 + $0x10] sm:$0xff]  }
 0x3b9   :  { %v4761_v63 = vadd.f32 %v8536_v12, %v4609_v25  ;;  %v4247_v7 = vpop.f32.mrf.mxu1  ;;  %v6608_v48 = vld [vmem:[%s8791_s5 + $0x128] sm:$0xff]   ;;  %v6612_v9 = vld [vmem:[%s8791_s5 + $0x118] sm:$0xff]   ;;  %v6614_v58 = vld [vmem:[%s8791_s5 + $0x110] sm:$0xff]  }
 0x3ba   :  { %4794 = vst [vmem:[#allocation7 + $0x60] sm:$0xff] %v4786_v0  ;;  %v4762_v37 = vadd.f32 %v8533_v11, %v4610_v56  ;;  %v4611_v1 = vadd.f32 %v4575_v27, %v4281_v47  ;;  %v4282_v49 = vadd.f32 %v4247_v7, %v3952_v41  ;;  %v6615_v43 = vld [vmem:[%s8791_s5 + $0x8] sm:$0xff]   ;;  %v6617_v0 = vld [vmem:[%s8791_s5] sm:$0xff]  }
 0x3bb   :  { %v4777_v55 = vmax.f32 %v4761_v63, 0.0  ;;  %v4249_v13 = vpop.f32.mrf.mxu1  ;;  %v6616_v53 = vld [vmem:[%s8791_s5 + $0x108] sm:$0xff]   ;;  %v6618_v56 = vld [vmem:[%s8791_s5 + $0x100] sm:$0xff]   ;;  %v6619_v63 = vld [vmem:[%s8791_s5 + $0xf8] sm:$0xff]  }
 0x3bc   :  { %v4763_v14 = vadd.f32 %v8536_v12, %v4611_v1  ;;  %v4612_v19 = vadd.f32 %v4577_v52, %v4282_v49  ;;  %v4283_v50 = vadd.f32 %v4249_v13, %v3953_v26  ;;  %v4778_v46 = vmax.f32 %v4762_v37, 0.0  ;;  %v4845_v47 = vld [vmem:[#allocation8] ss:$8 sm:$0xf] }
 0x3bd   :  { %v4808_v24 = vld [vmem:[#allocation7 + $0x50] ss:$2 sm:$0xff]  ;;  %v4824_v51 = vld [vmem:[#allocation7 + $0x51] ss:$2 sm:$0xff]  ;;  %v4787_v22 = vmax.f32 %v4776_v6, %v4777_v55  ;;  %v6620_v1 = vld [vmem:[%s8791_s5 + $0xf0] sm:$0xff]  }
 0x3be   :  { %v4834_v34 = vmax.f32 %v4808_v24, %v4824_v51  ;;  %v4779_v39 = vmax.f32 %v4763_v14, 0.0  ;;  %v4764_v59 = vadd.f32 %v8533_v11, %v4612_v19  ;;  %v4613_v15 = vadd.f32 %v4579_v17, %v4283_v50  ;;  %v4866_v11 = vld [vmem:[#allocation8 + $0x1] ss:$8 sm:$0xf] }
 0x3bf   :  { %4795 = vst [vmem:[#allocation7 + $0x68] sm:$0xff] %v4787_v22  ;;  %v6621_v49 = vld [vmem:[%s8791_s5 + $0xe8] sm:$0xff]   ;;  %v6623_v26 = vld [vmem:[%s8791_s5 + $0xd8] sm:$0xff]   ;;  %v6624_v6 = vld [vmem:[%s8791_s5 + $0xd0] sm:$0xff]  }
 0x3c0   :  { %4842 = vst [vmem:[#allocation8 + $0x28] sm:$0xff] %v4834_v34  ;;  %v4788_v38 = vmax.f32 %v4778_v46, %v4779_v39  ;;  %v4765_v3 = vadd.f32 %v8536_v12, %v4613_v15  ;;  %v4780_v36 = vmax.f32 %v4764_v59, 0.0  ;;  %v6603_v12 = vld [vmem:[%s8791_s5 + $0x38] sm:$0xff]   ;;  %v8699_v55 = vld [vmem:[#allocation2 + $0x100] sm:$0xff]  ;;  %v6625_v13 = vld [vmem:[%s8791_s5 + $0xc8] sm:$0xff]  }
 0x3c1   :  { %v6626_v19 = vld [vmem:[%s8791_s5 + $0xc0] sm:$0xff]   ;;  %v6627_v51 = vld [vmem:[%s8793_s7 + $0x38] sm:$0xff]   ;;  %v6628_v22 = vld [vmem:[%s8793_s7 + $0x30] sm:$0xff]  }
 0x3c2   :  { %4796 = vst [vmem:[#allocation7 + $0x70] sm:$0xff] %v4788_v38  ;;  %v4781_v31 = vmax.f32 %v4765_v3, 0.0  ;;  %v5175_v50 = vld [vmem:[#allocation8 + $0x3] ss:$8 sm:$0xf] }
 0x3c3   :  { %v6629_v46 = vld [vmem:[%s8793_s7 + $0x28] sm:$0xff]   ;;  %v6630_v34 = vld [vmem:[%s8793_s7 + $0x20] sm:$0xff]   ;;  %v6631_v39 = vld [vmem:[%s8793_s7 + $0x18] sm:$0xff]  }
 0x3c4   :  { %v4789_v30 = vmax.f32 %v4780_v36, %v4781_v31  ;;  %v6632_v59 = vld [vmem:[%s8793_s7 + $0x10] sm:$0xff]   ;;  %v6633_v15 = vld [vmem:[%s8793_s7 + $0x8] sm:$0xff]   ;;  %v6634_v38 = vld [vmem:[%s8793_s7] sm:$0xff]  }
 0x3c5   :  { %v6635_v3 = vld [vmem:[%s8794_s9 + $0x38] sm:$0xff]   ;;  %v6636_v36 = vld [vmem:[%s8794_s9 + $0x30] sm:$0xff]   ;;  %v6637_v31 = vld [vmem:[%s8794_s9 + $0x28] sm:$0xff]  }
 0x3c6   :  { %v4810_v20 = vld [vmem:[#allocation7 + $0x60] ss:$2 sm:$0xff]  ;;  %v4826_v40 = vld [vmem:[#allocation7 + $0x61] ss:$2 sm:$0xff]  ;;  %4797 = vst [vmem:[#allocation7 + $0x78] sm:$0xff] %v4789_v30  ;;  %v6638_v30 = vld [vmem:[%s8794_s9 + $0x20] sm:$0xff]  }
 0x3c7   :  { %v4835_v21 = vmax.f32 %v4810_v20, %v4826_v40  ;;  %v6639_v20 = vld [vmem:[%s8794_s9 + $0x18] sm:$0xff]   ;;  %v6640_v40 = vld [vmem:[%s8794_s9 + $0x10] sm:$0xff]  }
 0x3c9   :  { %4843 = vst [vmem:[#allocation8 + $0x30] sm:$0xff] %v4835_v21 }
 0x3cd   :  { %v4812_v16 = vld [vmem:[#allocation7 + $0x70] ss:$2 sm:$0xff]  ;;  %v4828_v35 = vld [vmem:[#allocation7 + $0x71] ss:$2 sm:$0xff] }
 0x3ce   :  { %v4836_v29 = vmax.f32 %v4812_v16, %v4828_v35 }
 0x3d0   :  { %4844 = vst [vmem:[#allocation8 + $0x38] sm:$0xff] %v4836_v29 }
 0x3d7   :  { %v4867_v23 = vld [vmem:[#allocation8 + $0x1] ss:$8 sm:$0xf0]  ;;  %v5065_v54 = vld [vmem:[#allocation8 + $0x2] ss:$8 sm:$0xf0] }
 0x3d8   :  { %v4868_v28 = vor.u32 %v4867_v23, %v4866_v11  ;;  %v5066_v42 = vor.u32 %v5065_v54, %v5064_v33  ;;  %v4846_v25 = vld [vmem:[#allocation8] ss:$8 sm:$0xf0]  ;;  %v5287_v2 = vld [vmem:[#allocation8 + $0x4] ss:$8 sm:$0xf0] }
 0x3d9   :  { %v4847_v41 = vor.u32 %v4846_v25, %v4845_v47  ;;  %v5288_v52 = vor.u32 %v5287_v2, %v5286_v62  ;;  %v5176_v14 = vld [vmem:[#allocation8 + $0x3] ss:$8 sm:$0xf0] }
 0x3da   :  { %v4869_v27 = vpack.c.bf16 %v4868_v28, %v4868_v28  ;;  %v5067_v4 = vpack.c.bf16 %v5066_v42, %v5066_v42  ;;  %v5177_v17 = vor.u32 %v5176_v14, %v5175_v50  ;;  %v6641_v2 = vld [vmem:[%s8794_s9 + $0x8] sm:$0xff]  }
 0x3db   :  { %v4848_v7 = vpack.c.bf16 %v4847_v41, %v4847_v41  ;;  %v5289_v37 = vpack.c.bf16 %v5288_v52, %v5288_v52 }
 0x3dc   :  { %6205 = vmatmul.mubr.bf16.vlgmr.msra.gmra.mxu1 %v4869_v27  ;;  %6245 = vmatmul.mubr.bf16.vlgmr.msra.gmra.mxu0 %v5067_v4  ;;  %v5178_v24 = vpack.c.bf16 %v5177_v17, %v5177_v17 }
 0x3dd   :  { %6209 = vmatpush3.bf16.msra.mxu1 %v6603_v12  ;;  %6269 = vmatpush3.bf16.msra.mxu0 %v6604_v8 }
 0x3de   :  { %6210 = vmatprep.subr.bf16.mxu1 %v9085_v18  ;;  %6270 = vmatprep.subr.bf16.mxu0 %v9085_v18 }
 0x3df   :  { %6224 = vmatprep.mubr.msk.bf16.mxu1 %vm6648_vm0, %v9085_v18  ;;  %6284 = vmatprep.mubr.msk.bf16.mxu0 %vm6648_vm0, %v9085_v18 }
 0x3e1   :  { %6211 = vmatpush3.bf16.msra.mxu1 %v6605_v60  ;;  %6271 = vmatpush3.bf16.msra.mxu0 %v6606_v32 }
 0x3e2   :  { %6212 = vmatprep.subr.bf16.mxu1 %v9085_v18  ;;  %6272 = vmatprep.subr.bf16.mxu0 %v9085_v18 }
 0x3e5   :  { %6213 = vmatpush3.bf16.msra.mxu1 %v6607_v45  ;;  %6273 = vmatpush3.bf16.msra.mxu0 %v6608_v48 }
 0x3e6   :  { %6214 = vmatprep.subr.bf16.mxu1 %v9085_v18  ;;  %6274 = vmatprep.subr.bf16.mxu0 %v9085_v18 }
 0x3e9   :  { %6215 = vmatpush3.bf16.msra.mxu1 %v6609_v57  ;;  %6275 = vmatpush3.bf16.msra.mxu0 %v6610_v61  ;;  %v6027_v61 = vld [vmem:[%s8795_s6] ss:$0 sm:$0xff] }
 0x3ea   :  { %6216 = vmatprep.subr.bf16.mxu1 %v9085_v18  ;;  %6276 = vmatprep.subr.bf16.mxu0 %v9085_v18 }
 0x3ed   :  { %6217 = vmatpush3.bf16.msra.mxu1 %v6611_v5  ;;  %6277 = vmatpush3.bf16.msra.mxu0 %v6612_v9 }
 0x3ee   :  { %6218 = vmatprep.subr.bf16.mxu1 %v9085_v18  ;;  %6278 = vmatprep.subr.bf16.mxu0 %v9085_v18 }
 0x3f1   :  { %6219 = vmatpush3.bf16.msra.mxu1 %v6613_v10  ;;  %6279 = vmatpush3.bf16.msra.mxu0 %v6614_v58 }
 0x3f2   :  { %6220 = vmatprep.subr.bf16.mxu1 %v9085_v18  ;;  %6280 = vmatprep.subr.bf16.mxu0 %v9085_v18 }
 0x3f5   :  { %6221 = vmatpush3.bf16.msra.mxu1 %v6615_v43  ;;  %6281 = vmatpush3.bf16.msra.mxu0 %v6616_v53 }
 0x3f6   :  { %6222 = vmatprep.subr.bf16.mxu1 %v9085_v18  ;;  %6282 = vmatprep.subr.bf16.mxu0 %v9085_v18 }
 0x3f9   :  { %6223 = vmatpush3.bf16.msra.mxu1 %v6617_v0  ;;  %6283 = vmatpush3.bf16.msra.mxu0 %v6618_v56  ;;  %v6642_v0 = vld [vmem:[%s8794_s9] sm:$0xff]  }
 0x3fa   :  { %6248 = vmatprep.subr.bf16.mxu1 %v9085_v18  ;;  %6308 = vmatprep.subr.bf16.mxu0 %v9085_v18  ;;  %v6028_v56 = vld [vmem:[%s8796_s8] ss:$0 sm:$0xff] }
 0x3fc   :  { %6225 = vmatmul.mubr.bf16.vlgmr.msra.gmra.mxu1 %v4848_v7  ;;  %6285 = vmatmul.mubr.bf16.vlgmr.msra.gmra.mxu0 %v5289_v37 }
 0x3fd   :  { %6249 = vmatpush3.bf16.msra.mxu1 %v6619_v63  ;;  %6264 = vmatprep.mubr.msk.bf16.mxu1 %vm6648_vm0, %v9085_v18 }
 0x3fe   :  { %6250 = vmatprep.subr.bf16.mxu1 %v9085_v18  ;;  %6324 = vmatprep.mubr.msk.bf16.mxu0 %vm6648_vm0, %v9085_v18 }
 0x3ff   :  { %6309 = vmatpush3.bf16.msra.mxu0 %v6635_v3 }
 0x400   :  { %6310 = vmatprep.subr.bf16.mxu0 %v8699_v55 }
 0x401   :  { %6251 = vmatpush3.bf16.msra.mxu1 %v6620_v1  ;;  %v6037_v1 = vld [vmem:[%s8797_s10] ss:$0 sm:$0xff] }
 0x402   :  { %6252 = vmatprep.subr.bf16.mxu1 %v9085_v18 }
 0x403   :  { %6311 = vmatpush3.bf16.msra.mxu0 %v6636_v36 }
 0x404   :  { %6312 = vmatprep.subr.bf16.mxu0 %v8699_v55 }
 0x405   :  { %6253 = vmatpush3.bf16.msra.mxu1 %v6621_v49 }
 0x406   :  { %6254 = vmatprep.subr.bf16.mxu1 %v9085_v18 }
 0x407   :  { %6313 = vmatpush3.bf16.msra.mxu0 %v6637_v31 }
 0x408   :  { %6314 = vmatprep.subr.bf16.mxu0 %v8699_v55 }
 0x409   :  { %6255 = vmatpush3.bf16.msra.mxu1 %v6622_v44 }
 0x40a   :  { %6256 = vmatprep.subr.bf16.mxu1 %v9085_v18 }
 0x40b   :  { %6315 = vmatpush3.bf16.msra.mxu0 %v6638_v30 }
 0x40c   :  { %6316 = vmatprep.subr.bf16.mxu0 %v8699_v55 }
 0x40d   :  { %6257 = vmatpush3.bf16.msra.mxu1 %v6623_v26 }
 0x40e   :  { %6258 = vmatprep.subr.bf16.mxu1 %v8699_v55 }
 0x40f   :  { %6317 = vmatpush3.bf16.msra.mxu0 %v6639_v20 }
 0x410   :  { %6318 = vmatprep.subr.bf16.mxu0 %v8699_v55 }
 0x411   :  { %6259 = vmatpush3.bf16.msra.mxu1 %v6624_v6 }
 0x412   :  { %6260 = vmatprep.subr.bf16.mxu1 %v8699_v55 }
 0x413   :  { %6319 = vmatpush3.bf16.msra.mxu0 %v6640_v40 }
 0x414   :  { %6320 = vmatprep.subr.bf16.mxu0 %v8699_v55 }
 0x415   :  { %6261 = vmatpush3.bf16.msra.mxu1 %v6625_v13 }
 0x416   :  { %6262 = vmatprep.subr.bf16.mxu1 %v8699_v55 }
 0x417   :  { %6321 = vmatpush3.bf16.msra.mxu0 %v6641_v2 }
 0x418   :  { %6322 = vmatprep.subr.bf16.mxu0 %v8699_v55 }
 0x419   :  { %6263 = vmatpush3.bf16.msra.mxu1 %v6626_v19 }
 0x41a   :  { %6288 = vmatprep.subr.bf16.mxu1 %v8699_v55 }
 0x41b   :  { %6323 = vmatpush3.bf16.msra.mxu0 %v6642_v0 }
 0x41c   :  { %6265 = vmatmul.mubr.bf16.vlgmr.msra.gmra.mxu1 %v5178_v24 }
 0x41d   :  { %6304 = vmatprep.mubr.msk.bf16.mxu1 %vm6648_vm0, %v8699_v55  ;;  %6289 = vmatpush3.bf16.msra.mxu1 %v6627_v51 }
 0x41e   :  { %6290 = vmatprep.subr.bf16.mxu1 %v8699_v55 }
 0x421   :  { %6291 = vmatpush3.bf16.msra.mxu1 %v6628_v22 }
 0x422   :  { %6292 = vmatprep.subr.bf16.mxu1 %v8699_v55 }
 0x425   :  { %6293 = vmatpush3.bf16.msra.mxu1 %v6629_v46 }
 0x426   :  { %6294 = vmatprep.subr.bf16.mxu1 %v8699_v55 }
 0x429   :  { %6295 = vmatpush3.bf16.msra.mxu1 %v6630_v34 }
 0x42a   :  { %6296 = vmatprep.subr.bf16.mxu1 %v8699_v55 }
 0x42d   :  { %6297 = vmatpush3.bf16.msra.mxu1 %v6631_v39 }
 0x42e   :  { %6298 = vmatprep.subr.bf16.mxu1 %v8699_v55 }
 0x431   :  { %6299 = vmatpush3.bf16.msra.mxu1 %v6632_v59 }
 0x432   :  { %6300 = vmatprep.subr.bf16.mxu1 %v8699_v55 }
 0x435   :  { %6301 = vmatpush3.bf16.msra.mxu1 %v6633_v15 }
 0x436   :  { %6302 = vmatprep.subr.bf16.mxu1 %v8699_v55 }
 0x439   :  { %6303 = vmatpush3.bf16.msra.mxu1 %v6634_v38 }
 0x49c   :  { %v4969_v21 = vpop.f32.mrf.mxu1  ;;  %v5167_v16 = vpop.f32.mrf.mxu0 }
 0x49e   :  { %v6206_v35 = vpop.f32.mrf.mxu1  ;;  %v6246_v29 = vpop.f32.mrf.mxu0 }
 0x4a0   :  { %v4972_v11 = vpop.f32.mrf.mxu1  ;;  %v5170_v33 = vpop.f32.mrf.mxu0 }
 0x4a2   :  { %v6207_v23 = vpop.f32.mrf.mxu1  ;;  %v6247_v54 = vpop.f32.mrf.mxu0 }
 0x4bc   :  { %v5057_v28 = vpop.f32.mrf.mxu1  ;;  %v5389_v42 = vpop.f32.mrf.mxu0 }
 0x4bd   :  { %v5058_v18 = vadd.f32 %v5057_v28, %v4969_v21 }
 0x4be   :  { %v6226_v12 = vpop.f32.mrf.mxu1  ;;  %v6286_v8 = vpop.f32.mrf.mxu0 }
 0x4bf   :  { %v5173_v45 = vadd.f32 %v5167_v16, %v5058_v18 }
 0x4c0   :  { %v5060_v27 = vpop.f32.mrf.mxu1  ;;  %v5392_v4 = vpop.f32.mrf.mxu0 }
 0x4c2   :  { %v6227_v60 = vpop.f32.mrf.mxu1  ;;  %v6287_v32 = vpop.f32.mrf.mxu0 }
 0x4dc   :  { %v5278_v48 = vpop.f32.mrf.mxu1 }
 0x4dd   :  { %v5284_v57 = vadd.f32 %v5278_v48, %v5173_v45 }
 0x4de   :  { %v6266_v5 = vpop.f32.mrf.mxu1 }
 0x4df   :  { %v5395_v9 = vadd.f32 %v5389_v42, %v5284_v57 }
 0x4e0   :  { %v5281_v10 = vpop.f32.mrf.mxu1 }
 0x4e1   :  { %v5403_v58 = vadd.f32 %v6027_v61, %v5395_v9 }
 0x4e2   :  { %v6267_v43 = vpop.f32.mrf.mxu1 }
 0x4e3   :  { %v5404_v53 = vmax.f32 %v5403_v58, 0.0 }
 0x4e5   :  { %v5405_v25 = vpack.c.bf16 %v5404_v53, %v5404_v53 }
 0x4e7   :  { %6305 = vmatmul.mubr.bf16.vlgmr.msra.gmra.mxu1 %v5405_v25 }
 0x5a7   :  { %v5511_v47 = vpop.f32.mrf.mxu1 }
 0x5a8   :  { %v5512_v62 = vadd.f32 %v6028_v56, %v5511_v47 }
 0x5a9   :  { %v6306_v41 = vpop.f32.mrf.mxu1 }
 0x5aa   :  { %v5517_v52 = vmax.f32 %v5512_v62, 0.0 }
 0x5ab   :  { %v5514_v63 = vpop.f32.mrf.mxu1 }
 0x5ac   :  { %v5518_v7 = vpack.c.bf16 %v5517_v52, %v5517_v52 }
 0x5ad   :  { %v6307_v37 = vpop.f32.mrf.mxu1 }
 0x5ae   :  { %6325 = vmatmul.mubr.bf16.vlgmr.msra.gmra.mxu0 %v5518_v7 }
 0x66e   :  { %v5624_v49 = vpop.f32.mrf.mxu0 }
 0x66f   :  { %v5625_v44 = vadd.f32 %v6037_v1, %v5624_v49 }
 0x670   :  { %v6326_v26 = vpop.f32.mrf.mxu0 }
 0x671   :  { %5630 = vst [vmem:[%s8798_s11] sm:$0xff] %v5625_v44 }
 0x672   :  { %v5627_v6 = vpop.f32.mrf.mxu0 }
 0x674   :  { %v6327_v55 = vpop.f32.mrf.mxu0 }

</bundles_post_ra>
